<compile_context>
chip_gen: v7x
topology: tpu7x:2x2x1
jax: 0.10.0
libtpu: 0.0.40
codegen_flags: <defaults>
</compile_context>

<pallas_src>
import functools
import inspect

import jax
import jax.numpy as jnp
from jax.experimental import pallas as pl
from jax.experimental.pallas import tpu as pltpu

NB_CONV = 4      # conv kernel size
NB_FILTERS = 32  # conv channels
NB_POOL = 2      # pool size / stride
NUM_CLASSES = 10
HIDDEN = 128

_HIGHEST = jax.lax.Precision.HIGHEST  # reference only


def _round_up(x, m):
    return ((x + m - 1) // m) * m


def _supports_pipeline_mode():
    try:
        return hasattr(pl, "Buffered") and (
            "pipeline_mode" in inspect.signature(pl.BlockSpec).parameters)
    except (TypeError, ValueError):
        return False


_HAS_PIPELINE_MODE = _supports_pipeline_mode()


def _weight_spec(shape):
    """BlockSpec for a grid-invariant (weight/bias) input; single-buffered."""
    imap = lambda i: (0,) * len(shape)
    if _HAS_PIPELINE_MODE:
        return pl.BlockSpec(shape, imap, pipeline_mode=pl.Buffered(1))
    return pl.BlockSpec(shape, imap)


# ---------------------------------------------------------------------------
# One-time weight lowering (hoisted out of the per-call path)
# ---------------------------------------------------------------------------
def lower_conv_weight(w, w_in):
    """(k,k,cin,cout) -> (k, w_in*cin, ow*cout) block-Toeplitz along width.

    lowered[kh, (j+kw)*cin + ci, j*cout + co] = w[kh, kw, ci, co], so that
    conv(x)[i, j*cout+co] = sum_kh (x2d[i+kh, :] @ lowered[kh])[j*cout+co]
    with x2d laid out as (H, W*cin).
    """
    k, _, cin, cout = w.shape
    ow = w_in - k + 1
    wpos = jnp.arange(w_in)[:, None]              # (w_in, 1)
    j = jnp.arange(ow)[None, :]                   # (1, ow)
    kw_idx = wpos - j                             # (w_in, ow)
    valid = (kw_idx >= 0) & (kw_idx < k)
    g = w[:, jnp.clip(kw_idx, 0, k - 1)]          # (k, w_in, ow, cin, cout)
    g = jnp.where(valid[None, :, :, None, None], g, 0.0)
    g = jnp.transpose(g, (0, 1, 3, 2, 4))         # (k, w_in, cin, ow, cout)
    return g.reshape(k, w_in * cin, ow * cout)


def prepare_lowered_params(params, input_shape):
    """Precompute lane-padded, kh-stacked, bf16 kernel weights (call once)."""
    cin, h, w = input_shape
    k, c = NB_CONV, NB_FILTERS
    oh1, ow1 = h - k + 1, w - k + 1
    oh2, ow2 = oh1 - k + 1, ow1 - k + 1
    ph, pw = oh2 // NB_POOL, ow2 // NB_POOL
    hidden = params["w3"].shape[1]
    num_classes = params["w4"].shape[1]
    assert params["w3"].shape[0] == ph * pw * c

    ow1cp = _round_up(ow1 * c, 128)               # 416 -> 512
    ow2cp = _round_up(ow2 * c, 128)               # 320 -> 384
    hid_p = _round_up(hidden, 128)
    out_p = _round_up(num_classes, 128)

    # conv1: kh-stacked block-Toeplitz, N lane-padded  -> (k*W*Cin, ow1cp)
    l1 = lower_conv_weight(params["w1"].astype(jnp.float32), w)
    l1 = jnp.pad(l1, ((0, 0), (0, 0), (0, ow1cp - ow1 * c)))
    w1l = l1.reshape(k * w * cin, ow1cp).astype(jnp.bfloat16)

    # conv2: K rows for conv1's padded lanes are zero   -> (k*ow1cp, ow2cp)
    l2 = lower_conv_weight(params["w2"].astype(jnp.float32), ow1)
    l2 = jnp.pad(l2, ((0, 0), (0, ow1cp - ow1 * c), (0, ow2cp - ow2 * c)))
    w2l = l2.reshape(k * ow1cp, ow2cp).astype(jnp.bfloat16)

    b1t = jnp.pad(jnp.tile(params["b1"].astype(jnp.float32), ow1),
                  (0, ow1cp - ow1 * c)).reshape(1, ow1cp)
    b2t = jnp.pad(jnp.tile(params["b2"].astype(jnp.float32), ow2),
                  (0, ow2cp - ow2 * c)).reshape(1, ow2cp)

    # dense (maxpool+flatten absorbed): rows laid out (pi, wcol, channel) over
    # the padded width; only even wcol < 2*pw carry pooled values, the rest
    # (odd / pad columns produced by the in-kernel shift-max) get zero rows.
    nwc = ow2cp // c
    w3r = params["w3"].astype(jnp.float32).reshape(ph, pw, c, hidden)
    w3b = jnp.zeros((ph, nwc, c, hidden), jnp.float32)
    w3b = w3b.at[:, 0:2 * pw:2].set(w3r)
    w3b = jnp.pad(w3b.reshape(ph * nwc * c, hidden),
                  ((0, 0), (0, hid_p - hidden))).astype(jnp.bfloat16)
    b3p = jnp.pad(params["b3"].astype(jnp.float32),
                  (0, hid_p - hidden)).reshape(1, hid_p)

    w4p = jnp.pad(params["w4"].astype(jnp.float32),
                  ((0, hid_p - hidden), (0, out_p - num_classes))
                  ).astype(jnp.bfloat16)
    b4p = jnp.pad(params["b4"].astype(jnp.float32),
                  (0, out_p - num_classes)).reshape(1, out_p)

    return {"w1l": w1l, "b1t": b1t, "w2l": w2l, "b2t": b2t,
            "w3b": w3b, "b3p": b3p, "w4p": w4p, "b4p": b4p}


# ---------------------------------------------------------------------------
# The fused Pallas kernel (one block of B samples per grid step)
# ---------------------------------------------------------------------------
def _fused_kernel(x_ref, w1_ref, b1_ref, w2_ref, b2_ref, w3_ref, b3_ref,
                  w4_ref, b4_ref, o_ref, *, k, c):
    bsz, oh1, kwc = x_ref.shape
    oh2 = oh1 - k + 1
    ph = oh2 // 2                               # nb_pool == 2
    ow1cp = w1_ref.shape[1]                     # lane-padded OW1*C
    ow2cp = w2_ref.shape[1]                     # lane-padded OW2*C
    assert w2_ref.shape[0] == k * ow1cp
    assert w3_ref.shape[0] == ph * ow2cp

    # ---- conv1 + bias + ReLU: one bf16 MXU matmul (kh pre-stacked along K) --
    x2 = x_ref[...].reshape(bsz * oh1, kwc).astype(jnp.bfloat16)
    a1 = jnp.dot(x2, w1_ref[...], preferred_element_type=jnp.float32)
    h1 = jnp.maximum(a1 + b1_ref[...], 0.0)                  # (B*OH1, ow1cp)
    h1 = h1.reshape(bsz, oh1, ow1cp)

    # ---- conv2 + bias + ReLU: concat k row-shifted slices (128-aligned) ----
    xc2 = jnp.concatenate([h1[:, kh:kh + oh2, :] for kh in range(k)], axis=-1)
    xc2 = xc2.reshape(bsz * oh2, k * ow1cp).astype(jnp.bfloat16)
    a2 = jnp.dot(xc2, w2_ref[...], preferred_element_type=jnp.float32)
    h2 = jnp.maximum(a2 + b2_ref[...], 0.0)                  # (B*OH2, ow2cp)
    h2 = h2.reshape(bsz, oh2, ow2cp)

    # ---- 2x2 max-pool (vectorized) fused with Flatten + Linear(->HIDDEN) ---
    # Vertical pool: row-pair max.  Horizontal pool: max with a C-lane
    # rotation; odd / pad columns are neutralized by zero rows of w3_ref, so
    # the NHWC flatten/gather costs nothing and the FC is ONE matmul.
    parts = []
    for pi in range(ph):
        r = jnp.maximum(h2[:, 2 * pi, :], h2[:, 2 * pi + 1, :])   # (B, ow2cp)
        r_rot = jnp.concatenate([r[:, c:], r[:, :c]], axis=-1)    # shift by C
        parts.append(jnp.maximum(r, r_rot))
    pooled = jnp.concatenate(parts, axis=-1).astype(jnp.bfloat16)  # (B, ph*ow2cp)

    d = jnp.dot(pooled, w3_ref[...],
                preferred_element_type=jnp.float32) + b3_ref[...]  # (B, hid_p)

    # dropout2d: identity in eval; BatchNorm1d: batchnorm=False -> skipped.
    # fc: ReLU -> Linear(HIDDEN -> num_classes), lane-padded to 128 columns.
    out = jnp.dot(jnp.maximum(d, 0.0).astype(jnp.bfloat16), w4_ref[...],
                  preferred_element_type=jnp.float32) + b4_ref[...]
    o_ref[0] = out


# ---------------------------------------------------------------------------
# Model
# ---------------------------------------------------------------------------
def init_params(key, input_shape=(1, 16, 16), num_classes=NUM_CLASSES):
    cin, h, w = input_shape
    k = NB_CONV
    oh1, ow1 = h - k + 1, w - k + 1
    oh2, ow2 = oh1 - k + 1, ow1 - k + 1
    ph, pw = oh2 // NB_POOL, ow2 // NB_POOL
    flat = ph * pw * NB_FILTERS

    ks = jax.random.split(key, 8)
    s = 0.1
    return {
        # conv weights stored as (KH, KW, Cin, Cout) (== torch weight.permute(2,3,1,0))
        "w1": jax.random.normal(ks[0], (k, k, cin, NB_FILTERS), jnp.float32) * s,
        "b1": jax.random.normal(ks[1], (NB_FILTERS,), jnp.float32) * s,
        "w2": jax.random.normal(ks[2], (k, k, NB_FILTERS, NB_FILTERS), jnp.float32) * s,
        "b2": jax.random.normal(ks[3], (NB_FILTERS,), jnp.float32) * s,
        # Linear weights stored as (in, out) (== torch weight.T), NHWC-flat row order
        "w3": jax.random.normal(ks[4], (flat, HIDDEN), jnp.float32) * s,
        "b3": jax.random.normal(ks[5], (HIDDEN,), jnp.float32) * s,
        "w4": jax.random.normal(ks[6], (HIDDEN, num_classes), jnp.float32) * s,
        "b4": jax.random.normal(ks[7], (num_classes,), jnp.float32) * s,
    }


@functools.partial(jax.jit, static_argnames=("num_classes", "block_b"))
def bay_shallow_cnn_forward(x_nchw, lowered, *, num_classes=NUM_CLASSES,
                            block_b=None):
    n, cin, h, w = x_nchw.shape
    k, c = NB_CONV, NB_FILTERS
    oh1 = h - k + 1
    oh2 = oh1 - k + 1

    w1l, b1t = lowered["w1l"], lowered["b1t"]
    w2l, b2t = lowered["w2l"], lowered["b2t"]
    w3b, b3p = lowered["w3b"], lowered["b3p"]
    w4p, b4p = lowered["w4p"], lowered["b4p"]
    out_p = w4p.shape[1]

    assert w1l.shape[0] == k * w * cin, "lowered params inconsistent with x"
    assert w2l.shape[0] == k * w1l.shape[1]
    assert w3b.shape[0] == (oh2 // NB_POOL) * w2l.shape[1]

    # Batch block per grid step; keep >=2 grid steps (v7x has 2 TensorCores).
    if block_b is None:
        bb = max(1, min(16, n // 2)) if n > 1 else 1
    else:
        bb = max(1, min(block_b, n))
    nblocks = -(-n // bb)
    n_pad = nblocks * bb

    # Per-call input prep (tiny): NCHW -> (n, H, W*Cin) with channels on
    # lanes, then the k row-shifted slices concatenated along lanes so conv1
    # is a single matmul in the kernel.
    x2d = jnp.transpose(x_nchw, (0, 2, 3, 1)).reshape(n, h, w * cin)
    x2d = x2d.astype(jnp.float32)
    xcat = jnp.concatenate([x2d[:, kh:kh + oh1, :] for kh in range(k)], axis=-1)
    if n_pad != n:
        xcat = jnp.pad(xcat, ((0, n_pad - n), (0, 0), (0, 0)))

    kern = functools.partial(_fused_kernel, k=k, c=c)

    out = pl.pallas_call(
        kern,
        out_shape=jax.ShapeDtypeStruct((nblocks, bb, out_p), jnp.float32),
        grid=(nblocks,),
        in_specs=[
            pl.BlockSpec((bb, oh1, k * w * cin), lambda i: (i, 0, 0)),
            _weight_spec(w1l.shape), _weight_spec(b1t.shape),
            _weight_spec(w2l.shape), _weight_spec(b2t.shape),
            _weight_spec(w3b.shape), _weight_spec(b3p.shape),
            _weight_spec(w4p.shape), _weight_spec(b4p.shape),
        ],
        out_specs=pl.BlockSpec((1, bb, out_p), lambda i: (i, 0, 0)),
        compiler_params=pltpu.CompilerParams(
            dimension_semantics=("parallel",)),
    )(xcat, w1l, b1t, w2l, b2t, w3b, b3p, w4p, b4p)

    return out.reshape(n_pad, out_p)[:n, :num_classes]


# ---------------------------------------------------------------------------
# Pure-JAX reference (independent formulation: lax.conv + reduce_window, f32)
# ---------------------------------------------------------------------------
def reference_forward(x_nchw, params):
    x = jnp.transpose(x_nchw, (0, 2, 3, 1)).astype(jnp.float32)   # NHWC
    dn = ("NHWC", "HWIO", "NHWC")
    h1 = jax.lax.conv_general_dilated(x, params["w1"], (1, 1), "VALID",
                                      dimension_numbers=dn, precision=_HIGHEST)
    h1 = jnp.maximum(h1 + params["b1"], 0.0)
    h2 = jax.lax.conv_general_dilated(h1, params["w2"], (1, 1), "VALID",
                                      dimension_numbers=dn, precision=_HIGHEST)
    h2 = jnp.maximum(h2 + params["b2"], 0.0)
    pooled = jax.lax.reduce_window(h2, -jnp.inf, jax.lax.max,
                                   (1, NB_POOL, NB_POOL, 1),
                                   (1, NB_POOL, NB_POOL, 1), "VALID")
    flat = pooled.reshape(x.shape[0], -1)                         # NHWC flatten
    d = jnp.dot(flat, params["w3"], precision=_HIGHEST) + params["b3"]
    return jnp.dot(jnp.maximum(d, 0.0), params["w4"],
                   precision=_HIGHEST) + params["b4"]


if __name__ == "__main__":
    key = jax.random.PRNGKey(0)
    k_param, k_x = jax.random.split(key)

    input_shape = (1, 16, 16)          # (C, H, W), consistent with the module
    batch = 8                          # -> B=4 per grid step, grid=(2,)
    params = init_params(k_param, input_shape=input_shape,
                         num_classes=NUM_CLASSES)
    lowered = prepare_lowered_params(params, input_shape)   # one-time lowering

    x = jax.random.normal(k_x, (batch,) + input_shape, jnp.float32)  # NCHW

    out = jax.block_until_ready(
        bay_shallow_cnn_forward(x, lowered, num_classes=NUM_CLASSES))
    assert out.shape == (batch, NUM_CLASSES), out.shape

    ref = jax.block_until_ready(reference_forward(x, params))
    max_diff = float(jnp.max(jnp.abs(out - ref)))
    rel = float(jnp.linalg.norm(out - ref) / jnp.linalg.norm(ref))
    # bf16 MXU operands in the kernel vs f32/HIGHEST reference.
    assert jnp.allclose(out, ref, rtol=3e-2, atol=2e-2), \
        f"max|diff|={max_diff}, rel={rel}"
    assert rel < 2e-2, f"relative Frobenius error {rel}"

    print("KERNEL_OK")
</pallas_src>

<mosaic_0001>
module attributes {stable_mosaic.version = 11 : i64} {
  func.func @_fused_kernel(%arg0: i32, %arg1: memref<4x13x64xf32, #tpu.memory_space<vmem>>, %arg2: memref<64x512xbf16, #tpu.memory_space<vmem>>, %arg3: memref<1x512xf32, #tpu.memory_space<vmem>>, %arg4: memref<2048x384xbf16, #tpu.memory_space<vmem>>, %arg5: memref<1x384xf32, #tpu.memory_space<vmem>>, %arg6: memref<1920x128xbf16, #tpu.memory_space<vmem>>, %arg7: memref<1x128xf32, #tpu.memory_space<vmem>>, %arg8: memref<128x128xbf16, #tpu.memory_space<vmem>>, %arg9: memref<1x128xf32, #tpu.memory_space<vmem>>, %arg10: memref<1x4x128xf32, #tpu.memory_space<vmem>>) attributes {dimension_semantics = [#tpu.dimension_semantics<parallel>], iteration_bounds = array<i64: 2>, scalar_prefetch = 0 : i64, scratch_operands = 0 : i64, tpu.core_type = #tpu.core_type<tc>, window_params = [{transform_indices = @transform_0, window_bounds = array<i64: 4, 13, 64>}, {pipeline_mode = #tpu.pipeline_mode<synchronous>, transform_indices = @transform_1, window_bounds = array<i64: 64, 512>}, {pipeline_mode = #tpu.pipeline_mode<synchronous>, transform_indices = @transform_2, window_bounds = array<i64: 1, 512>}, {pipeline_mode = #tpu.pipeline_mode<synchronous>, transform_indices = @transform_3, window_bounds = array<i64: 2048, 384>}, {pipeline_mode = #tpu.pipeline_mode<synchronous>, transform_indices = @transform_4, window_bounds = array<i64: 1, 384>}, {pipeline_mode = #tpu.pipeline_mode<synchronous>, transform_indices = @transform_5, window_bounds = array<i64: 1920, 128>}, {pipeline_mode = #tpu.pipeline_mode<synchronous>, transform_indices = @transform_6, window_bounds = array<i64: 1, 128>}, {pipeline_mode = #tpu.pipeline_mode<synchronous>, transform_indices = @transform_7, window_bounds = array<i64: 128, 128>}, {pipeline_mode = #tpu.pipeline_mode<synchronous>, transform_indices = @transform_8, window_bounds = array<i64: 1, 128>}, {transform_indices = @transform_9, window_bounds = array<i64: 1, 4, 128>}]} {
    %c0 = arith.constant 0 : index
    %c0_0 = arith.constant 0 : index
    %c0_1 = arith.constant 0 : index
    %0 = vector.load %arg1[%c0, %c0_0, %c0_1] : memref<4x13x64xf32, #tpu.memory_space<vmem>>, vector<4x13x64xf32>
    %1 = vector.shape_cast %0 : vector<4x13x64xf32> to vector<52x64xf32>
    %2 = arith.truncf %1 : vector<52x64xf32> to vector<52x64xbf16>
    %c0_2 = arith.constant 0 : index
    %c0_3 = arith.constant 0 : index
    %3 = vector.load %arg2[%c0_2, %c0_3] : memref<64x512xbf16, #tpu.memory_space<vmem>>, vector<64x512xbf16>
    %cst = arith.constant dense<0.000000e+00> : vector<52x512xf32>
    %4 = tpu.matmul %2, %3, %cst {dimension_numbers = #tpu.dot_dimension_numbers<[1], [0], [0], [1], [0, 0, 1, 1], [], []>} : vector<52x64xbf16>, vector<64x512xbf16>, vector<52x512xf32> -> vector<52x512xf32>
    %c0_4 = arith.constant 0 : index
    %c0_5 = arith.constant 0 : index
    %5 = vector.load %arg3[%c0_4, %c0_5] : memref<1x512xf32, #tpu.memory_space<vmem>>, vector<1x512xf32>
    %6 = vector.broadcast %5 : vector<1x512xf32> to vector<52x512xf32>
    %7 = arith.addf %4, %6 : vector<52x512xf32>
    %cst_6 = arith.constant 0.000000e+00 : f32
    %8 = vector.broadcast %cst_6 : f32 to vector<52x512xf32>
    %9 = arith.maximumf %7, %8 : vector<52x512xf32>
    %10 = vector.shape_cast %9 : vector<52x512xf32> to vector<4x13x512xf32>
    %11 = vector.extract_strided_slice %10 {offsets = [0, 0, 0], sizes = [4, 10, 512], strides = [1, 1, 1]} : vector<4x13x512xf32> to vector<4x10x512xf32>
    %12 = vector.extract_strided_slice %10 {offsets = [0, 1, 0], sizes = [4, 10, 512], strides = [1, 1, 1]} : vector<4x13x512xf32> to vector<4x10x512xf32>
    %13 = vector.extract_strided_slice %10 {offsets = [0, 2, 0], sizes = [4, 10, 512], strides = [1, 1, 1]} : vector<4x13x512xf32> to vector<4x10x512xf32>
    %14 = vector.extract_strided_slice %10 {offsets = [0, 3, 0], sizes = [4, 10, 512], strides = [1, 1, 1]} : vector<4x13x512xf32> to vector<4x10x512xf32>
    %15 = tpu.concatenate %11, %12, %13, %14 in 2 : vector<4x10x512xf32>, vector<4x10x512xf32>, vector<4x10x512xf32>, vector<4x10x512xf32> -> vector<4x10x2048xf32>
    %16 = vector.shape_cast %15 : vector<4x10x2048xf32> to vector<40x2048xf32>
    %17 = arith.truncf %16 : vector<40x2048xf32> to vector<40x2048xbf16>
    %c0_7 = arith.constant 0 : index
    %c0_8 = arith.constant 0 : index
    %18 = vector.load %arg4[%c0_7, %c0_8] : memref<2048x384xbf16, #tpu.memory_space<vmem>>, vector<2048x384xbf16>
    %cst_9 = arith.constant dense<0.000000e+00> : vector<40x384xf32>
    %19 = tpu.matmul %17, %18, %cst_9 {dimension_numbers = #tpu.dot_dimension_numbers<[1], [0], [0], [1], [0, 0, 1, 1], [], []>} : vector<40x2048xbf16>, vector<2048x384xbf16>, vector<40x384xf32> -> vector<40x384xf32>
    %c0_10 = arith.constant 0 : index
    %c0_11 = arith.constant 0 : index
    %20 = vector.load %arg5[%c0_10, %c0_11] : memref<1x384xf32, #tpu.memory_space<vmem>>, vector<1x384xf32>
    %21 = vector.broadcast %20 : vector<1x384xf32> to vector<40x384xf32>
    %22 = arith.addf %19, %21 : vector<40x384xf32>
    %cst_12 = arith.constant 0.000000e+00 : f32
    %23 = vector.broadcast %cst_12 : f32 to vector<40x384xf32>
    %24 = arith.maximumf %22, %23 : vector<40x384xf32>
    %25 = vector.shape_cast %24 : vector<40x384xf32> to vector<4x10x384xf32>
    %26 = vector.extract_strided_slice %25 {offsets = [0, 0, 0], sizes = [4, 1, 384], strides = [1, 1, 1]} : vector<4x10x384xf32> to vector<4x1x384xf32>
    %27 = vector.shape_cast %26 : vector<4x1x384xf32> to vector<4x384xf32>
    %28 = vector.extract_strided_slice %25 {offsets = [0, 1, 0], sizes = [4, 1, 384], strides = [1, 1, 1]} : vector<4x10x384xf32> to vector<4x1x384xf32>
    %29 = vector.shape_cast %28 : vector<4x1x384xf32> to vector<4x384xf32>
    %30 = arith.maximumf %27, %29 : vector<4x384xf32>
    %31 = vector.extract_strided_slice %30 {offsets = [0, 32], sizes = [4, 352], strides = [1, 1]} : vector<4x384xf32> to vector<4x352xf32>
    %32 = vector.extract_strided_slice %30 {offsets = [0, 0], sizes = [4, 32], strides = [1, 1]} : vector<4x384xf32> to vector<4x32xf32>
    %33 = tpu.concatenate %31, %32 in 1 : vector<4x352xf32>, vector<4x32xf32> -> vector<4x384xf32>
    %34 = arith.maximumf %30, %33 : vector<4x384xf32>
    %35 = vector.extract_strided_slice %25 {offsets = [0, 2, 0], sizes = [4, 1, 384], strides = [1, 1, 1]} : vector<4x10x384xf32> to vector<4x1x384xf32>
    %36 = vector.shape_cast %35 : vector<4x1x384xf32> to vector<4x384xf32>
    %37 = vector.extract_strided_slice %25 {offsets = [0, 3, 0], sizes = [4, 1, 384], strides = [1, 1, 1]} : vector<4x10x384xf32> to vector<4x1x384xf32>
    %38 = vector.shape_cast %37 : vector<4x1x384xf32> to vector<4x384xf32>
    %39 = arith.maximumf %36, %38 : vector<4x384xf32>
    %40 = vector.extract_strided_slice %39 {offsets = [0, 32], sizes = [4, 352], strides = [1, 1]} : vector<4x384xf32> to vector<4x352xf32>
    %41 = vector.extract_strided_slice %39 {offsets = [0, 0], sizes = [4, 32], strides = [1, 1]} : vector<4x384xf32> to vector<4x32xf32>
    %42 = tpu.concatenate %40, %41 in 1 : vector<4x352xf32>, vector<4x32xf32> -> vector<4x384xf32>
    %43 = arith.maximumf %39, %42 : vector<4x384xf32>
    %44 = vector.extract_strided_slice %25 {offsets = [0, 4, 0], sizes = [4, 1, 384], strides = [1, 1, 1]} : vector<4x10x384xf32> to vector<4x1x384xf32>
    %45 = vector.shape_cast %44 : vector<4x1x384xf32> to vector<4x384xf32>
    %46 = vector.extract_strided_slice %25 {offsets = [0, 5, 0], sizes = [4, 1, 384], strides = [1, 1, 1]} : vector<4x10x384xf32> to vector<4x1x384xf32>
    %47 = vector.shape_cast %46 : vector<4x1x384xf32> to vector<4x384xf32>
    %48 = arith.maximumf %45, %47 : vector<4x384xf32>
    %49 = vector.extract_strided_slice %48 {offsets = [0, 32], sizes = [4, 352], strides = [1, 1]} : vector<4x384xf32> to vector<4x352xf32>
    %50 = vector.extract_strided_slice %48 {offsets = [0, 0], sizes = [4, 32], strides = [1, 1]} : vector<4x384xf32> to vector<4x32xf32>
    %51 = tpu.concatenate %49, %50 in 1 : vector<4x352xf32>, vector<4x32xf32> -> vector<4x384xf32>
    %52 = arith.maximumf %48, %51 : vector<4x384xf32>
    %53 = vector.extract_strided_slice %25 {offsets = [0, 6, 0], sizes = [4, 1, 384], strides = [1, 1, 1]} : vector<4x10x384xf32> to vector<4x1x384xf32>
    %54 = vector.shape_cast %53 : vector<4x1x384xf32> to vector<4x384xf32>
    %55 = vector.extract_strided_slice %25 {offsets = [0, 7, 0], sizes = [4, 1, 384], strides = [1, 1, 1]} : vector<4x10x384xf32> to vector<4x1x384xf32>
    %56 = vector.shape_cast %55 : vector<4x1x384xf32> to vector<4x384xf32>
    %57 = arith.maximumf %54, %56 : vector<4x384xf32>
    %58 = vector.extract_strided_slice %57 {offsets = [0, 32], sizes = [4, 352], strides = [1, 1]} : vector<4x384xf32> to vector<4x352xf32>
    %59 = vector.extract_strided_slice %57 {offsets = [0, 0], sizes = [4, 32], strides = [1, 1]} : vector<4x384xf32> to vector<4x32xf32>
    %60 = tpu.concatenate %58, %59 in 1 : vector<4x352xf32>, vector<4x32xf32> -> vector<4x384xf32>
    %61 = arith.maximumf %57, %60 : vector<4x384xf32>
    %62 = vector.extract_strided_slice %25 {offsets = [0, 8, 0], sizes = [4, 1, 384], strides = [1, 1, 1]} : vector<4x10x384xf32> to vector<4x1x384xf32>
    %63 = vector.shape_cast %62 : vector<4x1x384xf32> to vector<4x384xf32>
    %64 = vector.extract_strided_slice %25 {offsets = [0, 9, 0], sizes = [4, 1, 384], strides = [1, 1, 1]} : vector<4x10x384xf32> to vector<4x1x384xf32>
    %65 = vector.shape_cast %64 : vector<4x1x384xf32> to vector<4x384xf32>
    %66 = arith.maximumf %63, %65 : vector<4x384xf32>
    %67 = vector.extract_strided_slice %66 {offsets = [0, 32], sizes = [4, 352], strides = [1, 1]} : vector<4x384xf32> to vector<4x352xf32>
    %68 = vector.extract_strided_slice %66 {offsets = [0, 0], sizes = [4, 32], strides = [1, 1]} : vector<4x384xf32> to vector<4x32xf32>
    %69 = tpu.concatenate %67, %68 in 1 : vector<4x352xf32>, vector<4x32xf32> -> vector<4x384xf32>
    %70 = arith.maximumf %66, %69 : vector<4x384xf32>
    %71 = tpu.concatenate %34, %43, %52, %61, %70 in 1 : vector<4x384xf32>, vector<4x384xf32>, vector<4x384xf32>, vector<4x384xf32>, vector<4x384xf32> -> vector<4x1920xf32>
    %72 = arith.truncf %71 : vector<4x1920xf32> to vector<4x1920xbf16>
    %c0_13 = arith.constant 0 : index
    %c0_14 = arith.constant 0 : index
    %73 = vector.load %arg6[%c0_13, %c0_14] : memref<1920x128xbf16, #tpu.memory_space<vmem>>, vector<1920x128xbf16>
    %cst_15 = arith.constant dense<0.000000e+00> : vector<4x128xf32>
    %74 = tpu.matmul %72, %73, %cst_15 {dimension_numbers = #tpu.dot_dimension_numbers<[1], [0], [0], [1], [0, 0, 1, 1], [], []>} : vector<4x1920xbf16>, vector<1920x128xbf16>, vector<4x128xf32> -> vector<4x128xf32>
    %c0_16 = arith.constant 0 : index
    %c0_17 = arith.constant 0 : index
    %75 = vector.load %arg7[%c0_16, %c0_17] : memref<1x128xf32, #tpu.memory_space<vmem>>, vector<1x128xf32>
    %76 = vector.broadcast %75 : vector<1x128xf32> to vector<4x128xf32>
    %77 = arith.addf %74, %76 : vector<4x128xf32>
    %cst_18 = arith.constant 0.000000e+00 : f32
    %78 = vector.broadcast %cst_18 : f32 to vector<4x128xf32>
    %79 = arith.maximumf %77, %78 : vector<4x128xf32>
    %80 = arith.truncf %79 : vector<4x128xf32> to vector<4x128xbf16>
    %c0_19 = arith.constant 0 : index
    %c0_20 = arith.constant 0 : index
    %81 = vector.load %arg8[%c0_19, %c0_20] : memref<128x128xbf16, #tpu.memory_space<vmem>>, vector<128x128xbf16>
    %cst_21 = arith.constant dense<0.000000e+00> : vector<4x128xf32>
    %82 = tpu.matmul %80, %81, %cst_21 {dimension_numbers = #tpu.dot_dimension_numbers<[1], [0], [0], [1], [0, 0, 1, 1], [], []>} : vector<4x128xbf16>, vector<128x128xbf16>, vector<4x128xf32> -> vector<4x128xf32>
    %c0_22 = arith.constant 0 : index
    %c0_23 = arith.constant 0 : index
    %83 = vector.load %arg9[%c0_22, %c0_23] : memref<1x128xf32, #tpu.memory_space<vmem>>, vector<1x128xf32>
    %84 = vector.broadcast %83 : vector<1x128xf32> to vector<4x128xf32>
    %85 = arith.addf %82, %84 : vector<4x128xf32>
    %c0_24 = arith.constant 0 : index
    %c0_25 = arith.constant 0 : index
    %c0_26 = arith.constant 0 : index
    %86 = vector.load %arg10[%c0_24, %c0_25, %c0_26] : memref<1x4x128xf32, #tpu.memory_space<vmem>>, vector<1x4x128xf32>
    %87 = vector.shape_cast %86 : vector<1x4x128xf32> to vector<4x128xf32>
    %88 = vector.shape_cast %85 : vector<4x128xf32> to vector<1x4x128xf32>
    tpu.vector_store %arg10[%c0_24, %c0_25, %c0_26], %88 {strides = array<i32>} : memref<1x4x128xf32, #tpu.memory_space<vmem>>, vector<1x4x128xf32>,
    return
  }
  func.func @transform_0(%arg0: i32) -> (i32, i32, i32) {
    %c0_i32 = arith.constant 0 : i32
    %c0_i32_0 = arith.constant 0 : i32
    %c0_i32_1 = arith.constant 0 : i32
    return %arg0, %c0_i32, %c0_i32_0 : i32, i32, i32
  }
  func.func @transform_1(%arg0: i32) -> (i32, i32) {
    %c0_i32 = arith.constant 0 : i32
    %c0_i32_0 = arith.constant 0 : i32
    %c0_i32_1 = arith.constant 0 : i32
    return %c0_i32, %c0_i32_0 : i32, i32
  }
  func.func @transform_2(%arg0: i32) -> (i32, i32) {
    %c0_i32 = arith.constant 0 : i32
    %c0_i32_0 = arith.constant 0 : i32
    %c0_i32_1 = arith.constant 0 : i32
    return %c0_i32, %c0_i32_0 : i32, i32
  }
  func.func @transform_3(%arg0: i32) -> (i32, i32) {
    %c0_i32 = arith.constant 0 : i32
    %c0_i32_0 = arith.constant 0 : i32
    %c0_i32_1 = arith.constant 0 : i32
    return %c0_i32, %c0_i32_0 : i32, i32
  }
  func.func @transform_4(%arg0: i32) -> (i32, i32) {
    %c0_i32 = arith.constant 0 : i32
    %c0_i32_0 = arith.constant 0 : i32
    %c0_i32_1 = arith.constant 0 : i32
    return %c0_i32, %c0_i32_0 : i32, i32
  }
  func.func @transform_5(%arg0: i32) -> (i32, i32) {
    %c0_i32 = arith.constant 0 : i32
    %c0_i32_0 = arith.constant 0 : i32
    %c0_i32_1 = arith.constant 0 : i32
    return %c0_i32, %c0_i32_0 : i32, i32
  }
  func.func @transform_6(%arg0: i32) -> (i32, i32) {
    %c0_i32 = arith.constant 0 : i32
    %c0_i32_0 = arith.constant 0 : i32
    %c0_i32_1 = arith.constant 0 : i32
    return %c0_i32, %c0_i32_0 : i32, i32
  }
  func.func @transform_7(%arg0: i32) -> (i32, i32) {
    %c0_i32 = arith.constant 0 : i32
    %c0_i32_0 = arith.constant 0 : i32
    %c0_i32_1 = arith.constant 0 : i32
    return %c0_i32, %c0_i32_0 : i32, i32
  }
  func.func @transform_8(%arg0: i32) -> (i32, i32) {
    %c0_i32 = arith.constant 0 : i32
    %c0_i32_0 = arith.constant 0 : i32
    %c0_i32_1 = arith.constant 0 : i32
    return %c0_i32, %c0_i32_0 : i32, i32
  }
  func.func @transform_9(%arg0: i32) -> (i32, i32, i32) {
    %c0_i32 = arith.constant 0 : i32
    %c0_i32_0 = arith.constant 0 : i32
    %c0_i32_1 = arith.constant 0 : i32
    return %arg0, %c0_i32, %c0_i32_0 : i32, i32, i32
  }
}

</mosaic_0001>

<bundles_post_ra>
// kernel: bay_shallow_cnn_forward.1
= control target key start
LH: loop header
LB: loop body
LE: loop exit
PB: predicated region body
PF: predicated region fallthrough
CT: control target
= control target key end

     0   :  { %s16178_s0 = inlined_call_operand.vmem [shape: f32[8,13,64], index: 0, kind: input, shape index: {}]   ;;  %s16179_s1 = inlined_call_operand.hbm [shape: bf16[64,512], index: 1, kind: input, shape index: {}]   ;;  %s16180_s2 = inlined_call_operand.hbm [shape: f32[1,512], index: 2, kind: input, shape index: {}]   ;;  %s16181_s3 = inlined_call_operand.hbm [shape: bf16[2048,384], index: 3, kind: input, shape index: {}]   ;;  %s16182_s4 = inlined_call_operand.hbm [shape: f32[1,384], index: 4, kind: input, shape index: {}]   ;;  %s16183_s5 = inlined_call_operand.hbm [shape: bf16[1920,128], index: 5, kind: input, shape index: {}]   ;;  %s16184_s6 = inlined_call_operand.hbm [shape: f32[1,128], index: 6, kind: input, shape index: {}]   ;;  %s16185_s7 = inlined_call_operand.hbm [shape: bf16[128,128], index: 7, kind: input, shape index: {}]   ;;  %s16186_s8 = inlined_call_operand.hbm [shape: f32[1,128], index: 8, kind: input, shape index: {}]   ;;  %s16187_s9 = inlined_call_operand.hbm [shape: f32[2,4,128], index: 9, kind: output, shape index: {}]  }
   0x1   :  { %16264 = sst [smem:[#allocation69_spill]] %s16180_s2 }
   0x2   :  { %16265 = sst [smem:[#allocation70_spill]] %s16182_s4 }
   0x3   :  { %14 = vsyncpa [#allocation3], 0 }
   0x4   :  { %15 = vsyncpa [#allocation6], 0 }
   0x5   :  { %16 = vsyncpa [#allocation9], 0 }
   0x6   :  { %17 = vsyncpa [#allocation12], 0 }
   0x7   :  { %18 = vsyncpa [#allocation15], 0 }
   0x8   :  { %19 = vsyncpa [#allocation4], 0 }
   0x9   :  { %21 = vsyncpa [#allocation4 + $0x1], 0  ;;  %s13546_s30 = smov 0   ;;  %s13548_s10 = smov 0  }
   0xa   :  { %s13550_s11 = smov 0   ;;  %s13552_s12 = smov 0  }
   0xb LB: > { %16266 = sst [smem:[#allocation23_spill]] %s13469_s11  ;;  %s13567_s13 = sadd.s32 4294967295, %s13473_s12   ;;  %s13473_s12 = sphi %s13552_s12, %s16391_s12   ;;  %s13469_s11 = sphi %s13550_s11, %s16393_s11   ;;  %s13465_s10 = sphi %s13548_s10, %s16395_s10   ;;  %s13461_s30 = sphi %s13546_s30, %s16394_s30  }
   0xc   : > { %s11052_s14 = sadd.s32 4294967294, %s13473_s12   ;;  %s13571_s15 = sadd.s32 1, %s13473_s12  }
   0xd   : > { %16267 = sst [smem:[#allocation24_spill]] %s13571_s15  ;;  %s228_s16 = sadd.s32 1, %s13469_s11 }
   0xe   : > { %s225_s17 = ssub.s32 %s13473_s12, %s13571_s15  ;;  %p238_p0 = scmp.ne.s32.totalorder %s13469_s11, %s13465_s10 }
   0xf   : > { %p226_p1 = scmp.eq.s32.totalorder %s225_s17, 0  ;;  %p239_p2 = scmp.eq.s32.totalorder %s13567_s13, 1 }
  0x10   : > { %p244_p3 = scmp.ne.s32.totalorder %s13465_s10, %s13461_s30  ;;  %p245_p4 = scmp.eq.s32.totalorder %s11052_s14, 1 }
  0x11   : > { %s13582_s18 = scalar_select %p226_p1, %s13469_s11, %s228_s16  }
  0x12   : > { %p13584_p5 = por %p239_p2, %p238_p0  ;;  %p13588_p6 = por %p245_p4, %p244_p3 }
  0x13   : > { %16268 = sst [smem:[#allocation25_spill]] %s13582_s18  ;;  %p11053_p7 = scmp.ge.s32.totalorder %s13473_s12, 1 }
  0x14   : > { %s16269_s19 = scalar_select %p13584_p5, 1, 0 }
  0x15   : > { %s16270_s20 = scalar_select %p13588_p6, 1, 0 }
  0x16   : > { %p252_p8 = scmp.lt.s32.totalorder %s13473_s12, 3  ;;  %p16188_p9 = scmp.eq.s32.totalorder %s13567_s13, 0 }
  0x17   : > { %s13475_s22 = smov [#allocation5]   ;;  %s13476_s24 = smov [#allocation8]  }
  0x18   : > { %p13595_p10 = pnand %p11053_p7, %p252_p8  ;;  %s278_s23 = sshll.u32 %s13475_s22, 4  ;;  %s279_s23 = int_to_ptr.vmem [resolvable:$true] %s278_s23 }
  0x19   : > { %s302_s25 = sshll.u32 %s13476_s24, 4  ;;  %s13477_s27 = smov [#allocation11]   ;;  %s13607_s25 = int_to_ptr.vmem [resolvable:$true] %s302_s25 }
  0x1a   : > { %s16271_s21 = scalar_select %p13595_p10, 1, 0 }
  0x1b   : > { %p12397_p11 = pneg %p13595_p10  ;;  %s326_s28 = sshll.u32 %s13477_s27, 4  ;;  %s13609_s28 = int_to_ptr.vmem [resolvable:$true] %s326_s28 }
  0x1c   : > { %s16273_s2 = sld [smem:[#allocation69_spill]] }
  0x1d   : > { %p13603_p12 = pnand %p16188_p9, %p12397_p11 }
  0x1f   : > { %p13619_p0 = pneg %p13603_p12 }
  0x22   : > { %s13167_s16 = scalar_lea.hbm %s16273_s2, 64 }
  0x23   : > { %p13168_p13 = scmp.ne.s32.totalorder %s16273_s2, %s13167_s16  ;;  %p13174_p3 = scmp.lt.u32.totalorder %s13167_s16, %s16273_s2 }
  0x25   : > { %p13170_p1 = pnand %p13619_p0, %p13168_p13 }
  0x27   : > { %p13171_p2 = pneg %p13170_p1 }
  0x29   : > { %p13176_p4 = pnand %p13174_p3, %p13171_p2 }
  0x2b   : > { %13179 = shalt.err (!%p13176_p4)
}
  0x2c   : > { %s13180_s29 = scalar_lea.vmem %s279_s23, 64  ;;  %p13188_p9 = scmp.lt.s32.totalorder %s279_s23, %s279_s23 }
  0x2d   : > { %p13181_p7 = scmp.ne.s32.totalorder %s279_s23, %s13180_s29  ;;  %p13189_p6 = scmp.lt.s32.totalorder %s13180_s29, %s13180_s29 }
  0x2f   : > { %p13183_p8 = pnand %p13181_p7, %p13619_p0  ;;  %p13190_p5 = por %p13189_p6, %p13188_p9 }
  0x31   : > { %p13184_p11 = pneg %p13183_p8 }
  0x33   : > { %p13191_p10 = pnand %p13190_p5, %p13184_p11 }
  0x35   : > { %13194 = shalt.err (!%p13191_p10)
}
  0x36   : > { %12403 = dma.hbm_to_vmem [thread:$0]  (!%p13603_p12), %s16273_s2, 64, %s279_s23, [#allocation6]  }
  0x37   : > { %s16275_s4 = sld [smem:[#allocation70_spill]] }
  0x3d   : > { %s13195_s22 = scalar_lea.hbm %s16275_s4, 48 }
  0x3e   : > { %p13196_p13 = scmp.ne.s32.totalorder %s16275_s4, %s13195_s22  ;;  %p13202_p5 = scmp.lt.u32.totalorder %s13195_s22, %s16275_s4 }
  0x40   : > { %p13198_p1 = pnand %p13196_p13, %p13619_p0 }
  0x42   : > { %p13199_p6 = pneg %p13198_p1 }
  0x44   : > { %p13204_p9 = pnand %p13202_p5, %p13199_p6 }
  0x46   : > { %13207 = shalt.err (!%p13204_p9)
}
  0x47   : > { %s13208_s23 = scalar_lea.vmem %s13607_s25, 48  ;;  %s13215_s11 = scalar_lea.vmem %s13607_s25, 64 }
  0x48   : > { %p13209_p10 = scmp.ne.s32.totalorder %s13607_s25, %s13208_s23  ;;  %p13216_p4 = scmp.lt.s32.totalorder %s13607_s25, %s13607_s25 }
  0x49   : > { %p13217_p7 = scmp.lt.s32.totalorder %s13215_s11, %s13208_s23 }
  0x4a   : > { %p13211_p2 = pnand %p13209_p10, %p13619_p0 }
  0x4b   : > { %p13218_p8 = por %p13217_p7, %p13216_p4 }
  0x4c   : > { %p13212_p3 = pneg %p13211_p2 }
  0x4e   : > { %p13219_p11 = pnand %p13218_p8, %p13212_p3 }
  0x50   : > { %13222 = shalt.err (!%p13219_p11)
}
  0x51   : > { %12409 = dma.hbm_to_vmem [thread:$0]  (!%p13603_p12), %s16275_s4, 48, %s13607_s25, [#allocation9]  }
  0x52   : > { %s13223_s16 = scalar_lea.hbm %s16184_s6, 16 }
  0x53   : > { %p13224_p13 = scmp.ne.s32.totalorder %s16184_s6, %s13223_s16  ;;  %p13230_p5 = scmp.lt.u32.totalorder %s13223_s16, %s16184_s6 }
  0x55   : > { %p13226_p1 = pnand %p13224_p13, %p13619_p0 }
  0x57   : > { %p13227_p6 = pneg %p13226_p1 }
  0x59   : > { %p13232_p9 = pnand %p13230_p5, %p13227_p6 }
  0x5b   : > { %13235 = shalt.err (!%p13232_p9)
}
  0x5c   : > { %s13236_s25 = scalar_lea.vmem %s13609_s28, 16  ;;  %s13243_s11 = scalar_lea.vmem %s13609_s28, 32 }
  0x5d   : > { %p13237_p10 = scmp.ne.s32.totalorder %s13609_s28, %s13236_s25  ;;  %p13244_p4 = scmp.lt.s32.totalorder %s13609_s28, %s13609_s28 }
  0x5e   : > { %p13245_p7 = scmp.lt.s32.totalorder %s13243_s11, %s13236_s25 }
  0x5f   : > { %p13239_p2 = pnand %p13237_p10, %p13619_p0 }
  0x60   : > { %p13246_p8 = por %p13245_p7, %p13244_p4 }
  0x61   : > { %p13240_p3 = pneg %p13239_p2 }
  0x63   : > { %p13247_p11 = pnand %p13246_p8, %p13240_p3 }
  0x65   : > { %13250 = shalt.err (!%p13247_p11)
}
  0x66   : > { %12415 = dma.hbm_to_vmem [thread:$0]  (!%p13603_p12), %s16184_s6, 16, %s13609_s28, [#allocation12]  }
  0x67   : > { %s13478_s17 = smov [#allocation2]   ;;  %s13251_s27 = scalar_lea.hbm %s16179_s1, 2048 }
  0x68   : > { %s264_s18 = sshll.u32 %s13478_s17, 4  ;;  %p13252_p13 = scmp.ne.s32.totalorder %s16179_s1, %s13251_s27  ;;  %s265_s18 = int_to_ptr.vmem [resolvable:$true] %s264_s18 }
  0x69   : > { %p13258_p5 = scmp.lt.u32.totalorder %s13251_s27, %s16179_s1 }
  0x6a   : > { %p13254_p1 = pnand %p13252_p13, %p13619_p0 }
  0x6c   : > { %p13255_p6 = pneg %p13254_p1 }
  0x6e   : > { %p13260_p9 = pnand %p13258_p5, %p13255_p6 }
  0x70   : > { %13263 = shalt.err (!%p13260_p9)
}
  0x71   : > { %s13264_s28 = scalar_lea.vmem %s265_s18, 2048  ;;  %p13272_p4 = scmp.lt.s32.totalorder %s265_s18, %s265_s18 }
  0x72   : > { %p13265_p10 = scmp.ne.s32.totalorder %s265_s18, %s13264_s28  ;;  %p13273_p7 = scmp.lt.s32.totalorder %s13264_s28, %s13264_s28 }
  0x74   : > { %p13267_p2 = pnand %p13265_p10, %p13619_p0  ;;  %p13274_p8 = por %p13273_p7, %p13272_p4 }
  0x76   : > { %p13268_p3 = pneg %p13267_p2 }
  0x78   : > { %p13275_p11 = pnand %p13274_p8, %p13268_p3 }
  0x7a   : > { %13278 = shalt.err (!%p13275_p11)
}
  0x7b   : > { %s13479_s15 = smov 256   ;;  %s13480_s14 = smov 16  }
  0x7c   : > { %12400 = dma.hbm_to_vmem [thread:$0]  (!%p13603_p12), %s16179_s1, 2048, %s265_s18, [#allocation3], %s13479_s15, %s13479_s15, %s13480_s14  }
  0x7d   : > { %s13481_s22 = smov [#allocation7]   ;;  %s13279_s25 = scalar_lea.hbm %s16181_s3, 49152 }
  0x7e   : > { %s288_s27 = sshll.u32 %s13481_s22, 4  ;;  %p13280_p13 = scmp.ne.s32.totalorder %s16181_s3, %s13279_s25  ;;  %s289_s27 = int_to_ptr.vmem [resolvable:$true] %s288_s27 }
  0x7f   : > { %p13286_p5 = scmp.lt.u32.totalorder %s13279_s25, %s16181_s3 }
  0x80   : > { %p13282_p1 = pnand %p13280_p13, %p13619_p0 }
  0x82   : > { %p13283_p6 = pneg %p13282_p1 }
  0x84   : > { %p13288_p9 = pnand %p13286_p5, %p13283_p6 }
  0x86   : > { %13291 = shalt.err (!%p13288_p9)
}
  0x87   : > { %s13292_s18 = scalar_lea.vmem %s289_s27, 49152  ;;  %p13300_p4 = scmp.lt.s32.totalorder %s289_s27, %s289_s27 }
  0x88   : > { %p13293_p10 = scmp.ne.s32.totalorder %s289_s27, %s13292_s18  ;;  %p13301_p7 = scmp.lt.s32.totalorder %s13292_s18, %s13292_s18 }
  0x8a   : > { %p13295_p2 = pnand %p13293_p10, %p13619_p0  ;;  %p13302_p8 = por %p13301_p7, %p13300_p4 }
  0x8c   : > { %p13296_p3 = pneg %p13295_p2 }
  0x8e   : > { %p13303_p11 = pnand %p13302_p8, %p13296_p3 }
  0x90   : > { %13306 = shalt.err (!%p13303_p11)
}
  0x91   : > { %s13482_s15 = smov 192   ;;  %s13483_s14 = smov 12  }
  0x92   : > { %12406 = dma.hbm_to_vmem [thread:$0]  (!%p13603_p12), %s16181_s3, 49152, %s289_s27, [#allocation6], %s13482_s15, %s13482_s15, %s13483_s14  }
  0x93   : > { %s13484_s17 = smov [#allocation10]   ;;  %s13307_s23 = scalar_lea.hbm %s16183_s5, 15360 }
  0x94   : > { %s312_s16 = sshll.u32 %s13484_s17, 4  ;;  %p13308_p13 = scmp.ne.s32.totalorder %s16183_s5, %s13307_s23  ;;  %s313_s16 = int_to_ptr.vmem [resolvable:$true] %s312_s16 }
  0x95   : > { %p13314_p5 = scmp.lt.u32.totalorder %s13307_s23, %s16183_s5 }
  0x96   : > { %p13310_p1 = pnand %p13308_p13, %p13619_p0 }
  0x98   : > { %p13311_p6 = pneg %p13310_p1 }
  0x9a   : > { %p13316_p9 = pnand %p13314_p5, %p13311_p6 }
  0x9c   : > { %13319 = shalt.err (!%p13316_p9)
}
  0x9d   : > { %s13320_s27 = scalar_lea.vmem %s313_s16, 15360  ;;  %p13328_p4 = scmp.lt.s32.totalorder %s313_s16, %s313_s16 }
  0x9e   : > { %p13321_p10 = scmp.ne.s32.totalorder %s313_s16, %s13320_s27  ;;  %p13329_p7 = scmp.lt.s32.totalorder %s13320_s27, %s13320_s27 }
  0xa0   : > { %p13323_p2 = pnand %p13321_p10, %p13619_p0  ;;  %p13330_p8 = por %p13329_p7, %p13328_p4 }
  0xa2   : > { %p13324_p3 = pneg %p13323_p2 }
  0xa4   : > { %p13331_p11 = pnand %p13330_p8, %p13324_p3 }
  0xa6   : > { %13334 = shalt.err (!%p13331_p11)
}
  0xa7   : > { %s13485_s15 = smov 64   ;;  %s13486_s14 = smov 4  }
  0xa8   : > { %12412 = dma.hbm_to_vmem [thread:$0]  (!%p13603_p12), %s16183_s5, 15360, %s313_s16, [#allocation9], %s13485_s15, %s13485_s15, %s13486_s14  }
  0xa9   : > { %s13487_s17 = smov [#allocation13]   ;;  %s13488_s29 = smov [#allocation14]  }
  0xaa   : > { %s336_s22 = sshll.u32 %s13487_s17, 4  ;;  %s350_s23 = sshll.u32 %s13488_s29, 4  ;;  %s337_s22 = int_to_ptr.vmem [resolvable:$true] %s336_s22  ;;  %s13737_s23 = int_to_ptr.vmem [resolvable:$true] %s350_s23 }
  0xab   : > { %s13335_s28 = scalar_lea.hbm %s16185_s7, 1024 }
  0xac   : > { %p13336_p13 = scmp.ne.s32.totalorder %s16185_s7, %s13335_s28  ;;  %p13342_p5 = scmp.lt.u32.totalorder %s13335_s28, %s16185_s7 }
  0xae   : > { %p13338_p1 = pnand %p13336_p13, %p13619_p0 }
  0xb0   : > { %p13339_p6 = pneg %p13338_p1 }
  0xb2   : > { %p13344_p9 = pnand %p13342_p5, %p13339_p6 }
  0xb4   : > { %13347 = shalt.err (!%p13344_p9)
}
  0xb5   : > { %s13348_s4 = scalar_lea.vmem %s337_s22, 1024  ;;  %p13356_p4 = scmp.lt.s32.totalorder %s337_s22, %s337_s22 }
  0xb6   : > { %p13349_p10 = scmp.ne.s32.totalorder %s337_s22, %s13348_s4  ;;  %p13357_p7 = scmp.lt.s32.totalorder %s13348_s4, %s13348_s4 }
  0xb8   : > { %p13351_p2 = pnand %p13349_p10, %p13619_p0  ;;  %p13358_p8 = por %p13357_p7, %p13356_p4 }
  0xba   : > { %p13352_p3 = pneg %p13351_p2 }
  0xbc   : > { %p13359_p11 = pnand %p13358_p8, %p13352_p3 }
  0xbe   : > { %13362 = shalt.err (!%p13359_p11)
}
  0xbf   : > { %12418 = dma.hbm_to_vmem [thread:$0]  (!%p13603_p12), %s16185_s7, 1024, %s337_s22, [#allocation12], %s13485_s15, %s13485_s15, %s13486_s14  }
  0xc0   : > { %s13363_s28 = scalar_lea.hbm %s16186_s8, 16 }
  0xc1   : > { %p13364_p13 = scmp.ne.s32.totalorder %s16186_s8, %s13363_s28  ;;  %p13370_p5 = scmp.lt.u32.totalorder %s13363_s28, %s16186_s8 }
  0xc3   : > { %p13366_p1 = pnand %p13364_p13, %p13619_p0 }
  0xc5   : > { %p13367_p6 = pneg %p13366_p1 }
  0xc7   : > { %p13372_p9 = pnand %p13370_p5, %p13367_p6 }
  0xc9   : > { %13375 = shalt.err (!%p13372_p9)
}
  0xca   : > { %s13376_s15 = scalar_lea.vmem %s13737_s23, 16  ;;  %s13383_s14 = scalar_lea.vmem %s13737_s23, 32 }
  0xcb   : > { %p13377_p10 = scmp.ne.s32.totalorder %s13737_s23, %s13376_s15  ;;  %p13384_p4 = scmp.lt.s32.totalorder %s13737_s23, %s13737_s23 }
  0xcc   : > { %p13385_p7 = scmp.lt.s32.totalorder %s13383_s14, %s13376_s15 }
  0xcd   : > { %p13379_p2 = pnand %p13377_p10, %p13619_p0 }
  0xce   : > { %p13386_p8 = por %p13385_p7, %p13384_p4 }
  0xcf   : > { %p13380_p3 = pneg %p13379_p2 }
  0xd1   : > { %p13387_p11 = pnand %p13386_p8, %p13380_p3 }
  0xd3   : > { %13390 = shalt.err (!%p13387_p11)
}
  0xd4   : > { %12421 = dma.hbm_to_vmem [thread:$0]  (!%p13603_p12), %s16186_s8, 16, %s13737_s23, [#allocation15]  }
  0xd5   : > { %p16276_p13 = scmp.ne.s32.totalorder %s16271_s21, 0 }
  0xd7   : > { %373 = sbr.rel (%p16276_p13) target bundleno = 2074 (0x81a), region = 56 }
  0xde   : > { %p16277_p0 = scmp.eq.s32.totalorder %s13567_s13, 0 }
  0xe0   : > { %13436 = dma.done.wait (%p16277_p0), [#allocation3], 2048   ;;  %p16278_p1 = pmov %p16277_p0 }
  0xe1   : > { %p16279_p6 = pmov %p16277_p0 }
  0xe2   : > { %13438 = vsyncadd (%p16278_p1), [#allocation3], 4294965248 }
  0xe3   : > { %13440 = dma.done.wait (%p16279_p6), [#allocation6], 49216   ;;  %p16280_p5 = pmov %p16277_p0 }
  0xe4   : > { %p16281_p9 = pmov %p16277_p0 }
  0xe5   : > { %13442 = vsyncadd (%p16280_p5), [#allocation6], 4294918080 }
  0xe6   : > { %13444 = dma.done.wait (%p16281_p9), [#allocation9], 15408   ;;  %p16282_p12 = pmov %p16277_p0 }
  0xe7   : > { %p16283_p10 = pmov %p16277_p0 }
  0xe8   : > { %13446 = vsyncadd (%p16282_p12), [#allocation9], 4294951888 }
  0xe9   : > { %13448 = dma.done.wait (%p16283_p10), [#allocation12], 1040   ;;  %p16284_p2 = pmov %p16277_p0 }
  0xea   : > { %p16285_p3 = pmov %p16277_p0 }
  0xeb   : > { %13450 = vsyncadd (%p16284_p2), [#allocation12], 4294966256 }
  0xec   : > { %13452 = dma.done.wait (%p16285_p3), [#allocation15], 16   ;;  %p16286_p4 = pmov %p16277_p0 }
  0xed   : > { %s11073_s21 = sshll.u32 %s13567_s13, 2  ;;  %v13489_v0 = vmov 0   ;;  %v13490_v1 = vmov 1966171168   ;;  %v466_v3 = vlaneseq  ;;  %v12495_v4 = vld [vmem:[#allocation2 + $0x4] ss:$16 sps:$4 sm:$0xff]  }
  0xee   : > { %13454 = vsyncadd (%p16286_p4), [#allocation15], 4294967280  ;;  %1306 = vmatprep.mubr.bf16.mxu0 %v13489_v0  ;;  %1377 = vmatprep.mubr.bf16.mxu1 %v13489_v0  ;;  %p439_p7 = scmp.lt.s32.totalorder %s11073_s21, 7  ;;  %v464_v2 = vunpack.c.l.s4 %v13490_v1  ;;  %v12497_v5 = vld [vmem:[#allocation2 + $0xc] ss:$16 sps:$4 sm:$0xff]   ;;  %vm1261_vm0 = vcmask 523264  }
  0xef   : > { %1274 = vmatprep.subr.bf16.mxu0 %v12495_v4  ;;  %v12499_v6 = vld [vmem:[#allocation2] ss:$16 sps:$4 sm:$0xff]   ;;  %v12500_v7 = vld [vmem:[#allocation2 + $0x8] ss:$16 sps:$4 sm:$0xff]   ;;  %1345 = vmatprep.subr.bf16.mxu1 %v12497_v5  ;;  %v12501_v8 = vld [vmem:[#allocation2 + $0x24] ss:$16 sps:$4 sm:$0xff]  }
  0xf0   : > { %s16397_s21 = smov (!%p439_p7, %s11073_s21), 7  ;;  %v465_v9 = vunpack.c.0.s8 %v464_v2  ;;  %v13806_v10 = vshrl.u32 %v466_v3, 7  ;;  %1275 = vmatpush1.bf16.msra.mxu0 %v12499_v6  ;;  %1346 = vmatpush1.bf16.msra.mxu1 %v12500_v7  ;;  %v12503_v11 = vld [vmem:[#allocation2 + $0x2c] ss:$16 sps:$4 sm:$0xff]   ;;  %v12505_v12 = vld [vmem:[#allocation2 + $0x20] ss:$16 sps:$4 sm:$0xff]  }
  0xf1   : > { %s11784_s26 = sshll.u32 %s16397_s21, 4  ;;  %1276 = vmatprep.subr.bf16.mxu0 %v12501_v8  ;;  %v12506_v13 = vld [vmem:[#allocation2 + $0x28] ss:$16 sps:$4 sm:$0xff]   ;;  %1347 = vmatprep.subr.bf16.mxu1 %v12503_v11  ;;  %v12507_v14 = vld [vmem:[#allocation2 + $0x44] ss:$16 sps:$4 sm:$0xff]   ;;  %vm8648_vm1 = vcmask 1041409  }
  0xf2   : > { %16287 = vst [vmem:[#allocation26_spill] sm:$0xff] %v13806_v10  ;;  %v12509_v15 = vld [vmem:[#allocation2 + $0x4c] ss:$16 sps:$4 sm:$0xff]   ;;  %v12511_v16 = vld [vmem:[#allocation2 + $0x40] ss:$16 sps:$4 sm:$0xff]   ;;  %s13811_s17 = scalar_lea.vmem %s16178_s0, %s11784_s26  ;;  %v13814_v18 = vsub.s32 %v465_v9, %v13806_v10  ;;  %vm8650_vm2 = vcmask 1042434  }
  0xf3   : > { %v12512_v17 = vld [vmem:[#allocation2 + $0x48] ss:$16 sps:$4 sm:$0xff]   ;;  %v12513_v19 = vld [vmem:[#allocation2 + $0x64] ss:$16 sps:$4 sm:$0xff]   ;;  %v12515_v20 = vld [vmem:[#allocation2 + $0x6c] ss:$16 sps:$4 sm:$0xff]  }
  0xf4   : > { %1277 = vmatpush1.bf16.msra.mxu0 %v12505_v12  ;;  %1348 = vmatpush1.bf16.msra.mxu1 %v12506_v13  ;;  %v446_v21 = vld [vmem:[%s13811_s17] sm:$0xff]  ;;  %v447_v22 = vld [vmem:[%s13811_s17 + $0x8] sm:$0x1f]  ;;  %v448_v23 = vld [vmem:[%s13811_s17 + $0x10] sm:$0xff]  ;;  %vm8652_vm3 = vcmask 1043459   ;;  %s13492_s29 = smov 96  }
  0xf5   : > { %1278 = vmatprep.subr.bf16.mxu0 %v12507_v14  ;;  %1349 = vmatprep.subr.bf16.mxu1 %v12509_v15  ;;  %v462_v24 = vcombine.high %v446_v21, %v446_v21  ;;  %v469_v25 = vrot.slane %v446_v21, %v13814_v18  ;;  %v12517_v26 = vld [vmem:[#allocation2 + $0x60] ss:$16 sps:$4 sm:$0xff]   ;;  %v12518_v27 = vld [vmem:[#allocation2 + $0x68] ss:$16 sps:$4 sm:$0xff]   ;;  %v511_v28 = vcombine.high %v447_v22, %v447_v22  ;;  %vm8666_vm4 = vcmask 785408   ;;  %s435_s25 = sand.u32 1, %s13465_s10  }
  0xf6   : > { %v518_v29 = vrot.slane %v447_v22, %v13814_v18  ;;  %v557_v30 = vrot.slane %v448_v23, %v13814_v18  ;;  %v12529_v38 = vld [vmem:[#allocation7 + $0x4] ss:$12 sps:$4 sm:$0xff]   ;;  %v550_v53 = vcombine.high %v448_v23, %v448_v23  ;;  %v449_v58 = vld [vmem:[%s13811_s17 + $0x18] sm:$0x1f]  ;;  %v450_v63 = vld [vmem:[%s13811_s17 + $0x20] sm:$0xff]  ;;  %vm13494_vm5 = vmmov 0  }
  0xf7   : > { %v476_v31 = vrot.slane %v462_v24, %v13814_v18  ;;  %v477_v32 = vcombine.high %v469_v25, %v469_v25  ;;  %v485_v33 = vrot.slane %v469_v25, %v13814_v18  ;;  %v525_v34 = vrot.slane %v511_v28, %v13814_v18  ;;  %s11072_s11 = sshll.u32 %s435_s25, 2  ;;  %s11781_s28 = sshll.u32 %s13567_s13, 6 }
  0xf8   : > { %1279 = vmatpush1.bf16.msra.mxu0 %v12511_v16  ;;  %1350 = vmatpush1.bf16.msra.mxu1 %v12512_v17  ;;  %v526_v35 = vcombine.high %v518_v29, %v518_v29  ;;  %v533_v36 = vrot.slane %v518_v29, %v13814_v18  ;;  %v565_v37 = vcombine.high %v557_v30, %v557_v30  ;;  %s437_s18 = scalar_lea.vmem [#allocation16], %s11072_s11  ;;  %s16136_s15 = scalar_lea.hbm %s16187_s9, %s11781_s28 }
  0xf9   : > { %1280 = vmatprep.subr.bf16.mxu0 %v12513_v19  ;;  %1351 = vmatprep.subr.bf16.mxu1 %v12515_v20  ;;  %v478_v39 = vcombine.high %v476_v31, %v476_v31  ;;  %v492_v40 = vrot.slane %v476_v31, %v13814_v18  ;;  %v499_v41 = vrot.slane %v477_v32, %v13814_v18  ;;  %s10914_s27 = sshll.u32 %s437_s18, 4  ;;  %s10901_s14 = scalar_lea.sflag [#allocation4], %s435_s25  ;;  %s16138_s27 = int_to_ptr.vmem [resolvable:$true] %s10914_s27 }
  0xfa   : > { %v573_v42 = vrot.slane %v557_v30, %v13814_v18  ;;  %v540_v43 = vrot.slane %v525_v34, %v13814_v18  ;;  %v547_v44 = vrot.slane %v526_v35, %v13814_v18  ;;  %v587_v45 = vrot.slane %v565_v37, %v13814_v18  ;;  %v12527_v35 = vld [vmem:[#allocation7] ss:$12 sps:$4 sm:$0xff]   ;;  %s13391_s13 = scalar_lea.vmem %s16138_s27, 64  ;;  %p16389_p11 = scmp.ne.s32.totalorder %s16269_s19, 0 }
  0xfb   : > { %v506_v46 = vrot.slane %v478_v39, %v13814_v18  ;;  %v814_v48 = vcombine.low %v485_v33, %v499_v41  ;;  %v11076_v49 = vcombine.high %v485_v33, %v499_v41  ;;  %v564_v4 = vrot.slane %v550_v53, %v13814_v18  ;;  %v12532_v41 = vld [vmem:[#allocation7 + $0x1c] ss:$12 sps:$4 sm:$0xff]   ;;  %p13392_p8 = scmp.ne.s32.totalorder %s16138_s27, %s13391_s13  ;;  %s13495_s22 = smov [#allocation16]  }
  0xfc   : > { %1281 = vmatpush1.bf16.msra.mxu0 %v12517_v26  ;;  %1352 = vmatpush1.bf16.msra.mxu1 %v12518_v27  ;;  %v595_v47 = vcombine.high %v573_v42, %v573_v42  ;;  %v863_v50 = vcombine.low %v533_v36, %v547_v44  ;;  %v11078_v51 = vcombine.high %v533_v36, %v547_v44  ;;  %s13395_s4 = sshll.u32 %s13495_s22, 4  ;;  %s13396_s4 = int_to_ptr.vmem [resolvable:$false] %s13395_s4 }
  0xfd   : > { %7419 = vmatprep.subr.bf16.mxu0 %v12529_v38  ;;  %v865_v52 = vcombine.low %v540_v43, %v573_v42  ;;  %v816_v54 = vcombine.low %v492_v40, %v506_v46  ;;  %v11077_v55 = vcombine.high %v492_v40, %v506_v46  ;;  %v824_v56 = vrot.slane %v814_v48, %v13814_v18  ;;  %v451_v40 = vld [vmem:[%s13811_s17 + $0x28] sm:$0x1f]  ;;  %p13393_p13 = pnand %p13392_p8, %p16389_p11  ;;  %s13397_s21 = scalar_lea.vmem %s13396_s4, 128 }
  0xfe   : > { %v831_v57 = vrot.slane %v11076_v49, %v13814_v18  ;;  %v866_v59 = vcombine.low %v587_v45, %v595_v47  ;;  %v873_v60 = vrot.slane %v863_v50, %v13814_v18  ;;  %v880_v61 = vrot.slane %v11078_v51, %v13814_v18  ;;  %v452_v50 = vld [vmem:[%s13811_s17 + $0x30] sm:$0xff]  ;;  %p13398_p1 = scmp.lt.s32.totalorder %s16138_s27, %s13396_s4  ;;  %p13399_p6 = scmp.lt.s32.totalorder %s13397_s21, %s13391_s13 }
  0xff   : > { %v887_v62 = vrot.slane %v865_v52, %v13814_v18  ;;  %v838_v1 = vrot.slane %v816_v54, %v13814_v18  ;;  %v845_v2 = vrot.slane %v11077_v55, %v13814_v18  ;;  %v597_v7 = vcombine.high %v587_v45, %v587_v45  ;;  %v12530_v54 = vld [vmem:[#allocation7 + $0x18] ss:$12 sps:$4 sm:$0xff]   ;;  %p13394_p0 = pneg %p13393_p13 }
 0x100   : > { %v846_v3 = vcombine.low %v824_v56, %v831_v57  ;;  %v894_v5 = vrot.slane %v866_v59, %v13814_v18  ;;  %v895_v6 = vcombine.low %v873_v60, %v880_v61  ;;  %v599_v8 = vcombine.high %v449_v58, %v449_v58  ;;  %p13400_p5 = por %p13399_p6, %p13398_p1 }
 0x101   : > { %v847_v9 = vcombine.low %v838_v1, %v845_v2  ;;  %v566_v12 = vcombine.high %v564_v4, %v564_v4  ;;  %v580_v13 = vrot.slane %v564_v4, %v13814_v18  ;;  %v606_v16 = vrot.slane %v449_v58, %v13814_v18  ;;  %v12535_v58 = vld [vmem:[#allocation7 + $0x34] ss:$12 sps:$4 sm:$0xff]  }
 0x102   : > { %v854_v11 = vrot.slane %v846_v3, %v13814_v18  ;;  %v896_v14 = vcombine.low %v887_v62, %v894_v5  ;;  %v903_v15 = vrot.slane %v895_v6, %v13814_v18  ;;  %v613_v17 = vrot.slane %v599_v8, %v13814_v18  ;;  %v13879_v62 = vld [vmem:[%s13811_s17 + $0x38] sm:$0x1f]  ;;  %p13401_p9 = pnand %p13400_p5, %p13394_p0 }
 0x103   : > { %v861_v19 = vrot.slane %v847_v9, %v13814_v18  ;;  %v594_v20 = vrot.slane %v566_v12, %v13814_v18  ;;  %v596_v21 = vcombine.high %v580_v13, %v580_v13  ;;  %v638_v22 = vcombine.high %v450_v63, %v450_v63  ;;  %v12533_v9 = vld [vmem:[#allocation7 + $0x30] ss:$12 sps:$4 sm:$0xff]  }
 0x104   : > { %v910_v23 = vrot.slane %v896_v14, %v13814_v18  ;;  %v614_v24 = vcombine.high %v606_v16, %v606_v16  ;;  %v621_v25 = vrot.slane %v606_v16, %v13814_v18  ;;  %v628_v26 = vrot.slane %v613_v17, %v13814_v18 }
 0x105   : > { %v862_v27 = vcombine.low %v854_v11, %v861_v19  ;;  %v598_v28 = vcombine.high %v594_v20, %v594_v20  ;;  %v645_v29 = vrot.slane %v450_v63, %v13814_v18  ;;  %v652_v30 = vrot.slane %v638_v22, %v13814_v18 }
 0x106   : > { %v911_v31 = vcombine.low %v903_v15, %v910_v23  ;;  %v635_v32 = vrot.slane %v614_v24, %v13814_v18  ;;  %v636_v33 = vcombine.high %v621_v25, %v621_v25  ;;  %v912_v34 = vcombine.low %v597_v7, %v580_v13  ;;  %v12538_v15 = vld [vmem:[#allocation7 + $0x4c] ss:$12 sps:$4 sm:$0xff]  }
 0x107   : > { %v653_v36 = vcombine.high %v645_v29, %v645_v29  ;;  %v654_v37 = vcombine.high %v652_v30, %v652_v30  ;;  %v661_v38 = vrot.slane %v645_v29, %v13814_v18  ;;  %v13859_v39 = vrot.slane %v652_v30, %v13814_v18 }
 0x108   : > { %v1139_v42 = vpack.c.bf16 %v911_v31, %v862_v27  ;;  %v637_v43 = vcombine.high %v635_v32, %v635_v32  ;;  %v913_v44 = vcombine.low %v594_v20, %v596_v21  ;;  %v914_v45 = vcombine.low %v598_v28, %v621_v25 }
 0x109   : > { %v675_v46 = vrot.slane %v653_v36, %v13814_v18  ;;  %v13864_v47 = vrot.slane %v654_v37, %v13814_v18  ;;  %v915_v48 = vcombine.low %v635_v32, %v636_v33  ;;  %v922_v49 = vrot.slane %v912_v34, %v13814_v18  ;;  %v12536_v37 = vld [vmem:[#allocation7 + $0x48] ss:$12 sps:$4 sm:$0xff]  }
 0x10a   : > { %11098 = vmatmul.mubr.msk.bf16.vlgmr.msra.gmra.mrb[0].mxu0 %vm1261_vm0, %v1139_v42  ;;  %11102 = vmatmul.mubr.msk.bf16.vlgmr.msra.gmra.mrb[0].mxu1 %vm1261_vm0, %v1139_v42  ;;  %v929_v51 = vrot.slane %v913_v44, %v13814_v18  ;;  %v936_v52 = vrot.slane %v914_v45, %v13814_v18  ;;  %v961_v53 = vcombine.low %v637_v43, %v628_v26  ;;  %v12541_v43 = vld [vmem:[#allocation7 + $0x64] ss:$12 sps:$4 sm:$0xff]  }
 0x10b   : > { %1316 = vmatprep.mubr.bf16.mxu0 %v13489_v0  ;;  %1387 = vmatprep.mubr.bf16.mxu1 %v13489_v0  ;;  %v943_v55 = vrot.slane %v915_v48, %v13814_v18  ;;  %v962_v56 = vcombine.low %v661_v38, %v675_v46  ;;  %v11079_v57 = vcombine.high %v661_v38, %v675_v46 }
 0x10c   : > { %v944_v59 = vcombine.low %v922_v49, %v929_v51  ;;  %v964_v60 = vcombine.low %v13859_v39, %v13864_v47  ;;  %v971_v61 = vrot.slane %v961_v53, %v13814_v18  ;;  %v687_v63 = vcombine.high %v451_v40, %v451_v40  ;;  %7420 = vmatpush1.bf16.msra.mxu0 %v12527_v35 }
 0x10d   : > { %v945_v1 = vcombine.low %v936_v52, %v943_v55  ;;  %v978_v2 = vrot.slane %v962_v56, %v13814_v18  ;;  %v985_v3 = vrot.slane %v11079_v57, %v13814_v18  ;;  %v694_v4 = vrot.slane %v451_v40, %v13814_v18  ;;  %7421 = vmatprep.subr.bf16.mxu0 %v12532_v41 }
 0x10e   : > { %v952_v5 = vrot.slane %v944_v59, %v13814_v18  ;;  %v992_v6 = vrot.slane %v964_v60, %v13814_v18  ;;  %v701_v7 = vrot.slane %v687_v63, %v13814_v18  ;;  %v726_v8 = vcombine.high %v452_v50, %v452_v50 }
 0x10f   : > { %v959_v11 = vrot.slane %v945_v1, %v13814_v18  ;;  %v993_v12 = vcombine.low %v971_v61, %v978_v2  ;;  %v702_v13 = vcombine.high %v694_v4, %v694_v4  ;;  %v709_v14 = vrot.slane %v694_v4, %v13814_v18 }
 0x110   : > { %v994_v16 = vcombine.low %v985_v3, %v992_v6  ;;  %v716_v17 = vrot.slane %v701_v7, %v13814_v18  ;;  %v733_v19 = vrot.slane %v452_v50, %v13814_v18  ;;  %v740_v20 = vrot.slane %v726_v8, %v13814_v18  ;;  %7422 = vmatpush1.bf16.msra.mxu0 %v12530_v54  ;;  %v12539_v54 = vld [vmem:[#allocation7 + $0x60] ss:$12 sps:$4 sm:$0xff]  }
 0x111   : > { %v960_v21 = vcombine.low %v952_v5, %v959_v11  ;;  %v1001_v22 = vrot.slane %v993_v12, %v13814_v18  ;;  %v723_v23 = vrot.slane %v702_v13, %v13814_v18  ;;  %v782_v24 = vrot.slane %v13879_v62, %v13814_v18  ;;  %7423 = vmatprep.subr.bf16.mxu0 %v12535_v58 }
 0x112   : > { %v1008_v25 = vrot.slane %v994_v16, %v13814_v18  ;;  %v741_v26 = vcombine.high %v733_v19, %v733_v19  ;;  %v742_v27 = vcombine.high %v740_v20, %v740_v20  ;;  %v749_v28 = vrot.slane %v733_v19, %v13814_v18 }
 0x113   : > { %v756_v29 = vrot.slane %v740_v20, %v13814_v18  ;;  %v797_v30 = vrot.slane %v782_v24, %v13814_v18  ;;  %v11080_v31 = vcombine.high %v13859_v39, %v13864_v47  ;;  %v1011_v32 = vcombine.low %v709_v14, %v723_v23 }
 0x114   : > { %v1009_v33 = vcombine.low %v1001_v22, %v1008_v25  ;;  %v763_v34 = vrot.slane %v741_v26, %v13814_v18  ;;  %v770_v35 = vrot.slane %v742_v27, %v13814_v18  ;;  %v771_v36 = vcombine.high %v749_v28, %v749_v28  ;;  %7424 = vmatpush1.bf16.msra.mxu0 %v12533_v9  ;;  %v12542_v22 = vld [vmem:[#allocation7 + $0x78] ss:$12 sps:$4 sm:$0xff]   ;;  %v12545_v25 = vld [vmem:[#allocation7 + $0x90] ss:$12 sps:$4 sm:$0xff]   ;;  %v12548_v27 = vld [vmem:[#allocation7 + $0xa8] ss:$12 sps:$4 sm:$0xff]  }
 0x115   : > { %v772_v38 = vcombine.high %v756_v29, %v756_v29  ;;  %v11081_v40 = vcombine.high %v709_v14, %v723_v23  ;;  %v1013_v41 = vcombine.low %v716_v17, %v749_v28  ;;  %v1020_v42 = vrot.slane %v11080_v31, %v13814_v18  ;;  %7425 = vmatprep.subr.bf16.mxu0 %v12538_v15  ;;  %v12544_v23 = vld [vmem:[#allocation7 + $0x7c] ss:$12 sps:$4 sm:$0xff]   ;;  %v12550_v26 = vld [vmem:[#allocation7 + $0xac] ss:$12 sps:$4 sm:$0xff]  }
 0x116   : > { %v1140_v44 = vpack.c.bf16 %v1009_v33, %v960_v21  ;;  %v773_v45 = vcombine.high %v763_v34, %v763_v34  ;;  %v774_v46 = vcombine.high %v770_v35, %v770_v35  ;;  %v1027_v39 = vrot.slane %v1011_v32, %v13814_v18  ;;  %v12554_v28 = vld [vmem:[#allocation7 + $0xc8] ss:$12 sps:$4 sm:$0xff]   ;;  %v12559_v32 = vld [vmem:[#allocation7 + $0xe0] ss:$12 sps:$4 sm:$0xff]   ;;  %v12556_v33 = vld [vmem:[#allocation7 + $0xd8] ss:$12 sps:$4 sm:$0xff]  }
 0x117   : > { %v1034_v47 = vrot.slane %v11081_v40, %v13814_v18  ;;  %v1041_v48 = vrot.slane %v1013_v41, %v13814_v18  ;;  %v1059_v49 = vcombine.low %v763_v34, %v771_v36  ;;  %v1061_v50 = vcombine.low %v770_v35, %v772_v38  ;;  %11785 = vmatprep.subr.bf16.mxu1 %v12554_v28  ;;  %v12558_v31 = vld [vmem:[#allocation7 + $0xdc] ss:$12 sps:$4 sm:$0xff]   ;;  %v12560_v34 = vld [vmem:[#allocation7 + $0x20] ss:$12 sps:$4 sm:$0xff]   ;;  %v12564_v36 = vld [vmem:[#allocation7 + $0xf8] ss:$12 sps:$4 sm:$0xff]  }
 0x118   : > { %11099 = vmatmul.mubr.msk.bf16.gmra.mrb[4].mxu0 %vm1261_vm0, %v1140_v44  ;;  %11103 = vmatmul.mubr.msk.bf16.gmra.mrb[4].mxu1 %vm1261_vm0, %v1140_v44  ;;  %v1042_v51 = vcombine.low %v1020_v42, %v1027_v39  ;;  %v1060_v52 = vcombine.low %v773_v45, %v756_v29  ;;  %v1062_v53 = vcombine.low %v774_v46, %v797_v30  ;;  %v12551_v29 = vld [vmem:[#allocation7 + $0xc0] ss:$12 sps:$4 sm:$0xff]   ;;  %v12565_v38 = vld [vmem:[#allocation7 + $0x38] ss:$12 sps:$4 sm:$0xff]   ;;  %v12569_v41 = vld [vmem:[#allocation7 + $0x110] ss:$12 sps:$4 sm:$0xff]  }
 0x119   : > { %1326 = vmatprep.mubr.bf16.mxu0 %v13489_v0  ;;  %1397 = vmatprep.mubr.bf16.mxu1 %v13489_v0  ;;  %v1043_v55 = vcombine.low %v1034_v47, %v1041_v48  ;;  %v1069_v56 = vrot.slane %v1059_v49, %v13814_v18  ;;  %v1083_v57 = vrot.slane %v1061_v50, %v13814_v18  ;;  %v12563_v35 = vld [vmem:[#allocation7 + $0xf4] ss:$12 sps:$4 sm:$0xff]   ;;  %v12568_v40 = vld [vmem:[#allocation7 + $0x10c] ss:$12 sps:$4 sm:$0xff]   ;;  %v12573_v44 = vld [vmem:[#allocation7 + $0x124] ss:$12 sps:$4 sm:$0xff]  }
 0x11a   : > { %v1050_v58 = vrot.slane %v1042_v51, %v13814_v18  ;;  %v1076_v59 = vrot.slane %v1060_v52, %v13814_v18  ;;  %v1090_v60 = vrot.slane %v1062_v53, %v13814_v18  ;;  %v775_v61 = vcombine.high %v13879_v62, %v13879_v62  ;;  %7426 = vmatpush1.bf16.msra.mxu0 %v12536_v37  ;;  %v12561_v37 = vld [vmem:[#allocation7 + $0xf0] ss:$12 sps:$4 sm:$0xff]   ;;  %v12566_v42 = vld [vmem:[#allocation7 + $0x108] ss:$12 sps:$4 sm:$0xff]   ;;  %v12571_v46 = vld [vmem:[#allocation7 + $0x120] ss:$12 sps:$4 sm:$0xff]  }
 0x11b   : > { %v1057_v63 = vrot.slane %v1043_v55, %v13814_v18  ;;  %v790_v1 = vcombine.high %v782_v24, %v782_v24  ;;  %v812_v2 = vcombine.high %v797_v30, %v797_v30  ;;  %7427 = vmatprep.subr.bf16.mxu0 %v12541_v43  ;;  %v12547_v24 = vld [vmem:[#allocation7 + $0x94] ss:$12 sps:$4 sm:$0xff]   ;;  %v12570_v43 = vld [vmem:[#allocation7 + $0x50] ss:$12 sps:$4 sm:$0xff]   ;;  %v12576_v49 = vld [vmem:[#allocation7 + $0x138] ss:$12 sps:$4 sm:$0xff]  }
 0x11c   : > { %v1091_v3 = vcombine.low %v1069_v56, %v1076_v59  ;;  %v1092_v4 = vcombine.low %v1083_v57, %v1090_v60  ;;  %v789_v5 = vrot.slane %v775_v61, %v13814_v18  ;;  %v12555_v30 = vld [vmem:[#allocation7 + $0x8] ss:$12 sps:$4 sm:$0xff]   ;;  %v12579_v48 = vld [vmem:[#allocation7 + $0x140] ss:$12 sps:$4 sm:$0xff]   ;;  %v12584_v52 = vld [vmem:[#allocation7 + $0x158] ss:$12 sps:$4 sm:$0xff]  }
 0x11d   : > { %v811_v6 = vrot.slane %v790_v1, %v13814_v18  ;;  %v1058_v7 = vcombine.low %v1050_v58, %v1057_v63  ;;  %11786 = vmatpush3.bf16.msra.mxu1 %v12555_v30  ;;  %v12574_v45 = vld [vmem:[#allocation7 + $0x128] ss:$12 sps:$4 sm:$0xff]   ;;  %v12580_v50 = vld [vmem:[#allocation7 + $0x80] ss:$12 sps:$4 sm:$0xff]   ;;  %v12581_v53 = vld [vmem:[#allocation7 + $0x150] ss:$12 sps:$4 sm:$0xff]  }
 0x11e   : > { %v1099_v8 = vrot.slane %v1091_v3, %v13814_v18  ;;  %v1106_v9 = vrot.slane %v1092_v4, %v13814_v18  ;;  %v804_v11 = vrot.slane %v789_v5, %v13814_v18  ;;  %7428 = vmatpush1.bf16.msra.mxu0 %v12539_v54  ;;  %11787 = vmatprep.subr.bf16.mxu1 %v12559_v32  ;;  %v12575_v39 = vld [vmem:[#allocation7 + $0x68] ss:$12 sps:$4 sm:$0xff]   ;;  %v12585_v54 = vld [vmem:[#allocation7 + $0x98] ss:$12 sps:$4 sm:$0xff]   ;;  %v12589_v56 = vld [vmem:[#allocation7 + $0x170] ss:$12 sps:$4 sm:$0xff]  }
 0x11f   : > { %v813_v62 = vcombine.high %v811_v6, %v811_v6  ;;  %v1108_v12 = vcombine.low %v811_v6, %v812_v2  ;;  %7429 = vmatprep.subr.bf16.mxu0 %v12544_v23  ;;  %v12578_v47 = vld [vmem:[#allocation7 + $0x13c] ss:$12 sps:$4 sm:$0xff]   ;;  %v12583_v51 = vld [vmem:[#allocation7 + $0x154] ss:$12 sps:$4 sm:$0xff]   ;;  %v12588_v55 = vld [vmem:[#allocation7 + $0x16c] ss:$12 sps:$4 sm:$0xff]  }
 0x120   : > { %v1107_v13 = vcombine.low %v1099_v8, %v1106_v9  ;;  %v12586_v57 = vld [vmem:[#allocation7 + $0x168] ss:$12 sps:$4 sm:$0xff]   ;;  %v12590_v58 = vld [vmem:[#allocation7 + $0xb0] ss:$12 sps:$4 sm:$0xff]   ;;  %v13935_v61 = vsub.s32 0, %v13806_v10  ;;  %v13938_v63 = vsub.s32 2, %v13806_v10 }
 0x121   : > { %v1109_v14 = vcombine.low %v813_v62, %v804_v11  ;;  %v1116_v15 = vrot.slane %v1108_v12, %v13814_v18  ;;  %11788 = vmatpush3.bf16.msra.mxu1 %v12560_v34  ;;  %v12593_v59 = vld [vmem:[#allocation7 + $0x184] ss:$12 sps:$4 sm:$0xff]   ;;  %v12594_v60 = vld [vmem:[#allocation7 + $0x248] ss:$12 sps:$4 sm:$0xff]   ;;  %v1159_v1 = vld [vmem:[#allocation5] sm:$0xf] }
 0x122   : > { %v1141_v16 = vpack.c.bf16 %v1107_v13, %v1058_v7  ;;  %7430 = vmatpush1.bf16.msra.mxu0 %v12542_v22  ;;  %11789 = vmatprep.subr.bf16.mxu1 %v12564_v36  ;;  %16288 = vst [vmem:[#allocation27_spill] sm:$0xff] %v13935_v61  ;;  %16289 = vst [vmem:[#allocation28_spill] sm:$0xff] %v13938_v63  ;;  %v16194_v2 = vsub.s32 1, %v13806_v10  ;;  %v1175_v3 = vsub.s32 3, %v13806_v10  ;;  %v13491_v36 = vmov 1983009808  }
 0x123   : > { %v1123_v17 = vrot.slane %v1109_v14, %v13814_v18  ;;  %7431 = vmatprep.subr.bf16.mxu0 %v12547_v24  ;;  %v13943_v4 = vrot.slane %v1159_v1, %v13935_v61  ;;  %v13946_v5 = vrot.slane %v1159_v1, %v13938_v63 }
 0x124   : > { %11100 = vmatmul.mubr.msk.bf16.gmra.mrb[8].mxu0 %vm1261_vm0, %v1141_v16  ;;  %11104 = vmatmul.mubr.msk.bf16.gmra.mrb[8].mxu1 %vm1261_vm0, %v1141_v16  ;;  %v13950_v6 = vrot.slane %v1159_v1, %v16194_v2  ;;  %v13952_v7 = vrot.slane %v1159_v1, %v1175_v3 }
 0x125   : > { %1336 = vmatprep.mubr.bf16.mxu0 %v13489_v0  ;;  %1407 = vmatprep.mubr.bf16.mxu1 %v13489_v0  ;;  %v1124_v19 = vcombine.low %v1116_v15, %v1123_v17  ;;  %v12553_v0 = vld [vmem:[#allocation7 + $0xc4] ss:$12 sps:$4 sm:$0xff]  }
 0x126   : > { %7432 = vmatpush1.bf16.msra.mxu0 %v12545_v25  ;;  %11790 = vmatpush3.bf16.msra.mxu1 %v12565_v38 }
 0x127   : > { %v1131_v20 = vrot.slane %v1124_v19, %v13814_v18  ;;  %7433 = vmatprep.subr.bf16.mxu0 %v12550_v26  ;;  %11791 = vmatprep.subr.bf16.mxu1 %v12569_v41 }
 0x129   : > { %v1142_v21 = vpack.c.bf16 %v1131_v20, %v1131_v20 }
 0x12a   : > { %7434 = vmatpush1.bf16.msra.mxu0 %v12548_v27  ;;  %11792 = vmatpush3.bf16.msra.mxu1 %v12570_v43 }
 0x12b   : > { %7435 = vmatprep.subr.bf16.mxu0 %v12553_v0  ;;  %11793 = vmatprep.subr.bf16.mxu1 %v12574_v45 }
 0x12c   : > { %11101 = vmatmul.mubr.msk.bf16.gmra.mrb[12].mxu0 %vm1261_vm0, %v1142_v21  ;;  %11105 = vmatmul.mubr.msk.bf16.gmra.mrb[12].mxu1 %vm1261_vm0, %v1142_v21 }
 0x12e   : > { %7436 = vmatpush1.bf16.msra.mxu0 %v12551_v29  ;;  %11794 = vmatpush3.bf16.msra.mxu1 %v12575_v39 }
 0x12f   : > { %7437 = vmatprep.subr.bf16.mxu0 %v12558_v31  ;;  %11795 = vmatprep.subr.bf16.mxu1 %v12579_v48 }
 0x132   : > { %7438 = vmatpush1.bf16.msra.mxu0 %v12556_v33  ;;  %11796 = vmatpush3.bf16.msra.mxu1 %v12580_v50 }
 0x133   : > { %7439 = vmatprep.subr.bf16.mxu0 %v12563_v35  ;;  %11797 = vmatprep.subr.bf16.mxu1 %v12584_v52 }
 0x136   : > { %7440 = vmatpush1.bf16.msra.mxu0 %v12561_v37  ;;  %11798 = vmatpush3.bf16.msra.mxu1 %v12585_v54  ;;  %v13962_v37 = vunpack.c.l.s4 %v13491_v36 }
 0x137   : > { %7441 = vmatprep.subr.bf16.mxu0 %v12568_v40  ;;  %11799 = vmatprep.subr.bf16.mxu1 %v12589_v56 }
 0x13a   : > { %7442 = vmatpush1.bf16.msra.mxu0 %v12566_v42  ;;  %11800 = vmatpush3.bf16.msra.mxu1 %v12590_v58 }
 0x13b   : > { %7443 = vmatprep.subr.bf16.mxu0 %v12573_v44  ;;  %11819 = vmatprep.subr.bf16.mxu1 %v12594_v60 }
 0x13e   : > { %7444 = vmatpush1.bf16.msra.mxu0 %v12571_v46 }
 0x13f   : > { %7445 = vmatprep.subr.bf16.mxu0 %v12578_v47 }
 0x142   : > { %7446 = vmatpush1.bf16.msra.mxu0 %v12576_v49 }
 0x143   : > { %7447 = vmatprep.subr.bf16.mxu0 %v12583_v51 }
 0x146   : > { %7448 = vmatpush1.bf16.msra.mxu0 %v12581_v53 }
 0x147   : > { %7449 = vmatprep.subr.bf16.mxu0 %v12588_v55 }
 0x14a   : > { %7450 = vmatpush1.bf16.msra.mxu0 %v12586_v57 }
 0x14b   : > { %7480 = vmatprep.subr.bf16.mxu0 %v12593_v59 }
 0x1dd   : > { %v1308_v8 = vpop.f32.mrb[0].mxu0  ;;  %v1379_v9 = vpop.f32.mrb[0].mxu1 }
 0x1de   : > { %v1309_v11 = vadd.f32 %v1308_v8, %v13943_v4  ;;  %v1380_v62 = vadd.f32 %v1379_v9, %v13946_v5  ;;  %v1310_v12 = vpop.f32.mrb[1].mxu0  ;;  %v1381_v13 = vpop.f32.mrb[1].mxu1 }
 0x1df   : > { %v1311_v14 = vadd.f32 %v1310_v12, %v13950_v6  ;;  %v1382_v15 = vadd.f32 %v1381_v13, %v13952_v7  ;;  %v1312_v16 = vpop.f32.mrb[2].mxu0  ;;  %v1383_v17 = vpop.f32.mrb[2].mxu1 }
 0x1e0   : > { %v1416_v19 = vmax.f32 %v1309_v11, 0.0  ;;  %v1418_v20 = vmax.f32 %v1380_v62, 0.0  ;;  %v1313_v21 = vadd.f32 %v1312_v16, %v13943_v4  ;;  %v1384_v22 = vadd.f32 %v1383_v17, %v13946_v5  ;;  %v1314_v23 = vpop.f32.mrb[3].mxu0  ;;  %v1385_v24 = vpop.f32.mrb[3].mxu1 }
 0x1e1   : > { %v1417_v25 = vmax.f32 %v1311_v14, 0.0  ;;  %v1419_v26 = vmax.f32 %v1382_v15, 0.0  ;;  %v1315_v27 = vadd.f32 %v1314_v23, %v13950_v6  ;;  %v1386_v0 = vadd.f32 %v1385_v24, %v13952_v7 }
 0x1e2   : > { %v1420_v28 = vmax.f32 %v1313_v21, 0.0  ;;  %v1422_v29 = vmax.f32 %v1384_v22, 0.0 }
 0x1e3   : > { %v1472_v30 = vcombine.low %v1416_v19, %v1417_v25  ;;  %v1473_v31 = vcombine.high %v1416_v19, %v1417_v25  ;;  %v1474_v32 = vcombine.low %v1418_v20, %v1419_v26  ;;  %v1475_v33 = vcombine.high %v1418_v20, %v1419_v26 }
 0x1e4   : > { %v1421_v34 = vmax.f32 %v1315_v27, 0.0  ;;  %v1423_v35 = vmax.f32 %v1386_v0, 0.0 }
 0x1e5   : > { %v1482_v38 = vrot.slane %v1472_v30, %v13814_v18  ;;  %v1489_v40 = vrot.slane %v1473_v31, %v13814_v18  ;;  %v1496_v41 = vrot.slane %v1474_v32, %v13814_v18  ;;  %v1503_v42 = vrot.slane %v1475_v33, %v13814_v18 }
 0x1e6   : > { %v1540_v43 = vcombine.low %v1420_v28, %v1421_v34  ;;  %v1541_v44 = vcombine.high %v1420_v28, %v1421_v34  ;;  %v1542_v45 = vcombine.low %v1422_v29, %v1423_v35  ;;  %v1543_v46 = vcombine.high %v1422_v29, %v1423_v35 }
 0x1e7   : > { %v1504_v39 = vcombine.low %v1482_v38, %v1496_v41  ;;  %v1505_v47 = vcombine.high %v1482_v38, %v1496_v41  ;;  %v1506_v48 = vcombine.low %v1489_v40, %v1503_v42  ;;  %v1507_v49 = vcombine.high %v1489_v40, %v1503_v42 }
 0x1e8   : > { %v1550_v50 = vrot.slane %v1540_v43, %v13814_v18  ;;  %v1557_v51 = vrot.slane %v1541_v44, %v13814_v18  ;;  %v1564_v52 = vrot.slane %v1542_v45, %v13814_v18  ;;  %v1571_v53 = vrot.slane %v1543_v46, %v13814_v18 }
 0x1e9   : > { %v1514_v54 = vrot.slane %v1504_v39, %v13814_v18  ;;  %v13974_v55 = vrot.slane %v1506_v48, %v13814_v18  ;;  %v1528_v56 = vrot.slane %v1505_v47, %v13814_v18  ;;  %v13978_v57 = vrot.slane %v1507_v49, %v13814_v18 }
 0x1ea   : > { %v1572_v58 = vcombine.low %v1550_v50, %v1564_v52  ;;  %v1573_v59 = vcombine.high %v1550_v50, %v1564_v52  ;;  %v1574_v60 = vcombine.low %v1557_v51, %v1571_v53  ;;  %v1575_v1 = vcombine.high %v1557_v51, %v1571_v53 }
 0x1eb   : > { %v1536_v3 = vcombine.high %v1514_v54, %v1514_v54  ;;  %v1537_v8 = vcombine.high %v13974_v55, %v13974_v55  ;;  %v1538_v9 = vcombine.high %v1528_v56, %v1528_v56  ;;  %v1539_v11 = vcombine.high %v13978_v57, %v13978_v57  ;;  %v1318_v62 = vpop.f32.mrb[4].mxu0  ;;  %v1389_v12 = vpop.f32.mrb[4].mxu1 }
 0x1ec   : > { %v1914_v13 = vcombine.low %v1514_v54, %v1528_v56  ;;  %v11106_v14 = vcombine.high %v1514_v54, %v1528_v56  ;;  %v1916_v15 = vcombine.low %v13974_v55, %v13978_v57  ;;  %v11107_v16 = vcombine.high %v13974_v55, %v13978_v57  ;;  %v1320_v17 = vpop.f32.mrb[5].mxu0  ;;  %v1391_v19 = vpop.f32.mrb[5].mxu1 }
 0x1ed   : > { %v2286_v20 = vcombine.low %v1528_v56, %v1536_v3  ;;  %v13989_v21 = vcombine.low %v1538_v9, %v13974_v55  ;;  %v13992_v22 = vcombine.low %v13978_v57, %v1537_v8  ;;  %v13995_v23 = vrot.slane %v1572_v58, %v13814_v18  ;;  %v1322_v24 = vpop.f32.mrb[6].mxu0  ;;  %v1393_v25 = vpop.f32.mrb[6].mxu1 }
 0x1ee   : > { %v1324_v26 = vpop.f32.mrb[7].mxu0  ;;  %v1395_v27 = vpop.f32.mrb[7].mxu1  ;;  %v13998_v0 = vrot.slane %v1574_v60, %v13814_v18  ;;  %v3152_v28 = vunpack.c.0.s8 %v13962_v37  ;;  %v14002_v29 = vrot.slane %v1573_v59, %v13814_v18  ;;  %v14005_v30 = vrot.slane %v1575_v1, %v13814_v18 }
 0x1ef   : > { %16290 = vst [vmem:[#allocation29_spill] sm:$0xff] %v13995_v23  ;;  %v1604_v31 = vcombine.high %v13995_v23, %v13995_v23  ;;  %v14010_v32 = vcombine.low %v1539_v11, %v13995_v23  ;;  %v1319_v34 = vadd.f32 %v1318_v62, %v13943_v4  ;;  %v1390_v35 = vadd.f32 %v1389_v12, %v13946_v5 }
 0x1f0   : > { %16291 = vst [vmem:[#allocation30_spill] sm:$0xff] %v14002_v29  ;;  %v1605_v33 = vcombine.high %v13998_v0, %v13998_v0  ;;  %v1321_v36 = vadd.f32 %v1320_v17, %v13950_v6  ;;  %v1606_v37 = vcombine.high %v14002_v29, %v14002_v29  ;;  %v1982_v38 = vcombine.low %v13995_v23, %v14002_v29 }
 0x1f1   : > { %v14025_v41 = vcombine.low %v14002_v29, %v1604_v31  ;;  %v11111_v42 = vcombine.high %v13998_v0, %v14005_v30  ;;  %v1424_v45 = vmax.f32 %v1319_v34, 0.0  ;;  %v1426_v46 = vmax.f32 %v1390_v35, 0.0 }
 0x1f2   : > { %v14022_v40 = vcombine.low %v14005_v30, %v1605_v33  ;;  %v14032_v44 = vcombine.low %v1606_v37, %v13998_v0  ;;  %v1425_v39 = vmax.f32 %v1321_v36, 0.0  ;;  %v14035_v47 = vsub.s32 %v3152_v28, %v13806_v10 }
 0x1f3   : > { %v14038_v48 = vrot.slane %v1914_v13, %v13814_v18  ;;  %v1392_v49 = vadd.f32 %v1391_v19, %v13952_v7  ;;  %v1323_v50 = vadd.f32 %v1322_v24, %v13943_v4  ;;  %v1394_v51 = vadd.f32 %v1393_v25, %v13946_v5 }
 0x1f4   : > { %16292 = vst [vmem:[#allocation31_spill] sm:$0xff] %v14032_v44  ;;  %v1608_v52 = vcombine.low %v1424_v45, %v1425_v39  ;;  %v1609_v53 = vcombine.high %v1424_v45, %v1425_v39  ;;  %v1325_v54 = vadd.f32 %v1324_v26, %v13950_v6  ;;  %v1396_v55 = vadd.f32 %v1395_v27, %v13952_v7 }
 0x1f5   : > { %v14048_v58 = vrot.slane %v11106_v14, %v13814_v18  ;;  %v1427_v59 = vmax.f32 %v1392_v49, 0.0  ;;  %v1428_v60 = vmax.f32 %v1323_v50, 0.0  ;;  %v1430_v1 = vmax.f32 %v1394_v51, 0.0 }
 0x1f6   : > { %v14055_v9 = vrot.slane %v1916_v15, %v13814_v18  ;;  %v14058_v11 = vrot.slane %v11107_v16, %v13814_v18  ;;  %v1429_v62 = vmax.f32 %v1325_v54, 0.0  ;;  %v1431_v12 = vmax.f32 %v1396_v55, 0.0 }
 0x1f7   : > { %v1328_v56 = vpop.f32.mrb[8].mxu0  ;;  %v14045_v57 = vpop.f32.mrb[8].mxu1  ;;  %16293 = vst [vmem:[#allocation32_spill] sm:$0xff] %v14048_v58  ;;  %v1618_v14 = vrot.slane %v1608_v52, %v13814_v18  ;;  %v1625_v19 = vrot.slane %v1609_v53, %v13814_v18  ;;  %v1610_v24 = vcombine.low %v1426_v46, %v1427_v59  ;;  %v1611_v25 = vcombine.high %v1426_v46, %v1427_v59 }
 0x1f8   : > { %v14050_v3 = vpop.f32.mrb[9].mxu0  ;;  %v14052_v8 = vpop.f32.mrb[9].mxu1  ;;  %16294 = vst [vmem:[#allocation33_spill] sm:$0xff] %v14055_v9  ;;  %16295 = vst [vmem:[#allocation34_spill] sm:$0xff] %v14058_v11  ;;  %v1676_v15 = vcombine.low %v1428_v60, %v1429_v62  ;;  %v1677_v28 = vcombine.high %v1428_v60, %v1429_v62  ;;  %v1678_v16 = vcombine.low %v1430_v1, %v1431_v12 }
 0x1f9   : > { %v14060_v13 = vpop.f32.mrb[10].mxu0  ;;  %v14062_v17 = vpop.f32.mrb[10].mxu1  ;;  %v1679_v31 = vcombine.high %v1430_v1, %v1431_v12  ;;  %v14071_v33 = vrot.slane %v2286_v20, %v13814_v18  ;;  %v1607_v34 = vcombine.high %v14005_v30, %v14005_v30  ;;  %v1632_v35 = vrot.slane %v1610_v24, %v13814_v18 }
 0x1fa   : > { %v14066_v26 = vpop.f32.mrb[11].mxu0  ;;  %v14068_v27 = vpop.f32.mrb[11].mxu1  ;;  %v1639_v36 = vrot.slane %v1611_v25, %v13814_v18  ;;  %v1686_v37 = vrot.slane %v1676_v15, %v13814_v18  ;;  %v1693_v45 = vrot.slane %v1677_v28, %v13814_v18  ;;  %v1700_v46 = vrot.slane %v1678_v16, %v13814_v18 }
 0x1fb   : > { %v1707_v39 = vrot.slane %v1679_v31, %v13814_v18  ;;  %v1640_v49 = vcombine.low %v1618_v14, %v1632_v35  ;;  %v1641_v50 = vcombine.high %v1618_v14, %v1632_v35  ;;  %v1329_v16 = vadd.f32 %v1328_v56, %v13943_v4 }
 0x1fc   : > { %v1642_v51 = vcombine.low %v1625_v19, %v1639_v36  ;;  %v1643_v20 = vcombine.high %v1625_v19, %v1639_v36  ;;  %v1708_v52 = vcombine.low %v1686_v37, %v1700_v46  ;;  %v1709_v53 = vcombine.high %v1686_v37, %v1700_v46 }
 0x1fd   : > { %v1710_v54 = vcombine.low %v1693_v45, %v1707_v39  ;;  %v1711_v55 = vcombine.high %v1693_v45, %v1707_v39  ;;  %v1650_v1 = vrot.slane %v1640_v49, %v13814_v18  ;;  %v1664_v12 = vrot.slane %v1641_v50, %v13814_v18 }
 0x1fe   : > { %v1657_v62 = vrot.slane %v1642_v51, %v13814_v18  ;;  %v1671_v24 = vrot.slane %v1643_v20, %v13814_v18  ;;  %v14094_v19 = vrot.slane %v1708_v52, %v13814_v18  ;;  %v14100_v28 = vrot.slane %v1709_v53, %v13814_v18 }
 0x1ff   : > { %v14081_v59 = vpop.f32.mrb[12].mxu0  ;;  %v14083_v60 = vpop.f32.mrb[12].mxu1  ;;  %v14097_v15 = vrot.slane %v1710_v54, %v13814_v18  ;;  %v1672_v36 = vcombine.high %v1650_v1, %v1650_v1  ;;  %v1674_v45 = vcombine.high %v1664_v12, %v1664_v12  ;;  %v2008_v46 = vcombine.low %v1607_v34, %v1650_v1 }
 0x200   : > { %v14089_v25 = vpop.f32.mrb[13].mxu0  ;;  %v14091_v14 = vpop.f32.mrb[13].mxu1  ;;  %16296 = vst [vmem:[#allocation35_spill] sm:$0xff] %v14094_v19  ;;  %16297 = vst [vmem:[#allocation36_spill] sm:$0xff] %v14100_v28  ;;  %v1673_v37 = vcombine.high %v1657_v62, %v1657_v62  ;;  %v2380_v50 = vcombine.low %v1650_v1, %v1664_v12  ;;  %v11112_v51 = vcombine.high %v1650_v1, %v1664_v12  ;;  %v1432_v1 = vmax.f32 %v1329_v16, 0.0 }
 0x201   : > { %v1342_v31 = vpop.f32.mrb[14].mxu0  ;;  %v1413_v35 = vpop.f32.mrb[14].mxu1  ;;  %v2382_v20 = vcombine.low %v1657_v62, %v1671_v24  ;;  %v11113_v52 = vcombine.high %v1657_v62, %v1671_v24  ;;  %v2009_v2 = vcombine.low %v1664_v12, %v1672_v36  ;;  %v2010_v54 = vcombine.low %v1674_v45, %v1657_v62 }
 0x202   : > { %v1343_v39 = vpop.f32.mrb[15].mxu0  ;;  %v1414_v49 = vpop.f32.mrb[15].mxu1  ;;  %v2075_v43 = vcombine.low %v1671_v24, %v1673_v37  ;;  %v14104_v53 = vrot.slane %v1711_v55, %v13814_v18  ;;  %v14108_v56 = vrot.slane %v13989_v21, %v13814_v18  ;;  %v14112_v31 = vrot.slane %v13992_v22, %v13814_v18 }
 0x203   : > { %v14116_v34 = vrot.slane %v14010_v32, %v13814_v18  ;;  %v14122_v62 = vrot.slane %v1982_v38, %v13814_v18  ;;  %v14126_v55 = vrot.slane %v14022_v40, %v13814_v18  ;;  %v1675_v21 = vcombine.high %v1671_v24, %v1671_v24 }
 0x204   : > { %16298 = vst [vmem:[#allocation37_spill] sm:$0xff] %v14108_v56  ;;  %16299 = vst [vmem:[#allocation38_spill] sm:$0xff] %v14112_v31  ;;  %v1400_v22 = vadd.f32 %v14045_v57, %v13946_v5  ;;  %v14132_v12 = vrot.slane %v14025_v41, %v13814_v18  ;;  %v1741_v32 = vcombine.high %v14097_v15, %v14097_v15 }
 0x205   : > { %16300 = vst [vmem:[#allocation39_spill] sm:$0xff] %v14116_v34  ;;  %16301 = vst [vmem:[#allocation40_spill] sm:$0xff] %v14122_v62  ;;  %v1742_v16 = vcombine.high %v14100_v28, %v14100_v28  ;;  %v11108_v38 = vcombine.high %v14094_v19, %v14100_v28  ;;  %v14145_v57 = vcombine.low %v1675_v21, %v14094_v19 }
 0x206   : > { %16302 = vst [vmem:[#allocation41_spill] sm:$0xff] %v14132_v12  ;;  %v14153_v35 = vrot.slane %v11111_v42, %v13814_v18  ;;  %v14159_v37 = vcombine.low %v14104_v53, %v1741_v32  ;;  %v1331_v45 = vadd.f32 %v14050_v3, %v13950_v6  ;;  %v14164_v39 = vrot.slane %v2008_v46, %v13814_v18 }
 0x207   : > { %16303 = vst [vmem:[#allocation42_spill] sm:$0xff] %v14145_v57  ;;  %v14156_v36 = vcombine.low %v1742_v16, %v14097_v15  ;;  %v14167_v49 = vrot.slane %v2380_v50, %v13814_v18  ;;  %v14170_v21 = vrot.slane %v11112_v51, %v13814_v18  ;;  %v1434_v0 = vmax.f32 %v1400_v22, 0.0 }
 0x208   : > { %16304 = vst [vmem:[#allocation43_spill] sm:$0xff] %v14164_v39  ;;  %v14173_v30 = vrot.slane %v2382_v20, %v13814_v18  ;;  %v14176_v42 = vrot.slane %v11113_v52, %v13814_v18  ;;  %v1433_v32 = vmax.f32 %v1331_v45, 0.0  ;;  %v1402_v3 = vadd.f32 %v14052_v8, %v13952_v7 }
 0x209   : > { %16305 = vst [vmem:[#allocation44_spill] sm:$0xff] %v14167_v49  ;;  %16306 = vst [vmem:[#allocation45_spill] sm:$0xff] %v14170_v21  ;;  %v14181_v46 = vrot.slane %v2009_v2, %v13814_v18  ;;  %v14184_v50 = vrot.slane %v2010_v54, %v13814_v18  ;;  %v1333_v51 = vadd.f32 %v14060_v13, %v13943_v4 }
 0x20a   : > { %v1404_v20 = vadd.f32 %v14062_v17, %v13946_v5  ;;  %v1744_v22 = vcombine.low %v1432_v1, %v1433_v32  ;;  %v1745_v16 = vcombine.high %v1432_v1, %v1433_v32  ;;  %v1435_v52 = vmax.f32 %v1402_v3, 0.0 }
 0x20b   : > { %16307 = vst [vmem:[#allocation46_spill] sm:$0xff] %v14181_v46  ;;  %16308 = vst [vmem:[#allocation47_spill] sm:$0xff] %v14184_v50  ;;  %v1335_v45 = vadd.f32 %v14066_v26, %v13950_v6  ;;  %v1436_v41 = vmax.f32 %v1333_v51, 0.0  ;;  %v1406_v2 = vadd.f32 %v14068_v27, %v13952_v7  ;;  %v14196_v54 = vadd.f32 %v14081_v59, %v13943_v4 }
 0x20c   : > { %v1438_v8 = vmax.f32 %v1404_v20, 0.0  ;;  %v1754_v13 = vrot.slane %v1744_v22, %v13814_v18  ;;  %v1761_v24 = vrot.slane %v1745_v16, %v13814_v18  ;;  %v1746_v17 = vcombine.low %v1434_v0, %v1435_v52 }
 0x20d   : > { %v1747_v40 = vcombine.high %v1434_v0, %v1435_v52  ;;  %v14201_v1 = vrot.slane %v2075_v43, %v13814_v18  ;;  %v1743_v26 = vcombine.high %v14104_v53, %v14104_v53  ;;  %v1437_v32 = vmax.f32 %v1335_v45, 0.0 }
 0x20e   : > { %v1439_v3 = vmax.f32 %v1406_v2, 0.0  ;;  %v14206_v27 = vrot.slane %v11108_v38, %v13814_v18  ;;  %v1768_v4 = vrot.slane %v1746_v17, %v13814_v18 }
 0x20f   : > { %16309 = vst [vmem:[#allocation48_spill] sm:$0xff] %v14201_v1  ;;  %v1775_v59 = vrot.slane %v1747_v40, %v13814_v18  ;;  %v1812_v20 = vcombine.low %v1436_v41, %v1437_v32  ;;  %v1813_v22 = vcombine.high %v1436_v41, %v1437_v32 }
 0x210   : > { %v1814_v0 = vcombine.low %v1438_v8, %v1439_v3  ;;  %v1815_v16 = vcombine.high %v1438_v8, %v1439_v3  ;;  %v1776_v43 = vcombine.low %v1754_v13, %v1768_v4  ;;  %v1777_v52 = vcombine.high %v1754_v13, %v1768_v4 }
 0x211   : > { %v1778_v10 = vcombine.low %v1761_v24, %v1775_v59  ;;  %v1779_v61 = vcombine.high %v1761_v24, %v1775_v59  ;;  %v1822_v45 = vrot.slane %v1812_v20, %v13814_v18  ;;  %v1829_v2 = vrot.slane %v1813_v22, %v13814_v18 }
 0x212   : > { %v1836_v38 = vrot.slane %v1814_v0, %v13814_v18  ;;  %v1843_v17 = vrot.slane %v1815_v16, %v13814_v18  ;;  %v1786_v40 = vrot.slane %v1776_v43, %v13814_v18  ;;  %v1800_v41 = vrot.slane %v1777_v52, %v13814_v18 }
 0x213   : > { %v14217_v51 = vrot.slane %v1778_v10, %v13814_v18  ;;  %v14221_v8 = vrot.slane %v1779_v61, %v13814_v18 }
 0x214   : > { %v1844_v13 = vcombine.low %v1822_v45, %v1836_v38  ;;  %v1845_v24 = vcombine.high %v1822_v45, %v1836_v38  ;;  %v1846_v32 = vcombine.low %v1829_v2, %v1843_v17  ;;  %v1847_v3 = vcombine.high %v1829_v2, %v1843_v17 }
 0x215   : > { %16310 = vst [vmem:[#allocation49_spill] sm:$0xff] %v14217_v51  ;;  %16311 = vst [vmem:[#allocation50_spill] sm:$0xff] %v14221_v8  ;;  %v1808_v4 = vcombine.high %v1786_v40, %v1786_v40  ;;  %v1809_v59 = vcombine.high %v14217_v51, %v14217_v51  ;;  %v1810_v20 = vcombine.high %v1800_v41, %v1800_v41 }
 0x216   : > { %v1811_v22 = vcombine.high %v14221_v8, %v14221_v8  ;;  %v2103_v0 = vcombine.low %v1786_v40, %v1800_v41  ;;  %v11110_v10 = vcombine.high %v1786_v40, %v1800_v41  ;;  %v2474_v16 = vcombine.low %v1743_v26, %v1786_v40 }
 0x217   : > { %v2475_v61 = vcombine.low %v1800_v41, %v1808_v4  ;;  %v2540_v52 = vcombine.low %v1810_v20, %v14217_v51  ;;  %v14231_v45 = vcombine.low %v14221_v8, %v1809_v59  ;;  %v1854_v2 = vrot.slane %v1844_v13, %v13814_v18  ;;  %v12598_v51 = vld [vmem:[#allocation7 + $0x19c] ss:$12 sps:$4 sm:$0xff]  }
 0x218   : > { %v16313_v38 = vcombine.low %v14097_v15, %v14104_v53  ;;  %v16315_v26 = vcombine.high %v14097_v15, %v14104_v53  ;;  %v14248_v41 = vrot.slane %v14156_v36, %v13814_v18  ;;  %v14252_v4 = vrot.slane %v14159_v37, %v13814_v18 }
 0x219   : > { %16312 = vst [vmem:[#allocation51_spill] sm:$0xff] %v14231_v45  ;;  %v14255_v13 = vrot.slane %v1846_v32, %v13814_v18  ;;  %v1410_v59 = vadd.f32 %v14083_v60, %v13946_v5  ;;  %v1341_v20 = vadd.f32 %v14089_v25, %v13950_v6  ;;  %v1412_v15 = vadd.f32 %v14091_v14, %v13952_v7 }
 0x21a   : > { %v14238_v17 = vrot.slane %v16313_v38, %v13814_v18  ;;  %v14244_v40 = vrot.slane %v16315_v26, %v13814_v18  ;;  %v14264_v53 = vrot.slane %v2103_v0, %v13814_v18  ;;  %v1868_v36 = vrot.slane %v1845_v24, %v13814_v18 }
 0x21b   : > { %v14268_v37 = vrot.slane %v1847_v3, %v13814_v18  ;;  %v1876_v38 = vcombine.high %v1854_v2, %v1854_v2  ;;  %v14271_v32 = vrot.slane %v11110_v10, %v13814_v18  ;;  %v14274_v5 = vrot.slane %v2474_v16, %v13814_v18 }
 0x21c   : > { %16314 = vst [vmem:[#allocation52_spill] sm:$0xff] %v14238_v17  ;;  %16316 = vst [vmem:[#allocation53_spill] sm:$0xff] %v14244_v40  ;;  %v1877_v6 = vcombine.high %v14255_v13, %v14255_v13  ;;  %v2193_v60 = vcombine.low %v1811_v22, %v1854_v2  ;;  %v14279_v7 = vrot.slane %v2475_v61, %v13814_v18  ;;  %v1442_v43 = vmax.f32 %v1410_v59, 0.0 }
 0x21d   : > { %16317 = vst [vmem:[#allocation54_spill] sm:$0xff] %v14264_v53  ;;  %16318 = vst [vmem:[#allocation55_spill] sm:$0xff] %v14271_v32  ;;  %v1878_v25 = vcombine.high %v1868_v36, %v1868_v36  ;;  %v2194_v14 = vcombine.low %v1868_v36, %v1876_v38  ;;  %v2565_v24 = vcombine.low %v1854_v2, %v1868_v36  ;;  %v16322_v59 = vmax.f32 %v14196_v54, 0.0 }
 0x21e   : > { %v14282_v3 = vrot.slane %v2540_v52, %v13814_v18  ;;  %v2196_v0 = vcombine.low %v14268_v37, %v1877_v6  ;;  %v11114_v10 = vcombine.high %v1854_v2, %v1868_v36  ;;  %v2567_v16 = vcombine.low %v14255_v13, %v14268_v37 }
 0x21f   : > { %v1879_v26 = vcombine.high %v14268_v37, %v14268_v37  ;;  %v2195_v22 = vcombine.low %v1878_v25, %v14255_v13  ;;  %v11115_v61 = vcombine.high %v14255_v13, %v14268_v37  ;;  %v14293_v38 = vrot.slane %v2193_v60, %v13814_v18 }
 0x220   : > { %v14296_v52 = vrot.slane %v2194_v14, %v13814_v18  ;;  %v14299_v2 = vrot.slane %v2565_v24, %v13814_v18  ;;  %v1441_v36 = vmax.f32 %v1341_v20, 0.0  ;;  %v14302_v6 = vrot.slane %v2196_v0, %v13814_v18 }
 0x221   : > { %v14305_v63 = vrot.slane %v11114_v10, %v13814_v18  ;;  %v1443_v25 = vmax.f32 %v1412_v15, 0.0  ;;  %v1946_v13 = vcombine.low %v14038_v48, %v14048_v58  ;;  %v1947_v60 = vcombine.high %v14038_v48, %v14048_v58 }
 0x222   : > { %16319 = vst [vmem:[#allocation56_spill] sm:$0xff] %v14296_v52  ;;  %16320 = vst [vmem:[#allocation57_spill] sm:$0xff] %v14299_v2  ;;  %v1880_v37 = vcombine.low %v16322_v59, %v1441_v36  ;;  %v1948_v14 = vcombine.low %v14055_v9, %v14058_v11  ;;  %v1949_v20 = vcombine.high %v14055_v9, %v14058_v11 }
 0x223   : > { %16321 = vst [vmem:[#allocation58_spill] sm:$0xff] %v14302_v6  ;;  %v1881_v24 = vcombine.low %v1442_v43, %v1443_v25  ;;  %v14318_v0 = vrot.slane %v1946_v13, %v13814_v18  ;;  %v1990_v15 = vcombine.high %v14122_v62, %v14122_v62  ;;  %v14324_v54 = vrot.slane %v14122_v62, %v13814_v18 }
 0x224   : > { %v1888_v10 = vrot.slane %v1880_v37, %v13814_v18  ;;  %v14328_v48 = vrot.slane %v1947_v60, %v13814_v18  ;;  %v14331_v36 = vrot.slane %v1948_v14, %v13814_v18  ;;  %v14334_v43 = vrot.slane %v1949_v20, %v13814_v18 }
 0x225   : > { %v1895_v25 = vrot.slane %v1881_v24, %v13814_v18  ;;  %v14338_v13 = vrot.slane %v1990_v15, %v13814_v18  ;;  %v2039_v59 = vcombine.low %v14126_v55, %v14164_v39  ;;  %v2040_v37 = vcombine.high %v14126_v55, %v14164_v39 }
 0x226   : > { %v2041_v60 = vcombine.low %v14181_v46, %v14184_v50  ;;  %v2042_v14 = vcombine.high %v14181_v46, %v14184_v50  ;;  %v11118_v20 = vcombine.low %v14318_v0, %v14328_v48  ;;  %v11119_v24 = vcombine.low %v14331_v36, %v14334_v43  ;;  %v12595_v46 = vld [vmem:[#allocation7 + $0x188] ss:$12 sps:$4 sm:$0xff]  }
 0x227   : > { %v1896_v15 = vcombine.low %v1888_v10, %v1895_v25  ;;  %v1897_v44 = vcombine.high %v1888_v10, %v1895_v25  ;;  %v2049_v45 = vrot.slane %v2039_v59, %v13814_v18  ;;  %v2056_v28 = vrot.slane %v2040_v37, %v13814_v18 }
 0x228   : > { %v2063_v55 = vrot.slane %v2041_v60, %v13814_v18  ;;  %v2070_v19 = vrot.slane %v2042_v14, %v13814_v18  ;;  %v3156_v11 = vrot.slane %v11118_v20, %v14035_v47  ;;  %v3163_v62 = vrot.slane %v11119_v24, %v14035_v47 }
 0x229   : > { %v14359_v58 = vrot.slane %v1896_v15, %v13814_v18  ;;  %v14362_v9 = vrot.slane %v1897_v44, %v13814_v18  ;;  %v3290_v10 = vcombine.low %v14324_v54, %v14338_v13  ;;  %v11138_v25 = vcombine.low %v2049_v45, %v2056_v28 }
 0x22a   : > { %v11139_v59 = vcombine.low %v2063_v55, %v2070_v19  ;;  %v11140_v37 = vcombine.high %v2049_v45, %v2056_v28  ;;  %v4004_v60 = vrot.slane %v3156_v11, %v14035_v47  ;;  %v4018_v14 = vrot.slane %v3163_v62, %v14035_v47 }
 0x22b   : > { %16323 = vst [vmem:[#allocation59_spill] sm:$0xff] %v14359_v58  ;;  %16324 = vst [vmem:[#allocation60_spill] sm:$0xff] %v14362_v9  ;;  %v1912_v20 = vcombine.high %v14359_v58, %v14359_v58  ;;  %v2261_v24 = vcombine.low %v1879_v26, %v14359_v58  ;;  %v3298_v29 = vrot.slane %v3290_v10, %v14035_v47 }
 0x22c   : > { %v3368_v23 = vrot.slane %v11138_v25, %v14035_v47  ;;  %v14378_v28 = vrot.slane %v11139_v59, %v14035_v47  ;;  %v14381_v11 = vrot.slane %v11140_v37, %v14035_v47  ;;  %v14384_v62 = vrot.slane %v2195_v22, %v13814_v18 }
 0x22d   : > { %v14387_v45 = vrot.slane %v2567_v16, %v13814_v18  ;;  %v14390_v26 = vrot.slane %v11115_v61, %v13814_v18  ;;  %v14393_v44 = vcombine.low %v14362_v9, %v1912_v20  ;;  %v14396_v10 = vrot.slane %v2261_v24, %v13814_v18 }
 0x22e   : > { %16325 = vst [vmem:[#allocation61_spill] sm:$0xff] %v14384_v62  ;;  %v3391_v25 = vcombine.high %v3368_v23, %v14381_v11  ;;  %v4026_v59 = vcombine.low %v4004_v60, %v4018_v14  ;;  %v11198_v37 = vcombine.low %v3298_v29, %v3368_v23  ;;  %v4027_v15 = vcombine.high %v4004_v60, %v4018_v14 }
 0x22f   : > { %16326 = vst [vmem:[#allocation62_spill] sm:$0xff] %v14387_v45  ;;  %16327 = vst [vmem:[#allocation63_spill] sm:$0xff] %v14390_v26  ;;  %v2083_v22 = vcombine.high %v14201_v1, %v14201_v1  ;;  %v14403_v16 = vrot.slane %v14201_v1, %v13814_v18  ;;  %v2132_v61 = vcombine.low %v14206_v27, %v14238_v17  ;;  %v12596_v45 = vld [vmem:[#allocation7 + $0x198] ss:$12 sps:$4 sm:$0xff]  }
 0x230   : > { %16328 = vst [vmem:[#allocation64_spill] sm:$0xff] %v14393_v44  ;;  %16329 = vst [vmem:[#allocation65_spill] sm:$0xff] %v14396_v10  ;;  %v11200_v20 = vcombine.low %v3391_v25, %v14378_v28  ;;  %v4148_v24 = vrot.slane %v11198_v37, %v14035_v47  ;;  %v2133_v44 = vcombine.high %v14206_v27, %v14238_v17 }
 0x231   : > { %v2134_v23 = vcombine.low %v14244_v40, %v14264_v53  ;;  %v14414_v29 = vrot.slane %v2083_v22, %v13814_v18  ;;  %v2135_v60 = vcombine.high %v14244_v40, %v14264_v53  ;;  %v14419_v14 = vrot.slane %v2132_v61, %v13814_v18 }
 0x232   : > { %v2176_v25 = vcombine.high %v14271_v32, %v14271_v32  ;;  %v4162_v37 = vrot.slane %v11200_v20, %v14035_v47  ;;  %v14425_v39 = vrot.slane %v2133_v44, %v13814_v18  ;;  %v14432_v22 = vrot.slane %v14271_v32, %v13814_v18 }
 0x233   : > { %v14428_v27 = vrot.slane %v2134_v23, %v13814_v18  ;;  %v14435_v53 = vrot.slane %v2135_v60, %v13814_v18  ;;  %v2225_v17 = vcombine.low %v14293_v38, %v14296_v52  ;;  %v2226_v44 = vcombine.high %v14293_v38, %v14296_v52  ;;  %v12591_v23 = vld [vmem:[#allocation7 + $0x180] ss:$12 sps:$4 sm:$0xff]  }
 0x234   : > { %v14438_v61 = vrot.slane %v2176_v25, %v13814_v18  ;;  %v4170_v20 = vcombine.low %v4148_v24, %v4162_v37  ;;  %v4171_v40 = vcombine.high %v4148_v24, %v4162_v37  ;;  %v11141_v8 = vcombine.high %v2063_v55, %v2070_v19  ;;  %v12599_v55 = vld [vmem:[#allocation7 + $0x260] ss:$12 sps:$4 sm:$0xff]  }
 0x235   : > { %v3502_v32 = vcombine.low %v14403_v16, %v14414_v29  ;;  %v2235_v60 = vrot.slane %v2225_v17, %v13814_v18  ;;  %v2242_v25 = vrot.slane %v2226_v44, %v13814_v18  ;;  %v11158_v57 = vcombine.low %v14419_v14, %v14425_v39 }
 0x236   : > { %v11159_v50 = vcombine.low %v14428_v27, %v14435_v53  ;;  %v4795_v38 = vpack.c.bf16 %v4171_v40, %v4027_v15  ;;  %v4794_v52 = vpack.c.bf16 %v4170_v20, %v4026_v59  ;;  %v14453_v24 = vrot.slane %v11141_v8, %v14035_v47  ;;  %v12600_v59 = vld [vmem:[#allocation7 + $0x1a0] ss:$12 sps:$4 sm:$0xff]  }
 0x237   : > { %v14456_v19 = vrot.slane %v3502_v32, %v14035_v47  ;;  %v3580_v37 = vrot.slane %v11158_v57, %v14035_v47  ;;  %v3714_v44 = vcombine.low %v14432_v22, %v14438_v61  ;;  %v11178_v1 = vcombine.low %v2235_v60, %v2242_v25  ;;  %v12603_v20 = vld [vmem:[#allocation7 + $0x1b4] ss:$12 sps:$4 sm:$0xff]  }
 0x238   : > { %v3587_v17 = vrot.slane %v11159_v50, %v14035_v47  ;;  %7451 = vmatprep.mubr.bf16.mxu0 %v4795_v38  ;;  %7939 = vmatprep.mubr.bf16.mxu1 %v4795_v38  ;;  %v3393_v40 = vcombine.high %v14378_v28, %v14453_v24  ;;  %v2227_v8 = vcombine.low %v14384_v62, %v14302_v6 }
 0x239   : > { %v2228_v32 = vcombine.high %v14384_v62, %v14302_v6  ;;  %7452 = vmatmul.mubr.bf16.vlgmr.msra.gmra.mrb[16].mxu0 %v4794_v52  ;;  %7940 = vmatmul.mubr.bf16.vlgmr.msra.gmra.mrb[16].mxu1 %v4794_v52  ;;  %v3722_v57 = vrot.slane %v3714_v44, %v14035_v47  ;;  %v3792_v50 = vrot.slane %v11178_v1, %v14035_v47  ;;  %v12604_v6 = vld [vmem:[#allocation7 + $0x278] ss:$12 sps:$4 sm:$0xff]  }
 0x23a   : > { %v4306_v15 = vrot.slane %v3580_v37, %v14035_v47  ;;  %7481 = vmatpush1.bf16.msra.mxu0 %v12591_v23  ;;  %11820 = vmatpush3.bf16.msra.mxu1 %v12595_v46  ;;  %v11214_v38 = vcombine.low %v3393_v40, %v14456_v19  ;;  %v4436_v26 = vrot.slane %v3587_v17, %v14035_v47  ;;  %v12601_v40 = vld [vmem:[#allocation7 + $0x1b0] ss:$12 sps:$4 sm:$0xff]  }
 0x23b   : > { %v2249_v2 = vrot.slane %v2227_v8, %v13814_v18  ;;  %7482 = vmatprep.subr.bf16.mxu0 %v12598_v51  ;;  %11821 = vmatprep.subr.bf16.mxu1 %v12599_v55  ;;  %v11222_v52 = vcombine.low %v3722_v57, %v3792_v50  ;;  %v2256_v44 = vrot.slane %v2228_v32, %v13814_v18  ;;  %v12605_v51 = vld [vmem:[#allocation7 + $0x1b8] ss:$12 sps:$4 sm:$0xff]  }
 0x23c   : > { %v2269_v1 = vcombine.high %v14396_v10, %v14396_v10  ;;  %v4292_v23 = vrot.slane %v11214_v38, %v14035_v47  ;;  %v14480_v46 = vrot.slane %v14396_v10, %v13814_v18  ;;  %v11180_v37 = vcombine.high %v2235_v60, %v2242_v25 }
 0x23d   : > { %v11120_v17 = vcombine.high %v14318_v0, %v14328_v48  ;;  %v4450_v55 = vrot.slane %v11222_v52, %v14035_v47  ;;  %v11179_v32 = vcombine.low %v2249_v2, %v2256_v44  ;;  %v11181_v57 = vcombine.high %v2249_v2, %v2256_v44 }
 0x23e   : > { %v14486_v8 = vrot.slane %v2269_v1, %v13814_v18  ;;  %7483 = vmatpush1.bf16.msra.mxu0 %v12596_v45  ;;  %11822 = vmatpush3.bf16.msra.mxu1 %v12600_v59  ;;  %v4315_v38 = vcombine.high %v4292_v23, %v4306_v15  ;;  %v4314_v62 = vcombine.low %v4292_v23, %v4306_v15  ;;  %v12606_v1 = vld [vmem:[#allocation7 + $0x1c8] ss:$12 sps:$4 sm:$0xff]   ;;  %v12610_v23 = vld [vmem:[#allocation7 + $0x1d0] ss:$12 sps:$4 sm:$0xff]  }
 0x23f   : > { %v14489_v10 = vrot.slane %v11180_v37, %v14035_v47  ;;  %7484 = vmatprep.subr.bf16.mxu0 %v12603_v20  ;;  %11823 = vmatprep.subr.bf16.mxu1 %v12604_v6  ;;  %v4459_v60 = vcombine.high %v4436_v26, %v4450_v55  ;;  %v4458_v0 = vcombine.low %v4436_v26, %v4450_v55  ;;  %v12608_v20 = vld [vmem:[#allocation7 + $0x1cc] ss:$12 sps:$4 sm:$0xff]   ;;  %v12609_v6 = vld [vmem:[#allocation7 + $0x290] ss:$12 sps:$4 sm:$0xff]  }
 0x240   : > { %v14492_v48 = vrot.slane %v11179_v32, %v14035_v47  ;;  %v14495_v25 = vrot.slane %v11181_v57, %v14035_v47  ;;  %v3926_v2 = vcombine.low %v14480_v46, %v14486_v8  ;;  %v11121_v45 = vcombine.high %v14331_v36, %v14334_v43  ;;  %v12613_v43 = vld [vmem:[#allocation7 + $0x1e4] ss:$12 sps:$4 sm:$0xff]  }
 0x241   : > { %v3815_v52 = vcombine.high %v3792_v50, %v14489_v10  ;;  %v4811_v15 = vpack.c.bf16 %v4459_v60, %v4315_v38  ;;  %v4810_v59 = vpack.c.bf16 %v4458_v0, %v4314_v62  ;;  %v3170_v26 = vrot.slane %v11120_v17, %v14035_v47  ;;  %v12614_v62 = vld [vmem:[#allocation7 + $0x2a8] ss:$12 sps:$4 sm:$0xff]   ;;  %v12611_v60 = vld [vmem:[#allocation7 + $0x1e0] ss:$12 sps:$4 sm:$0xff]  }
 0x242   : > { %v11134_v44 = vcombine.high %v14324_v54, %v14338_v13  ;;  %7485 = vmatpush1.bf16.msra.mxu0 %v12601_v40  ;;  %11824 = vmatpush3.bf16.msra.mxu1 %v12605_v51  ;;  %v3817_v50 = vcombine.high %v14492_v48, %v14495_v25  ;;  %v14508_v37 = vrot.slane %v3926_v2, %v14035_v47 }
 0x243   : > { %v11230_v36 = vcombine.low %v3815_v52, %v14492_v48  ;;  %7461 = vmatprep.mubr.bf16.mxu0 %v4811_v15  ;;  %7947 = vmatprep.mubr.bf16.mxu1 %v4811_v15  ;;  %v3177_v17 = vrot.slane %v11121_v45, %v14035_v47  ;;  %v3392_v13 = vcombine.low %v14378_v28, %v14453_v24  ;;  %v12615_v28 = vld [vmem:[#allocation7 + $0x1e8] ss:$12 sps:$4 sm:$0xff]  }
 0x244   : > { %v3305_v54 = vrot.slane %v11134_v44, %v14035_v47  ;;  %7462 = vmatmul.mubr.bf16.gmra.mrb[20].mxu0 %v4810_v59  ;;  %7948 = vmatmul.mubr.bf16.gmra.mrb[20].mxu1 %v4810_v59  ;;  %v11232_v40 = vcombine.low %v3817_v50, %v14508_v37  ;;  %v4011_v55 = vrot.slane %v3170_v26, %v14035_v47  ;;  %v12618_v45 = vld [vmem:[#allocation7 + $0x1fc] ss:$12 sps:$4 sm:$0xff]  }
 0x245   : > { %v4580_v51 = vrot.slane %v11230_v36, %v14035_v47  ;;  %7486 = vmatprep.subr.bf16.mxu0 %v12608_v20  ;;  %11825 = vmatprep.subr.bf16.mxu1 %v12609_v6  ;;  %v4025_v32 = vrot.slane %v3177_v17, %v14035_v47  ;;  %v11201_v38 = vcombine.high %v14381_v11, %v3392_v13  ;;  %v12616_v36 = vld [vmem:[#allocation7 + $0x1f8] ss:$12 sps:$4 sm:$0xff]  }
 0x246   : > { %v11199_v57 = vcombine.low %v3305_v54, %v14381_v11  ;;  %7487 = vmatpush1.bf16.msra.mxu0 %v12606_v1  ;;  %11826 = vmatpush3.bf16.msra.mxu1 %v12610_v23  ;;  %v4594_v0 = vrot.slane %v11232_v40, %v14035_v47  ;;  %v11154_v52 = vcombine.high %v14403_v16, %v14414_v29  ;;  %v12619_v11 = vld [vmem:[#allocation7 + $0x2c0] ss:$12 sps:$4 sm:$0xff]  }
 0x247   : > { %v11160_v2 = vcombine.high %v14419_v14, %v14425_v39  ;;  %7488 = vmatprep.subr.bf16.mxu0 %v12613_v43  ;;  %11827 = vmatprep.subr.bf16.mxu1 %v12614_v62  ;;  %v4028_v15 = vcombine.low %v4011_v55, %v4025_v32  ;;  %v4029_v59 = vcombine.high %v4011_v55, %v4025_v32  ;;  %v12620_v62 = vld [vmem:[#allocation7 + $0x200] ss:$12 sps:$4 sm:$0xff]   ;;  %v12625_v32 = vld [vmem:[#allocation7 + $0x218] ss:$12 sps:$4 sm:$0xff]  }
 0x248   : > { %v4155_v20 = vrot.slane %v11199_v57, %v14035_v47  ;;  %v4603_v6 = vcombine.high %v4580_v51, %v4594_v0  ;;  %v4602_v26 = vcombine.low %v4580_v51, %v4594_v0  ;;  %v4169_v44 = vrot.slane %v11201_v38, %v14035_v47  ;;  %v12629_v0 = vld [vmem:[#allocation7 + $0x2f0] ss:$12 sps:$4 sm:$0xff]  }
 0x249   : > { %v3517_v1 = vrot.slane %v11154_v52, %v14035_v47  ;;  %v11161_v16 = vcombine.high %v14428_v27, %v14435_v53  ;;  %v3594_v29 = vrot.slane %v11160_v2, %v14035_v47  ;;  %v11174_v39 = vcombine.high %v14432_v22, %v14438_v61  ;;  %v12623_v22 = vld [vmem:[#allocation7 + $0x214] ss:$12 sps:$4 sm:$0xff]   ;;  %v12624_v61 = vld [vmem:[#allocation7 + $0x2d8] ss:$12 sps:$4 sm:$0xff]  }
 0x24a   : > { %v3816_v14 = vcombine.low %v14492_v48, %v14495_v25  ;;  %7489 = vmatpush1.bf16.msra.mxu0 %v12611_v60  ;;  %11828 = vmatpush3.bf16.msra.mxu1 %v12615_v28  ;;  %v4827_v23 = vpack.c.bf16 %v4603_v6, %v4603_v6  ;;  %v4826_v50 = vpack.c.bf16 %v4602_v26, %v4602_v26  ;;  %v12628_v28 = vld [vmem:[#allocation7 + $0x22c] ss:$12 sps:$4 sm:$0xff]  }
 0x24b   : > { %v4172_v43 = vcombine.low %v4155_v20, %v4169_v44  ;;  %7490 = vmatprep.subr.bf16.mxu0 %v12618_v45  ;;  %v4173_v17 = vcombine.high %v4155_v20, %v4169_v44  ;;  %11829 = vmatprep.subr.bf16.mxu1 %v12619_v11  ;;  %v3518_v53 = vcombine.low %v14456_v19, %v3517_v1  ;;  %v12621_v19 = vld [vmem:[#allocation7 + $0x210] ss:$12 sps:$4 sm:$0xff]   ;;  %v12626_v11 = vld [vmem:[#allocation7 + $0x228] ss:$12 sps:$4 sm:$0xff]  }
 0x24c   : > { %v3601_v27 = vrot.slane %v11161_v16, %v14035_v47  ;;  %7471 = vmatprep.mubr.bf16.mxu0 %v4827_v23  ;;  %7955 = vmatprep.mubr.bf16.mxu1 %v4827_v23  ;;  %v3729_v48 = vrot.slane %v11174_v39, %v14035_v47  ;;  %v4313_v13 = vrot.slane %v3594_v29, %v14035_v47  ;;  %v12633_v1 = vld [vmem:[#allocation7 + $0x244] ss:$12 sps:$4 sm:$0xff]   ;;  %v12634_v16 = vld [vmem:[#allocation7 + $0x3c8] ss:$12 sps:$4 sm:$0xff]  }
 0x24d   : > { %v14538_v54 = vpack.c.bf16 %v4172_v43, %v4028_v15  ;;  %7472 = vmatmul.mubr.bf16.gmra.mrb[24].mxu0 %v4826_v50  ;;  %7956 = vmatmul.mubr.bf16.gmra.mrb[24].mxu1 %v4826_v50  ;;  %v4797_v40 = vpack.c.bf16 %v4173_v17, %v4029_v59  ;;  %v11215_v51 = vcombine.high %v14453_v24, %v3518_v53 }
 0x24e   : > { %v4443_v55 = vrot.slane %v3601_v27, %v14035_v47  ;;  %7491 = vmatpush1.bf16.msra.mxu0 %v12616_v36  ;;  %11830 = vmatpush3.bf16.msra.mxu1 %v12620_v62  ;;  %v11223_v57 = vcombine.low %v3729_v48, %v14489_v10  ;;  %v11194_v38 = vcombine.high %v14480_v46, %v14486_v8  ;;  %v12631_v27 = vld [vmem:[#allocation7 + $0x240] ss:$12 sps:$4 sm:$0xff]   ;;  %v12635_v48 = vld [vmem:[#allocation7 + $0x308] ss:$12 sps:$4 sm:$0xff]  }
 0x24f   : > { %v11231_v60 = vcombine.high %v14489_v10, %v3816_v14  ;;  %7512 = vmatprep.mubr.bf16.mxu0 %v4797_v40  ;;  %7995 = vmatprep.mubr.bf16.mxu1 %v4797_v40  ;;  %v4299_v52 = vrot.slane %v11215_v51, %v14035_v47  ;;  %v2318_v24 = vcombine.low %v14071_v33, %v14108_v56 }
 0x250   : > { %v2319_v2 = vcombine.high %v14071_v33, %v14108_v56  ;;  %7492 = vmatprep.subr.bf16.mxu0 %v12623_v22  ;;  %11831 = vmatprep.subr.bf16.mxu1 %v12624_v61  ;;  %v4457_v45 = vrot.slane %v11223_v57, %v14035_v47  ;;  %v3941_v46 = vrot.slane %v11194_v38, %v14035_v47  ;;  %v12630_v33 = vld [vmem:[#allocation7 + $0x230] ss:$12 sps:$4 sm:$0xff]  }
 0x251   : > { %v4587_v10 = vrot.slane %v11231_v60, %v14035_v47  ;;  %v4317_v8 = vcombine.high %v4299_v52, %v4313_v13  ;;  %v4316_v15 = vcombine.low %v4299_v52, %v4313_v13  ;;  %v2320_v59 = vcombine.low %v14112_v31, %v14116_v34  ;;  %v12638_v13 = vld [vmem:[#allocation7 + $0x25c] ss:$12 sps:$4 sm:$0xff]  }
 0x252   : > { %v2321_v20 = vcombine.high %v14112_v31, %v14116_v34  ;;  %7493 = vmatpush1.bf16.msra.mxu0 %v12621_v19  ;;  %11832 = vmatpush3.bf16.msra.mxu1 %v12625_v32  ;;  %v4461_v6 = vcombine.high %v4443_v55, %v4457_v45  ;;  %v4460_v26 = vcombine.low %v4443_v55, %v4457_v45  ;;  %v12639_v55 = vld [vmem:[#allocation7 + $0x3e0] ss:$12 sps:$4 sm:$0xff]   ;;  %v12636_v45 = vld [vmem:[#allocation7 + $0x258] ss:$12 sps:$4 sm:$0xff]  }
 0x253   : > { %v3942_v44 = vcombine.low %v14508_v37, %v3941_v46  ;;  %7494 = vmatprep.subr.bf16.mxu0 %v12628_v28  ;;  %11833 = vmatprep.subr.bf16.mxu1 %v12629_v0  ;;  %v14562_v29 = vrot.slane %v2318_v24, %v13814_v18  ;;  %v14565_v39 = vrot.slane %v2319_v2, %v13814_v18 }
 0x254   : > { %v14568_v14 = vrot.slane %v2320_v59, %v13814_v18  ;;  %v14570_v23 = vpack.c.bf16 %v4461_v6, %v4317_v8  ;;  %v14572_v50 = vpack.c.bf16 %v4460_v26, %v4316_v15  ;;  %v14576_v37 = vrot.slane %v2321_v20, %v13814_v18  ;;  %v12640_v8 = vld [vmem:[#allocation7 + $0x320] ss:$12 sps:$4 sm:$0xff]  }
 0x255   : > { %v11233_v36 = vcombine.high %v14495_v25, %v3942_v44  ;;  %v2362_v43 = vcombine.high %v14132_v12, %v14132_v12  ;;  %v14582_v62 = vrot.slane %v14132_v12, %v13814_v18  ;;  %v2411_v17 = vcombine.low %v14153_v35, %v14167_v49  ;;  %v12643_v15 = vld [vmem:[#allocation7 + $0x274] ss:$12 sps:$4 sm:$0xff]  }
 0x256   : > { %v2412_v53 = vcombine.high %v14153_v35, %v14167_v49  ;;  %7495 = vmatpush1.bf16.msra.mxu0 %v12626_v11  ;;  %11834 = vmatpush3.bf16.msra.mxu1 %v12630_v33  ;;  %v2413_v22 = vcombine.low %v14170_v21, %v14173_v30  ;;  %v2414_v61 = vcombine.high %v14170_v21, %v14173_v30  ;;  %v12644_v33 = vld [vmem:[#allocation7 + $0x3f8] ss:$12 sps:$4 sm:$0xff]  }
 0x257   : > { %v4601_v25 = vrot.slane %v11233_v36, %v14035_v47  ;;  %7496 = vmatprep.subr.bf16.mxu0 %v12633_v1  ;;  %11853 = vmatprep.subr.bf16.mxu1 %v12634_v16  ;;  %v14594_v40 = vrot.slane %v2362_v43, %v13814_v18  ;;  %v2421_v35 = vrot.slane %v2411_v17, %v13814_v18 }
 0x258   : > { %v2428_v51 = vrot.slane %v2412_v53, %v13814_v18  ;;  %v14599_v57 = vrot.slane %v2413_v22, %v13814_v18  ;;  %v14602_v38 = vrot.slane %v2414_v61, %v13814_v18  ;;  %v11122_v60 = vcombine.low %v14562_v29, %v14565_v39  ;;  %v12641_v53 = vld [vmem:[#allocation7 + $0x270] ss:$12 sps:$4 sm:$0xff]  }
 0x259   : > { %v4605_v19 = vcombine.high %v4587_v10, %v4601_v25  ;;  %v4604_v32 = vcombine.low %v4587_v10, %v4601_v25  ;;  %7996 = vmatmul.mubr.bf16.vlgmr.msra.gmra.mrb[28].mxu1 %v14538_v54  ;;  %v11123_v28 = vcombine.low %v14568_v14, %v14576_v37  ;;  %v3307_v0 = vcombine.low %v14582_v62, %v14594_v40 }
 0x25a   : > { %v11142_v52 = vcombine.low %v2421_v35, %v2428_v51  ;;  %v16330_v24 = vcombine.low %v14359_v58, %v14362_v9  ;;  %7497 = vmatpush1.bf16.msra.mxu0 %v12631_v27  ;;  %8003 = vmatprep.mubr.bf16.mxu1 %v14570_v23  ;;  %v11143_v10 = vcombine.low %v14599_v57, %v14602_v38 }
 0x25b   : > { %v14618_v46 = vpack.c.bf16 %v4605_v19, %v4605_v19  ;;  %11854 = vmatpush3.bf16.msra.mxu1 %v12635_v48  ;;  %7498 = vmatprep.subr.bf16.mxu0 %v12638_v13  ;;  %v14622_v59 = vpack.c.bf16 %v4604_v32, %v4604_v32  ;;  %v3192_v20 = vrot.slane %v11122_v60, %v14035_v47  ;;  %v12645_v48 = vld [vmem:[#allocation7 + $0x338] ss:$12 sps:$4 sm:$0xff]   ;;  %v12649_v19 = vld [vmem:[#allocation7 + $0x410] ss:$12 sps:$4 sm:$0xff]  }
 0x25c   : > { %v14615_v2 = vrot.slane %v16330_v24, %v13814_v18  ;;  %v3199_v11 = vrot.slane %v11123_v28, %v14035_v47  ;;  %11855 = vmatprep.subr.bf16.mxu1 %v12639_v55  ;;  %v3315_v6 = vrot.slane %v3307_v0, %v14035_v47  ;;  %v11144_v26 = vcombine.high %v2421_v35, %v2428_v51  ;;  %v12648_v13 = vld [vmem:[#allocation7 + $0x28c] ss:$12 sps:$4 sm:$0xff]  }
 0x25d   : > { %v3404_v44 = vrot.slane %v11142_v52, %v14035_v47  ;;  %v2455_v1 = vcombine.high %v14176_v42, %v14176_v42  ;;  %v14631_v16 = vrot.slane %v11143_v10, %v14035_v47  ;;  %v14634_v36 = vrot.slane %v3192_v20, %v14035_v47  ;;  %v12646_v10 = vld [vmem:[#allocation7 + $0x288] ss:$12 sps:$4 sm:$0xff]  }
 0x25e   : > { %16331 = vst [vmem:[#allocation66_spill] sm:$0xff] %v14615_v2  ;;  %v14637_v43 = vrot.slane %v3199_v11, %v14035_v47  ;;  %v2504_v17 = vcombine.low %v14248_v41, %v14252_v4  ;;  %7499 = vmatpush1.bf16.msra.mxu0 %v12636_v45  ;;  %v14642_v27 = vrot.slane %v11144_v26, %v14035_v47  ;;  %v16332_v20 = vld [vmem:[#allocation57_spill] sm:$0xff] }
 0x25f   : > { %v11202_v25 = vcombine.low %v3315_v6, %v3404_v44  ;;  %v14646_v22 = vrot.slane %v14176_v42, %v13814_v18  ;;  %v2505_v61 = vcombine.high %v14248_v41, %v14252_v4  ;;  %11856 = vmatpush3.bf16.msra.mxu1 %v12640_v8  ;;  %7500 = vmatprep.subr.bf16.mxu0 %v12643_v15  ;;  %v12653_v6 = vld [vmem:[#allocation7 + $0x2a4] ss:$12 sps:$4 sm:$0xff]  }
 0x260   : > { %v4062_v35 = vcombine.low %v14634_v36, %v14637_v43  ;;  %v14653_v51 = vrot.slane %v2455_v1, %v13814_v18  ;;  %v2506_v55 = vcombine.low %v14274_v5, %v14279_v7  ;;  %11857 = vmatprep.subr.bf16.mxu1 %v12644_v33  ;;  %v3427_v32 = vcombine.high %v3404_v44, %v14642_v27  ;;  %v12650_v33 = vld [vmem:[#allocation7 + $0x350] ss:$12 sps:$4 sm:$0xff]  }
 0x261   : > { %v4184_v60 = vrot.slane %v11202_v25, %v14035_v47  ;;  %v2507_v41 = vcombine.high %v14274_v5, %v14279_v7  ;;  %v14662_v28 = vrot.slane %v2504_v17, %v13814_v18  ;;  %8004 = vmatmul.mubr.bf16.gmra.mrb[32].mxu1 %v14572_v50  ;;  %v14666_v0 = vrot.slane %v2505_v61, %v13814_v18  ;;  %v12654_v17 = vld [vmem:[#allocation7 + $0x428] ss:$12 sps:$4 sm:$0xff]  }
 0x262   : > { %v14669_v52 = vrot.slane %v2506_v55, %v13814_v18  ;;  %v2548_v24 = vcombine.high %v14282_v3, %v14282_v3  ;;  %v14675_v45 = vrot.slane %v14282_v3, %v13814_v18  ;;  %7501 = vmatpush1.bf16.msra.mxu0 %v12641_v53  ;;  %8011 = vmatprep.mubr.bf16.mxu1 %v14618_v46 }
 0x263   : > { %v11204_v8 = vcombine.low %v3427_v32, %v14631_v16  ;;  %v14680_v15 = vrot.slane %v2507_v41, %v13814_v18  ;;  %v2597_v11 = vcombine.low %v16332_v20, %v14305_v63  ;;  %11858 = vmatpush3.bf16.msra.mxu1 %v12645_v48  ;;  %7502 = vmatprep.subr.bf16.mxu0 %v12648_v13 }
 0x264   : > { %v14685_v26 = vrot.slane %v2548_v24, %v13814_v18  ;;  %v2598_v44 = vcombine.high %v16332_v20, %v14305_v63  ;;  %v11145_v1 = vcombine.high %v14599_v57, %v14602_v38  ;;  %11859 = vmatprep.subr.bf16.mxu1 %v12649_v19  ;;  %v3519_v61 = vcombine.low %v14646_v22, %v14653_v51  ;;  %v12651_v19 = vld [vmem:[#allocation7 + $0x2a0] ss:$12 sps:$4 sm:$0xff]   ;;  %v12655_v20 = vld [vmem:[#allocation7 + $0x368] ss:$12 sps:$4 sm:$0xff]  }
 0x265   : > { %v4198_v53 = vrot.slane %v11204_v8, %v14035_v47  ;;  %v2607_v25 = vrot.slane %v2597_v11, %v13814_v18  ;;  %v11162_v48 = vcombine.low %v14662_v28, %v14666_v0  ;;  %v11163_v57 = vcombine.low %v14669_v52, %v14680_v15  ;;  %v12658_v11 = vld [vmem:[#allocation7 + $0x2bc] ss:$12 sps:$4 sm:$0xff]  }
 0x266   : > { %v2614_v13 = vrot.slane %v2598_v44, %v13814_v18  ;;  %v14699_v55 = vrot.slane %v11145_v1, %v14035_v47  ;;  %v3731_v38 = vcombine.low %v14675_v45, %v14685_v26  ;;  %7503 = vmatpush1.bf16.msra.mxu0 %v12646_v10  ;;  %v4063_v32 = vcombine.high %v14634_v36, %v14637_v43  ;;  %v12659_v36 = vld [vmem:[#allocation7 + $0x440] ss:$12 sps:$4 sm:$0xff]  }
 0x267   : > { %v4206_v41 = vcombine.low %v4184_v60, %v4198_v53  ;;  %v4207_v24 = vcombine.high %v4184_v60, %v4198_v53  ;;  %v3616_v8 = vrot.slane %v11162_v48, %v14035_v47  ;;  %11860 = vmatpush3.bf16.msra.mxu1 %v12650_v33  ;;  %7504 = vmatprep.subr.bf16.mxu0 %v12653_v6  ;;  %v16333_v48 = vld [vmem:[#allocation63_spill] sm:$0xff] }
 0x268   : > { %v3429_v44 = vcombine.high %v14631_v16, %v14699_v55  ;;  %v14711_v1 = vrot.slane %v3519_v61, %v14035_v47  ;;  %v3623_v10 = vrot.slane %v11163_v57, %v14035_v47  ;;  %11861 = vmatprep.subr.bf16.mxu1 %v12654_v17  ;;  %v3739_v60 = vrot.slane %v3731_v38, %v14035_v47  ;;  %v16334_v61 = vld [vmem:[#allocation62_spill] sm:$0xff] }
 0x269   : > { %v14714_v9 = vpack.c.bf16 %v4207_v24, %v4063_v32  ;;  %v14716_v43 = vpack.c.bf16 %v4206_v41, %v4062_v35  ;;  %v11182_v33 = vcombine.low %v2607_v25, %v2614_v13  ;;  %8012 = vmatmul.mubr.bf16.gmra.mrb[36].mxu1 %v14622_v59  ;;  %v4342_v53 = vrot.slane %v3616_v8, %v14035_v47  ;;  %v12656_v35 = vld [vmem:[#allocation7 + $0x2b8] ss:$12 sps:$4 sm:$0xff]   ;;  %v12660_v41 = vld [vmem:[#allocation7 + $0x380] ss:$12 sps:$4 sm:$0xff]  }
 0x26a   : > { %v11216_v6 = vcombine.low %v3429_v44, %v14711_v1  ;;  %v2599_v58 = vcombine.low %v16334_v61, %v16333_v48  ;;  %v2600_v17 = vcombine.high %v16334_v61, %v16333_v48  ;;  %7505 = vmatpush1.bf16.msra.mxu0 %v12651_v19  ;;  %v2641_v38 = vcombine.high %v14615_v2, %v14615_v2  ;;  %v12663_v24 = vld [vmem:[#allocation7 + $0x2d4] ss:$12 sps:$4 sm:$0xff]   ;;  %v12664_v48 = vld [vmem:[#allocation7 + $0x458] ss:$12 sps:$4 sm:$0xff]  }
 0x26b   : > { %8051 = vmatprep.mubr.bf16.mxu1 %v14714_v9  ;;  %v3828_v57 = vrot.slane %v11182_v33, %v14035_v47  ;;  %v14732_v32 = vrot.slane %v14615_v2, %v13814_v18  ;;  %11862 = vmatpush3.bf16.msra.mxu1 %v12655_v20  ;;  %v11184_v12 = vcombine.high %v2607_v25, %v2614_v13 }
 0x26c   : > { %7506 = vmatprep.subr.bf16.mxu0 %v12658_v11  ;;  %v4328_v8 = vrot.slane %v11216_v6, %v14035_v47  ;;  %v2621_v19 = vrot.slane %v2599_v58, %v13814_v18  ;;  %v2628_v44 = vrot.slane %v2600_v17, %v13814_v18  ;;  %11863 = vmatprep.subr.bf16.mxu1 %v12659_v36  ;;  %v12661_v6 = vld [vmem:[#allocation7 + $0x2d0] ss:$12 sps:$4 sm:$0xff]  }
 0x26d   : > { %v11224_v33 = vcombine.low %v3739_v60, %v3828_v57  ;;  %v14738_v34 = vrot.slane %v2641_v38, %v13814_v18  ;;  %v11124_v2 = vcombine.high %v14562_v29, %v14565_v39  ;;  %v4472_v11 = vrot.slane %v3623_v10, %v14035_v47  ;;  %v12665_v29 = vld [vmem:[#allocation7 + $0x398] ss:$12 sps:$4 sm:$0xff]  }
 0x26e   : > { %v4351_v20 = vcombine.high %v4328_v8, %v4342_v53  ;;  %v11183_v56 = vcombine.low %v2621_v19, %v2628_v44  ;;  %v11185_v31 = vcombine.high %v2621_v19, %v2628_v44  ;;  %7507 = vmatpush1.bf16.msra.mxu0 %v12656_v35  ;;  %v14745_v36 = vrot.slane %v11184_v12, %v14035_v47  ;;  %v12668_v39 = vld [vmem:[#allocation7 + $0x2ec] ss:$12 sps:$4 sm:$0xff]   ;;  %v12669_v12 = vld [vmem:[#allocation7 + $0x470] ss:$12 sps:$4 sm:$0xff]  }
 0x26f   : > { %v4486_v58 = vrot.slane %v11224_v33, %v14035_v47  ;;  %v3943_v60 = vcombine.low %v14732_v32, %v14738_v34  ;;  %v11125_v25 = vcombine.high %v14568_v14, %v14576_v37  ;;  %11864 = vmatpush3.bf16.msra.mxu1 %v12660_v41  ;;  %7508 = vmatprep.subr.bf16.mxu0 %v12663_v24  ;;  %v12673_v24 = vld [vmem:[#allocation7 + $0x304] ss:$12 sps:$4 sm:$0xff]  }
 0x270   : > { %v4350_v13 = vcombine.low %v4328_v8, %v4342_v53  ;;  %v14752_v10 = vrot.slane %v11183_v56, %v14035_v47  ;;  %v14755_v17 = vrot.slane %v11185_v31, %v14035_v47  ;;  %11865 = vmatprep.subr.bf16.mxu1 %v12664_v48  ;;  %v3851_v19 = vcombine.high %v3828_v57, %v14745_v36  ;;  %v12666_v53 = vld [vmem:[#allocation7 + $0x2e8] ss:$12 sps:$4 sm:$0xff]  }
 0x271   : > { %v4495_v35 = vcombine.high %v4472_v11, %v4486_v58  ;;  %v4494_v38 = vcombine.low %v4472_v11, %v4486_v58  ;;  %v3206_v44 = vrot.slane %v11124_v2, %v14035_v47  ;;  %v3213_v37 = vrot.slane %v11125_v25, %v14035_v47  ;;  %v12670_v2 = vld [vmem:[#allocation7 + $0x3b0] ss:$12 sps:$4 sm:$0xff]  }
 0x272   : > { %v3853_v14 = vcombine.high %v14752_v10, %v14755_v17  ;;  %v11135_v56 = vcombine.high %v14582_v62, %v14594_v40  ;;  %v3428_v31 = vcombine.low %v14631_v16, %v14699_v55  ;;  %7509 = vmatpush1.bf16.msra.mxu0 %v12661_v6  ;;  %v14771_v57 = vrot.slane %v3943_v60, %v14035_v47  ;;  %v12674_v40 = vld [vmem:[#allocation7 + $0x548] ss:$12 sps:$4 sm:$0xff]  }
 0x273   : > { %v14766_v48 = vpack.c.bf16 %v4495_v35, %v4351_v20  ;;  %v14768_v41 = vpack.c.bf16 %v4494_v38, %v4350_v13  ;;  %11866 = vmatpush3.bf16.msra.mxu1 %v12665_v29  ;;  %7510 = vmatprep.subr.bf16.mxu0 %v12668_v39  ;;  %v11234_v8 = vcombine.low %v3851_v19, %v14752_v10  ;;  %v12671_v13 = vld [vmem:[#allocation7 + $0x300] ss:$12 sps:$4 sm:$0xff]  }
 0x274   : > { %v3322_v62 = vrot.slane %v11135_v56, %v14035_v47  ;;  %11867 = vmatprep.subr.bf16.mxu1 %v12669_v12  ;;  %v11236_v16 = vcombine.low %v3853_v14, %v14771_v57  ;;  %v11205_v33 = vcombine.high %v14642_v27, %v3428_v31  ;;  %v11155_v20 = vcombine.high %v14646_v22, %v14653_v51 }
 0x275   : > { %v11164_v11 = vcombine.high %v14662_v28, %v14666_v0  ;;  %v4047_v6 = vrot.slane %v3206_v44, %v14035_v47  ;;  %v4061_v58 = vrot.slane %v3213_v37, %v14035_v47  ;;  %v11165_v39 = vcombine.high %v14669_v52, %v14680_v15  ;;  %v12675_v28 = vld [vmem:[#allocation7 + $0x488] ss:$12 sps:$4 sm:$0xff]   ;;  %v12679_v52 = vld [vmem:[#allocation7 + $0x560] ss:$12 sps:$4 sm:$0xff]  }
 0x276   : > { %v11203_v60 = vcombine.low %v3322_v62, %v14642_v27  ;;  %7511 = vmatpush1.bf16.msra.mxu0 %v12666_v53  ;;  %v4205_v25 = vrot.slane %v11205_v33, %v14035_v47  ;;  %v3534_v29 = vrot.slane %v11155_v20, %v14035_v47  ;;  %v12678_v0 = vld [vmem:[#allocation7 + $0x31c] ss:$12 sps:$4 sm:$0xff]   ;;  %v4616_v27 = vrot.slane %v11234_v8, %v14035_v47  ;;  %v12680_v53 = vld [vmem:[#allocation7 + $0x4a0] ss:$12 sps:$4 sm:$0xff]   ;;  %v12685_v20 = vld [vmem:[#allocation7 + $0x4b8] ss:$12 sps:$4 sm:$0xff]  }
 0x277   : > { %11868 = vmatpush3.bf16.msra.mxu1 %v12670_v2  ;;  %7541 = vmatprep.subr.bf16.mxu0 %v12673_v24  ;;  %v3630_v51 = vrot.slane %v11164_v11, %v14035_v47  ;;  %v4630_v12 = vrot.slane %v11236_v16, %v14035_v47  ;;  %v11175_v38 = vcombine.high %v14675_v45, %v14685_v26  ;;  %v12676_v45 = vld [vmem:[#allocation7 + $0x318] ss:$12 sps:$4 sm:$0xff]   ;;  %v12681_v16 = vld [vmem:[#allocation7 + $0x330] ss:$12 sps:$4 sm:$0xff]  }
 0x278   : > { %v4191_v22 = vrot.slane %v11203_v60, %v14035_v47  ;;  %11887 = vmatprep.subr.bf16.mxu1 %v12674_v40  ;;  %v3535_v35 = vcombine.low %v14711_v1, %v3534_v29  ;;  %v4064_v15 = vcombine.low %v4047_v6, %v4061_v58  ;;  %v4065_v19 = vcombine.high %v4047_v6, %v4061_v58  ;;  %v12688_v11 = vld [vmem:[#allocation7 + $0x34c] ss:$12 sps:$4 sm:$0xff]   ;;  %v12689_v29 = vld [vmem:[#allocation7 + $0x590] ss:$12 sps:$4 sm:$0xff]  }
 0x279   : > { %7513 = vmatmul.mubr.bf16.vlgmr.msra.gmra.mrb[16].mxu0 %v14538_v54  ;;  %v3637_v37 = vrot.slane %v11165_v39, %v14035_v47  ;;  %v3746_v56 = vrot.slane %v11175_v38, %v14035_v47  ;;  %v4349_v31 = vrot.slane %v3630_v51, %v14035_v47  ;;  %v4639_v8 = vcombine.high %v4616_v27, %v4630_v12  ;;  %v16340_v38 = vld [vmem:[#allocation47_spill] sm:$0xff] }
 0x27a   : > { %v4208_v44 = vcombine.low %v4191_v22, %v4205_v25  ;;  %v4209_v14 = vcombine.high %v4191_v22, %v4205_v25  ;;  %8052 = vmatmul.mubr.bf16.vlgmr.msra.gmra.mrb[40].mxu1 %v14716_v43  ;;  %7522 = vmatprep.mubr.bf16.mxu0 %v14570_v23  ;;  %v11217_v1 = vcombine.high %v14699_v55, %v3535_v35  ;;  %v12683_v23 = vld [vmem:[#allocation7 + $0x334] ss:$12 sps:$4 sm:$0xff]   ;;  %v12684_v55 = vld [vmem:[#allocation7 + $0x578] ss:$12 sps:$4 sm:$0xff]  }
 0x27b   : > { %7542 = vmatpush1.bf16.msra.mxu0 %v12671_v13  ;;  %8059 = vmatprep.mubr.bf16.mxu1 %v14766_v48  ;;  %v11225_v24 = vcombine.low %v3746_v56, %v14745_v36  ;;  %v4479_v62 = vrot.slane %v3637_v37, %v14035_v47  ;;  %v14812_v25 = vpack.c.bf16 %v4639_v8, %v4639_v8  ;;  %v12686_v22 = vld [vmem:[#allocation7 + $0x348] ss:$12 sps:$4 sm:$0xff]   ;;  %v16339_v35 = vld [vmem:[#allocation48_spill] sm:$0xff] }
 0x27c   : > { %v14802_v54 = vpack.c.bf16 %v4209_v14, %v4065_v19  ;;  %v14804_v26 = vpack.c.bf16 %v4208_v44, %v4064_v15  ;;  %11888 = vmatpush3.bf16.msra.mxu1 %v12675_v28  ;;  %7543 = vmatprep.subr.bf16.mxu0 %v12678_v0  ;;  %v4335_v2 = vrot.slane %v11217_v1, %v14035_v47  ;;  %v12693_v28 = vld [vmem:[#allocation7 + $0x364] ss:$12 sps:$4 sm:$0xff]   ;;  %v16342_v19 = vld [vmem:[#allocation49_spill] sm:$0xff] }
 0x27d   : > { %11889 = vmatprep.subr.bf16.mxu1 %v12679_v52  ;;  %v4493_v40 = vrot.slane %v11225_v24, %v14035_v47  ;;  %16337 = vst [vmem:[#allocation67_spill] sm:$0xff] %v14812_v25  ;;  %v4638_v51 = vcombine.low %v4616_v27, %v4630_v12  ;;  %v11195_v0 = vcombine.high %v14732_v32, %v14738_v34  ;;  %v16343_v44 = vld [vmem:[#allocation50_spill] sm:$0xff]  ;;  %v16346_v32 = vld [vmem:[#allocation43_spill] sm:$0xff] }
 0x27e   : > { %16335 = vst [vmem:[#allocation57_spill] sm:$0xff] %v14802_v54  ;;  %16336 = vst [vmem:[#allocation62_spill] sm:$0xff] %v14804_v26  ;;  %v4353_v33 = vcombine.high %v4335_v2, %v4349_v31  ;;  %v4352_v58 = vcombine.low %v4335_v2, %v4349_v31  ;;  %v2721_v52 = vcombine.low %v16340_v38, %v16339_v35  ;;  %v12694_v27 = vld [vmem:[#allocation7 + $0x5a8] ss:$12 sps:$4 sm:$0xff]   ;;  %v12691_v31 = vld [vmem:[#allocation7 + $0x360] ss:$12 sps:$4 sm:$0xff]  }
 0x27f   : > { %7544 = vmatpush1.bf16.msra.mxu0 %v12676_v45  ;;  %v4497_v6 = vcombine.high %v4479_v62, %v4493_v40  ;;  %v4496_v60 = vcombine.low %v4479_v62, %v4493_v40  ;;  %v16344_v14 = vcombine.low %v16342_v19, %v16343_v44  ;;  %v2722_v12 = vcombine.high %v16340_v38, %v16339_v35  ;;  %v16345_v34 = vld [vmem:[#allocation46_spill] sm:$0xff]  ;;  %v12698_v2 = vld [vmem:[#allocation7 + $0x37c] ss:$12 sps:$4 sm:$0xff]   ;;  %v12699_v40 = vld [vmem:[#allocation7 + $0x5c0] ss:$12 sps:$4 sm:$0xff]  }
 0x280   : > { %11890 = vmatpush3.bf16.msra.mxu1 %v12680_v53  ;;  %7545 = vmatprep.subr.bf16.mxu0 %v12683_v23  ;;  %v3852_v56 = vcombine.low %v14752_v10, %v14755_v17  ;;  %v2719_v1 = vcombine.low %v16346_v32, %v16345_v34  ;;  %v2720_v45 = vcombine.high %v16346_v32, %v16345_v34  ;;  %v12695_v23 = vld [vmem:[#allocation7 + $0x4e8] ss:$12 sps:$4 sm:$0xff]   ;;  %v12704_v19 = vld [vmem:[#allocation7 + $0x5d8] ss:$12 sps:$4 sm:$0xff]  }
 0x281   : > { %7523 = vmatmul.mubr.bf16.gmra.mrb[20].mxu0 %v14572_v50  ;;  %11891 = vmatprep.subr.bf16.mxu1 %v12684_v55  ;;  %v14816_v39 = vpack.c.bf16 %v4497_v6, %v4353_v33  ;;  %v14818_v13 = vpack.c.bf16 %v4496_v60, %v4352_v58  ;;  %v12690_v50 = vld [vmem:[#allocation7 + $0x4d0] ss:$12 sps:$4 sm:$0xff]   ;;  %v2823_v37 = vrot.slane %v16344_v14, %v13814_v18  ;;  %v12696_v60 = vld [vmem:[#allocation7 + $0x378] ss:$12 sps:$4 sm:$0xff]   ;;  %v12703_v35 = vld [vmem:[#allocation7 + $0x394] ss:$12 sps:$4 sm:$0xff]  }
 0x282   : > { %8060 = vmatmul.mubr.bf16.gmra.mrb[44].mxu1 %v14768_v41  ;;  %7532 = vmatprep.mubr.bf16.mxu0 %v14618_v46  ;;  %v16341_v46 = vld [vmem:[#allocation42_spill] sm:$0xff]  ;;  %v14839_v53 = vpack.c.bf16 %v4638_v51, %v4638_v51  ;;  %v14842_v24 = vrot.slane %v11195_v0, %v14035_v47  ;;  %v14845_v55 = vrot.slane %v2721_v52, %v13814_v18  ;;  %v12700_v0 = vld [vmem:[#allocation7 + $0x500] ss:$12 sps:$4 sm:$0xff]  }
 0x283   : > { %16338 = vst [vmem:[#allocation68_spill] sm:$0xff] %v14816_v39  ;;  %7546 = vmatpush1.bf16.msra.mxu0 %v12681_v16  ;;  %8067 = vmatprep.mubr.bf16.mxu1 %v14812_v25  ;;  %v2762_v15 = vrot.slane %v16341_v46, %v13814_v18  ;;  %v14848_v10 = vrot.slane %v2722_v12, %v13814_v18  ;;  %v16348_v16 = vld [vmem:[#allocation29_spill] sm:$0xff]  ;;  %v16349_v33 = vld [vmem:[#allocation30_spill] sm:$0xff]  ;;  %v16356_v12 = vld [vmem:[#allocation52_spill] sm:$0xff] }
 0x284   : > { %11892 = vmatpush3.bf16.msra.mxu1 %v12685_v20  ;;  %7547 = vmatprep.subr.bf16.mxu0 %v12688_v11  ;;  %16347 = vst [vmem:[#allocation48_spill] sm:$0xff] %v14839_v53  ;;  %v2824_v62 = vcombine.high %v2823_v37, %v2823_v37  ;;  %v16350_v20 = vcombine.high %v16348_v16, %v16349_v33  ;;  %v12705_v16 = vld [vmem:[#allocation7 + $0x518] ss:$12 sps:$4 sm:$0xff]   ;;  %v16361_v25 = vld [vmem:[#allocation65_spill] sm:$0xff] }
 0x285   : > { %11893 = vmatprep.subr.bf16.mxu1 %v12689_v29  ;;  %v2763_v8 = vcombine.high %v2762_v15, %v2762_v15  ;;  %v14860_v6 = vcombine.high %v14745_v36, %v3852_v56  ;;  %v14863_v58 = vrot.slane %v2719_v1, %v13814_v18  ;;  %v16351_v29 = vld [vmem:[#allocation33_spill] sm:$0xff]  ;;  %v3959_v38 = vcombine.low %v14771_v57, %v14842_v24  ;;  %v16357_v1 = vld [vmem:[#allocation55_spill] sm:$0xff] }
 0x286   : > { %v14855_v11 = vrot.slane %v16350_v20, %v13814_v18  ;;  %v11147_v46 = vcombine.low %v14845_v55, %v14848_v10  ;;  %v14893_v32 = vrot.slane %v2762_v15, %v13814_v18  ;;  %v14909_v15 = vrot.slane %v2824_v62, %v13814_v18  ;;  %v12708_v33 = vld [vmem:[#allocation7 + $0x3ac] ss:$12 sps:$4 sm:$0xff]  }
 0x287   : > { %7548 = vmatpush1.bf16.msra.mxu0 %v12686_v22  ;;  %v16352_v22 = vld [vmem:[#allocation32_spill] sm:$0xff]  ;;  %v14884_v14 = vrot.slane %v2763_v8, %v13814_v18 }
 0x288   : > { %11894 = vmatpush3.bf16.msra.mxu1 %v12690_v50  ;;  %7549 = vmatprep.subr.bf16.mxu0 %v12693_v28  ;;  %v2658_v51 = vcombine.low %v16352_v22, %v16351_v29  ;;  %v2659_v50 = vcombine.high %v16352_v22, %v16351_v29  ;;  %v16354_v28 = vld [vmem:[#allocation34_spill] sm:$0xff]  ;;  %v2702_v44 = vcombine.high %v14855_v11, %v14855_v11 }
 0x289   : > { %7533 = vmatmul.mubr.bf16.gmra.mrb[24].mxu0 %v14622_v59  ;;  %11895 = vmatprep.subr.bf16.mxu1 %v12694_v27  ;;  %v14866_v59 = vrot.slane %v2720_v45, %v13814_v18  ;;  %v16355_v27 = vld [vmem:[#allocation53_spill] sm:$0xff]  ;;  %v16358_v45 = vld [vmem:[#allocation54_spill] sm:$0xff]  ;;  %v14912_v20 = vrot.slane %v11147_v46, %v14035_v47 }
 0x28a   : > { %8068 = vmatmul.mubr.bf16.gmra.mrb[48].mxu1 %v14839_v53  ;;  %7573 = vmatprep.mubr.bf16.mxu0 %v14714_v9  ;;  %v16353_v9 = vld [vmem:[#allocation40_spill] sm:$0xff]  ;;  %v2780_v56 = vcombine.low %v16356_v12, %v16355_v27  ;;  %v2781_v57 = vcombine.high %v16356_v12, %v16355_v27 }
 0x28b   : > { %7550 = vmatpush1.bf16.msra.mxu0 %v12691_v31  ;;  %8107 = vmatprep.mubr.bf16.mxu1 %v14802_v54  ;;  %v2660_v36 = vcombine.low %v16354_v28, %v16353_v9  ;;  %v2661_v52 = vcombine.high %v16354_v28, %v16353_v9  ;;  %v11146_v34 = vcombine.low %v14863_v58, %v14866_v59  ;;  %v12709_v28 = vld [vmem:[#allocation7 + $0x5f0] ss:$12 sps:$4 sm:$0xff]   ;;  %v16360_v27 = vld [vmem:[#allocation56_spill] sm:$0xff] }
 0x28c   : > { %11896 = vmatpush3.bf16.msra.mxu1 %v12695_v23  ;;  %7551 = vmatprep.subr.bf16.mxu0 %v12698_v2  ;;  %v2782_v31 = vcombine.low %v16358_v45, %v16357_v1  ;;  %v2783_v23 = vcombine.high %v16358_v45, %v16357_v1  ;;  %v12701_v2 = vld [vmem:[#allocation7 + $0x390] ss:$12 sps:$4 sm:$0xff]   ;;  %v14900_v24 = vrot.slane %v2780_v56, %v13814_v18  ;;  %v12706_v1 = vld [vmem:[#allocation7 + $0x3a8] ss:$12 sps:$4 sm:$0xff]  }
 0x28d   : > { %11897 = vmatprep.subr.bf16.mxu1 %v12699_v40  ;;  %v14903_v8 = vrot.slane %v2781_v57, %v13814_v18  ;;  %v14906_v40 = vrot.slane %v2823_v37, %v13814_v18  ;;  %v16359_v37 = vld [vmem:[#allocation61_spill] sm:$0xff]  ;;  %v11148_v46 = vcombine.high %v14863_v58, %v14866_v59  ;;  %v14937_v45 = vrot.slane %v2660_v36, %v13814_v18  ;;  %v12710_v59 = vld [vmem:[#allocation7 + $0x530] ss:$12 sps:$4 sm:$0xff]  }
 0x28e   : > { %v14918_v9 = vrot.slane %v2783_v23, %v13814_v18  ;;  %v2841_v12 = vcombine.low %v16360_v27, %v16359_v37  ;;  %v2842_v62 = vcombine.high %v16360_v27, %v16359_v37  ;;  %v11237_v23 = vcombine.high %v14755_v17, %v3959_v38  ;;  %v12714_v37 = vld [vmem:[#allocation7 + $0x6c8] ss:$12 sps:$4 sm:$0xff]  }
 0x28f   : > { %7552 = vmatpush1.bf16.msra.mxu0 %v12696_v60  ;;  %v14915_v60 = vrot.slane %v2782_v31, %v13814_v18  ;;  %v11166_v56 = vcombine.low %v14900_v24, %v14903_v8  ;;  %v3748_v57 = vcombine.low %v14906_v40, %v14909_v15  ;;  %v12713_v31 = vld [vmem:[#allocation7 + $0x3c4] ss:$12 sps:$4 sm:$0xff]   ;;  %v14962_v17 = vrot.slane %v2702_v44, %v13814_v18  ;;  %v12715_v44 = vld [vmem:[#allocation7 + $0x608] ss:$12 sps:$4 sm:$0xff]  }
 0x290   : > { %11898 = vmatpush3.bf16.msra.mxu1 %v12700_v0  ;;  %7553 = vmatprep.subr.bf16.mxu0 %v12703_v35  ;;  %v11149_v0 = vcombine.high %v14845_v55, %v14848_v10  ;;  %v3536_v35 = vcombine.low %v14893_v32, %v14884_v14  ;;  %v14940_v55 = vrot.slane %v2841_v12, %v13814_v18 }
 0x291   : > { %11899 = vmatprep.subr.bf16.mxu1 %v12704_v19  ;;  %v11167_v19 = vcombine.low %v14915_v60, %v14918_v9  ;;  %v14943_v10 = vrot.slane %v2842_v62, %v13814_v18  ;;  %v14965_v38 = vrot.slane %v11146_v34, %v14035_v47  ;;  %v12711_v62 = vld [vmem:[#allocation7 + $0x3c0] ss:$12 sps:$4 sm:$0xff]   ;;  %v14981_v34 = vrot.slane %v2658_v51, %v13814_v18 }
 0x292   : > { %v14946_v58 = vrot.slane %v11149_v0, %v14035_v47  ;;  %v14953_v36 = vrot.slane %v3536_v35, %v14035_v47  ;;  %v4623_v0 = vrot.slane %v14860_v6, %v14035_v47  ;;  %v14991_v6 = vrot.slane %v14855_v11, %v13814_v18 }
 0x293   : > { %7554 = vmatpush1.bf16.msra.mxu0 %v12701_v2  ;;  %v14950_v2 = vrot.slane %v2661_v52, %v13814_v18  ;;  %v3659_v12 = vrot.slane %v11167_v19, %v14035_v47  ;;  %v14968_v52 = vrot.slane %v11148_v46, %v14035_v47  ;;  %v14987_v46 = vrot.slane %v2659_v50, %v13814_v18 }
 0x294   : > { %11900 = vmatpush3.bf16.msra.mxu1 %v12705_v16  ;;  %7555 = vmatprep.subr.bf16.mxu0 %v12708_v33  ;;  %v3465_v27 = vcombine.high %v14912_v20, %v14946_v58  ;;  %v3756_v16 = vrot.slane %v3748_v57, %v14035_v47  ;;  %v11186_v33 = vcombine.low %v14940_v55, %v14943_v10  ;;  %v12719_v57 = vld [vmem:[#allocation7 + $0x6e0] ss:$12 sps:$4 sm:$0xff]  }
 0x295   : > { %11901 = vmatprep.subr.bf16.mxu1 %v12709_v28  ;;  %v3652_v28 = vrot.slane %v11166_v56, %v14035_v47  ;;  %v12718_v56 = vld [vmem:[#allocation7 + $0x3dc] ss:$12 sps:$4 sm:$0xff]   ;;  %v11127_v29 = vcombine.low %v14937_v45, %v14950_v2  ;;  %v3324_v22 = vcombine.low %v14991_v6, %v14962_v17  ;;  %v3463_v11 = vcombine.high %v14965_v38, %v14968_v52 }
 0x296   : > { %v14974_v35 = vrot.slane %v11186_v33, %v14035_v47  ;;  %v11218_v19 = vcombine.low %v3465_v27, %v14953_v36  ;;  %v12720_v27 = vld [vmem:[#allocation7 + $0x620] ss:$12 sps:$4 sm:$0xff]  }
 0x297   : > { %7556 = vmatpush1.bf16.msra.mxu0 %v12706_v1  ;;  %v4637_v1 = vrot.slane %v11237_v23, %v14035_v47  ;;  %v4378_v50 = vrot.slane %v3652_v28, %v14035_v47  ;;  %v12716_v23 = vld [vmem:[#allocation7 + $0x3d8] ss:$12 sps:$4 sm:$0xff]  }
 0x298   : > { %11902 = vmatpush3.bf16.msra.mxu1 %v12710_v59  ;;  %7557 = vmatprep.subr.bf16.mxu0 %v12713_v31  ;;  %v4364_v59 = vrot.slane %v11218_v19, %v14035_v47  ;;  %v11226_v51 = vcombine.low %v3756_v16, %v14974_v35  ;;  %v4508_v31 = vrot.slane %v3659_v12, %v14035_v47  ;;  %v12723_v12 = vld [vmem:[#allocation7 + $0x3f4] ss:$12 sps:$4 sm:$0xff]   ;;  %v12724_v19 = vld [vmem:[#allocation7 + $0x6f8] ss:$12 sps:$4 sm:$0xff]  }
 0x299   : > { %11921 = vmatprep.subr.bf16.mxu1 %v12714_v37  ;;  %v11126_v16 = vcombine.low %v14981_v34, %v14987_v46 }
 0x29a   : > { %v4522_v37 = vrot.slane %v11226_v51, %v14035_v47  ;;  %v4387_v33 = vcombine.high %v4364_v59, %v4378_v50  ;;  %v4386_v28 = vcombine.low %v4364_v59, %v4378_v50  ;;  %v3332_v51 = vrot.slane %v3324_v22, %v14035_v47  ;;  %v16363_v22 = vld [vmem:[#allocation64_spill] sm:$0xff]  ;;  %v12728_v50 = vld [vmem:[#allocation7 + $0x40c] ss:$12 sps:$4 sm:$0xff]  }
 0x29b   : > { %8108 = vmatmul.mubr.bf16.vlgmr.msra.gmra.mrb[52].mxu1 %v14804_v26  ;;  %7558 = vmatpush1.bf16.msra.mxu0 %v12711_v62  ;;  %v4641_v26 = vcombine.high %v4623_v0, %v4637_v1  ;;  %v3235_v62 = vrot.slane %v11127_v29, %v14035_v47 }
 0x29c   : > { %8115 = vmatprep.mubr.bf16.mxu1 %v14816_v39  ;;  %11922 = vmatpush3.bf16.msra.mxu1 %v12715_v44  ;;  %v4531_v54 = vcombine.high %v4508_v31, %v4522_v37  ;;  %v4530_v49 = vcombine.low %v4508_v31, %v4522_v37  ;;  %v11208_v39 = vcombine.low %v3463_v11, %v14912_v20  ;;  %v12721_v44 = vld [vmem:[#allocation7 + $0x3f0] ss:$12 sps:$4 sm:$0xff]   ;;  %v12725_v31 = vld [vmem:[#allocation7 + $0x638] ss:$12 sps:$4 sm:$0xff]  }
 0x29d   : > { %7559 = vmatprep.subr.bf16.mxu0 %v12718_v56  ;;  %11923 = vmatprep.subr.bf16.mxu1 %v12719_v57  ;;  %v16362_v56 = vld [vmem:[#allocation58_spill] sm:$0xff]  ;;  %v11206_v29 = vcombine.low %v3332_v51, %v14965_v38  ;;  %v2884_v11 = vrot.slane %v16363_v22, %v13814_v18  ;;  %v15026_v37 = vpack.c.bf16 %v4641_v26, %v4641_v26 }
 0x29e   : > { %v15012_v21 = vpack.c.bf16 %v4531_v54, %v4387_v33  ;;  %v15014_v53 = vpack.c.bf16 %v4530_v49, %v4386_v28  ;;  %v2843_v57 = vcombine.low %v16362_v56, %v16361_v25  ;;  %v2844_v59 = vcombine.high %v16362_v56, %v16361_v25  ;;  %v12729_v54 = vld [vmem:[#allocation7 + $0x710] ss:$12 sps:$4 sm:$0xff]  }
 0x29f   : > { %7560 = vmatpush1.bf16.msra.mxu0 %v12716_v23  ;;  %v3228_v49 = vrot.slane %v11126_v16, %v14035_v47  ;;  %v11156_v23 = vcombine.high %v14893_v32, %v14884_v14  ;;  %v4640_v33 = vcombine.low %v4623_v0, %v4637_v1  ;;  %v15029_v25 = vrot.slane %v11208_v39, %v14035_v47  ;;  %v12730_v26 = vld [vmem:[#allocation7 + $0x650] ss:$12 sps:$4 sm:$0xff]   ;;  %v12734_v0 = vld [vmem:[#allocation7 + $0x728] ss:$12 sps:$4 sm:$0xff]  }
 0x2a0   : > { %11924 = vmatpush3.bf16.msra.mxu1 %v12720_v27  ;;  %7561 = vmatprep.subr.bf16.mxu0 %v12723_v12  ;;  %v11188_v38 = vcombine.high %v14940_v55, %v14943_v10  ;;  %v12726_v27 = vld [vmem:[#allocation7 + $0x408] ss:$12 sps:$4 sm:$0xff]   ;;  %v15035_v12 = vrot.slane %v3235_v62, %v14035_v47  ;;  %v2865_v16 = vrot.slane %v2843_v57, %v13814_v18  ;;  %v12733_v39 = vld [vmem:[#allocation7 + $0x424] ss:$12 sps:$4 sm:$0xff]  }
 0x2a1   : > { %11925 = vmatprep.subr.bf16.mxu1 %v12724_v19  ;;  %v2872_v14 = vrot.slane %v2844_v59, %v13814_v18  ;;  %v15041_v32 = vrot.slane %v11206_v29, %v14035_v47  ;;  %v3551_v55 = vrot.slane %v11156_v23, %v14035_v47  ;;  %v11168_v10 = vcombine.high %v14900_v24, %v14903_v8  ;;  %v12731_v8 = vld [vmem:[#allocation7 + $0x420] ss:$12 sps:$4 sm:$0xff]  }
 0x2a2   : > { %v15047_v1 = vrot.slane %v3228_v49, %v14035_v47  ;;  %v2885_v19 = vcombine.high %v2884_v11, %v2884_v11  ;;  %v11169_v28 = vcombine.high %v14915_v60, %v14918_v9  ;;  %v15054_v51 = vrot.slane %v11188_v38, %v14035_v47  ;;  %v12735_v60 = vld [vmem:[#allocation7 + $0x668] ss:$12 sps:$4 sm:$0xff]  }
 0x2a3   : > { %8116 = vmatmul.mubr.bf16.gmra.mrb[56].mxu1 %v14818_v13  ;;  %7562 = vmatpush1.bf16.msra.mxu0 %v12721_v44  ;;  %v4243_v62 = vcombine.high %v15041_v32, %v15029_v25  ;;  %v3552_v44 = vcombine.low %v14953_v36, %v3551_v55  ;;  %v11176_v24 = vcombine.high %v14906_v40, %v14909_v15  ;;  %v12738_v40 = vld [vmem:[#allocation7 + $0x43c] ss:$12 sps:$4 sm:$0xff]   ;;  %v12739_v15 = vld [vmem:[#allocation7 + $0x740] ss:$12 sps:$4 sm:$0xff]  }
 0x2a4   : > { %8123 = vmatprep.mubr.bf16.mxu1 %v15026_v37  ;;  %11926 = vmatpush3.bf16.msra.mxu1 %v12725_v31  ;;  %v4099_v56 = vcombine.high %v15047_v1, %v15035_v12  ;;  %v11187_v57 = vcombine.low %v2865_v16, %v2872_v14  ;;  %v3673_v59 = vrot.slane %v11169_v28, %v14035_v47 }
 0x2a5   : > { %7563 = vmatprep.subr.bf16.mxu0 %v12728_v50  ;;  %11927 = vmatprep.subr.bf16.mxu1 %v12729_v54  ;;  %v11189_v9 = vcombine.high %v2865_v16, %v2872_v14  ;;  %v3666_v31 = vrot.slane %v11168_v10, %v14035_v47  ;;  %v3763_v29 = vrot.slane %v11176_v24, %v14035_v47  ;;  %v12740_v16 = vld [vmem:[#allocation7 + $0x680] ss:$12 sps:$4 sm:$0xff]   ;;  %v12744_v10 = vld [vmem:[#allocation7 + $0x758] ss:$12 sps:$4 sm:$0xff]   ;;  %v12741_v24 = vld [vmem:[#allocation7 + $0x450] ss:$12 sps:$4 sm:$0xff]  }
 0x2a6   : > { %v15064_v36 = vpack.c.bf16 %v4640_v33, %v4640_v33  ;;  %v15067_v22 = vrot.slane %v2884_v11, %v13814_v18  ;;  %v15070_v50 = vrot.slane %v2885_v19, %v13814_v18  ;;  %v11219_v54 = vcombine.high %v14946_v58, %v3552_v44  ;;  %v12736_v33 = vld [vmem:[#allocation7 + $0x438] ss:$12 sps:$4 sm:$0xff]   ;;  %v12743_v14 = vld [vmem:[#allocation7 + $0x454] ss:$12 sps:$4 sm:$0xff]  }
 0x2a7   : > { %7564 = vmatpush1.bf16.msra.mxu0 %v12726_v27  ;;  %v15073_v49 = vpack.c.bf16 %v4243_v62, %v4099_v56  ;;  %v11227_v23 = vcombine.low %v3763_v29, %v15054_v51  ;;  %v4515_v38 = vrot.slane %v3673_v59, %v14035_v47  ;;  %v15079_v27 = vrot.slane %v11187_v57, %v14035_v47  ;;  %v12745_v56 = vld [vmem:[#allocation7 + $0x698] ss:$12 sps:$4 sm:$0xff]  }
 0x2a8   : > { %11928 = vmatpush3.bf16.msra.mxu1 %v12730_v26  ;;  %7565 = vmatprep.subr.bf16.mxu0 %v12733_v39  ;;  %v4371_v11 = vrot.slane %v11219_v54, %v14035_v47  ;;  %v15084_v26 = vrot.slane %v11189_v9, %v14035_v47  ;;  %v4385_v39 = vrot.slane %v3666_v31, %v14035_v47  ;;  %v12748_v57 = vld [vmem:[#allocation7 + $0x46c] ss:$12 sps:$4 sm:$0xff]   ;;  %v12749_v31 = vld [vmem:[#allocation7 + $0x770] ss:$12 sps:$4 sm:$0xff]  }
 0x2a9   : > { %11929 = vmatprep.subr.bf16.mxu1 %v12734_v0  ;;  %v4529_v55 = vrot.slane %v11227_v23, %v14035_v47  ;;  %v3960_v0 = vcombine.low %v15067_v22, %v15070_v50  ;;  %v16364_v29 = vld [vmem:[#allocation35_spill] sm:$0xff]  ;;  %v2965_v23 = vcombine.low %v14173_v30, %v14176_v42 }
 0x2aa   : > { %v4389_v19 = vcombine.high %v4371_v11, %v4385_v39  ;;  %v4388_v62 = vcombine.low %v4371_v11, %v4385_v39  ;;  %v3889_v59 = vcombine.high %v15079_v27, %v15084_v26  ;;  %v11136_v39 = vcombine.high %v14991_v6, %v14962_v17 }
 0x2ab   : > { %8124 = vmatmul.mubr.bf16.gmra.mrb[60].mxu1 %v15064_v36  ;;  %7566 = vmatpush1.bf16.msra.mxu0 %v12731_v8  ;;  %v4533_v28 = vcombine.high %v4515_v38, %v4529_v55  ;;  %v4532_v44 = vcombine.low %v4515_v38, %v4529_v55  ;;  %v3887_v8 = vcombine.high %v14974_v35, %v15054_v51  ;;  %v12750_v55 = vld [vmem:[#allocation7 + $0x6b0] ss:$12 sps:$4 sm:$0xff]  }
 0x2ac   : > { %11930 = vmatpush3.bf16.msra.mxu1 %v12735_v60  ;;  %8163 = vmatprep.mubr.bf16.mxu1 %v15073_v49  ;;  %v15103_v35 = vrot.slane %v3960_v0, %v14035_v47  ;;  %v2966_v38 = vcombine.high %v14173_v30, %v14176_v42  ;;  %v11128_v30 = vcombine.high %v14981_v34, %v14987_v46 }
 0x2ad   : > { %7567 = vmatprep.subr.bf16.mxu0 %v12738_v40  ;;  %11931 = vmatprep.subr.bf16.mxu1 %v12739_v15  ;;  %v15094_v60 = vpack.c.bf16 %v4533_v28, %v4389_v19  ;;  %v15096_v9 = vpack.c.bf16 %v4532_v44, %v4388_v62  ;;  %v16365_v40 = vld [vmem:[#allocation36_spill] sm:$0xff]  ;;  %v11238_v0 = vcombine.low %v3887_v8, %v15079_v27 }
 0x2ae   : > { %v16366_v15 = vcombine.low %v16364_v29, %v16365_v40  ;;  %v11240_v19 = vcombine.low %v3889_v59, %v15103_v35  ;;  %v4098_v42 = vcombine.low %v15047_v1, %v15035_v12  ;;  %v3464_v17 = vcombine.low %v14912_v20, %v14946_v58  ;;  %v12751_v12 = vld [vmem:[#allocation7 + $0x480] ss:$12 sps:$4 sm:$0xff]   ;;  %v12758_v1 = vld [vmem:[#allocation7 + $0x49c] ss:$12 sps:$4 sm:$0xff]  }
 0x2af   : > { %7568 = vmatpush1.bf16.msra.mxu0 %v12736_v33  ;;  %v16367_v33 = vld [vmem:[#allocation51_spill] sm:$0xff]  ;;  %v15126_v28 = vrot.slane %v2965_v23, %v13814_v18  ;;  %v15129_v62 = vrot.slane %v2966_v38, %v13814_v18  ;;  %v3339_v46 = vrot.slane %v11136_v39, %v14035_v47  ;;  %v15141_v58 = vrot.slane %v11128_v30, %v14035_v47  ;;  %v12759_v59 = vld [vmem:[#allocation7 + $0x860] ss:$12 sps:$4 sm:$0xff]  }
 0x2b0   : > { %11932 = vmatpush3.bf16.msra.mxu1 %v12740_v16  ;;  %7569 = vmatprep.subr.bf16.mxu0 %v12743_v14  ;;  %v3006_v54 = vrot.slane %v16366_v15, %v13814_v18  ;;  %v3067_v11 = vrot.slane %v16367_v33, %v13814_v18  ;;  %v4242_v16 = vcombine.low %v15041_v32, %v15029_v25  ;;  %v12746_v14 = vld [vmem:[#allocation7 + $0x468] ss:$12 sps:$4 sm:$0xff]  }
 0x2b1   : > { %11933 = vmatprep.subr.bf16.mxu1 %v12744_v10  ;;  %v12753_v10 = vld [vmem:[#allocation7 + $0x484] ss:$12 sps:$4 sm:$0xff]   ;;  %v12754_v25 = vld [vmem:[#allocation7 + $0x848] ss:$12 sps:$4 sm:$0xff]   ;;  %v11129_v32 = vcombine.high %v14937_v45, %v14950_v2  ;;  %v15135_v45 = vrot.slane %v11238_v0, %v14035_v47  ;;  %v15138_v20 = vrot.slane %v11240_v19, %v14035_v47  ;;  %v11207_v8 = vcombine.low %v3339_v46, %v14968_v52 }
 0x2b2   : > { %v3007_v6 = vcombine.high %v3006_v54, %v3006_v54  ;;  %v3068_v44 = vcombine.high %v3067_v11, %v3067_v11  ;;  %v15131_v34 = vpack.c.bf16 %v4242_v16, %v4098_v42  ;;  %v12755_v2 = vld [vmem:[#allocation7 + $0x788] ss:$12 sps:$4 sm:$0xff]   ;;  %v3025_v40 = vcombine.high %v14252_v4, %v14274_v5 }
 0x2b3   : > { %7570 = vmatpush1.bf16.msra.mxu0 %v12741_v24  ;;  %v3249_v24 = vrot.slane %v11129_v32, %v14035_v47  ;;  %v3026_v15 = vcombine.low %v14279_v7, %v14282_v3  ;;  %v15166_v23 = vrot.slane %v3067_v11, %v13814_v18  ;;  %v15172_v38 = vrot.slane %v3006_v54, %v13814_v18 }
 0x2b4   : > { %11934 = vmatpush3.bf16.msra.mxu1 %v12745_v56  ;;  %7571 = vmatprep.subr.bf16.mxu0 %v12748_v57  ;;  %v11209_v56 = vcombine.high %v14968_v52, %v3464_v17  ;;  %v3024_v57 = vcombine.low %v14252_v4, %v14274_v5  ;;  %v15152_v29 = vrot.slane %v3007_v6, %v13814_v18  ;;  %v12756_v4 = vld [vmem:[#allocation7 + $0x498] ss:$12 sps:$4 sm:$0xff]  }
 0x2b5   : > { %11935 = vmatprep.subr.bf16.mxu1 %v12749_v31  ;;  %v11151_v31 = vcombine.low %v15126_v28, %v15129_v62  ;;  %v4675_v5 = vcombine.high %v15135_v45, %v15138_v20  ;;  %v15178_v33 = vrot.slane %v3026_v15, %v13814_v18  ;;  %v15184_v16 = vrot.slane %v3068_v44, %v13814_v18  ;;  %v12765_v6 = vld [vmem:[#allocation7 + $0x7b8] ss:$12 sps:$4 sm:$0xff]   ;;  %v12770_v15 = vld [vmem:[#allocation7 + $0x7d0] ss:$12 sps:$4 sm:$0xff]  }
 0x2b6   : > { %v15163_v52 = vrot.slane %v3024_v57, %v13814_v18  ;;  %v3085_v39 = vcombine.low %v14305_v63, %v16334_v61  ;;  %v3553_v0 = vcombine.low %v15172_v38, %v15152_v29  ;;  %v15204_v32 = vrot.slane %v3249_v24, %v14035_v47 }
 0x2b7   : > { %7572 = vmatpush1.bf16.msra.mxu0 %v12746_v14  ;;  %v12764_v14 = vld [vmem:[#allocation7 + $0x878] ss:$12 sps:$4 sm:$0xff]   ;;  %v15187_v54 = vrot.slane %v11151_v31, %v14035_v47  ;;  %v3765_v42 = vcombine.low %v15166_v23, %v15184_v16  ;;  %v4674_v31 = vcombine.low %v15135_v45, %v15138_v20 }
 0x2b8   : > { %11936 = vmatpush3.bf16.msra.mxu1 %v12750_v55  ;;  %7602 = vmatprep.subr.bf16.mxu0 %v12753_v10  ;;  %v3086_v55 = vcombine.high %v14305_v63, %v16334_v61  ;;  %v11153_v10 = vcombine.high %v15126_v28, %v15129_v62  ;;  %v15207_v63 = vrot.slane %v11207_v8, %v14035_v47  ;;  %v12768_v28 = vld [vmem:[#allocation7 + $0x4cc] ss:$12 sps:$4 sm:$0xff]  }
 0x2b9   : > { %11955 = vmatprep.subr.bf16.mxu1 %v12754_v25  ;;  %v12761_v25 = vld [vmem:[#allocation7 + $0x4b0] ss:$12 sps:$4 sm:$0xff]   ;;  %v15210_v61 = vrot.slane %v3085_v39, %v13814_v18  ;;  %v15216_v62 = vrot.slane %v11209_v56, %v14035_v47  ;;  %v15222_v46 = vrot.slane %v3553_v0, %v14035_v47  ;;  %v3773_v57 = vrot.slane %v3765_v42, %v14035_v47  ;;  %v12771_v39 = vld [vmem:[#allocation7 + $0x4e0] ss:$12 sps:$4 sm:$0xff]   ;;  %v12775_v0 = vld [vmem:[#allocation7 + $0x7e8] ss:$12 sps:$4 sm:$0xff]  }
 0x2ba   : > { %7574 = vmatmul.mubr.bf16.vlgmr.msra.gmra.mrb[16].mxu0 %v14716_v43  ;;  %v3027_v43 = vcombine.high %v14279_v7, %v14282_v3  ;;  %v12760_v7 = vld [vmem:[#allocation7 + $0x7a0] ss:$12 sps:$4 sm:$0xff]   ;;  %v15213_v17 = vrot.slane %v3086_v55, %v13814_v18  ;;  %v15219_v44 = vrot.slane %v11153_v10, %v14035_v47  ;;  %v16368_v8 = vld [vmem:[#allocation67_spill] sm:$0xff]  ;;  %v15254_v55 = vpack.c.bf16 %v4674_v31, %v4674_v31 }
 0x2bb   : > { %8164 = vmatmul.mubr.bf16.vlgmr.msra.gmra.mrb[64].mxu1 %v15131_v34  ;;  %7583 = vmatprep.mubr.bf16.mxu0 %v14766_v48  ;;  %v15175_v48 = vrot.slane %v3025_v40, %v13814_v18  ;;  %v12763_v3 = vld [vmem:[#allocation7 + $0x4b4] ss:$12 sps:$4 sm:$0xff]   ;;  %v15241_v40 = vrot.slane %v15141_v58, %v14035_v47  ;;  %v11196_v42 = vcombine.high %v15067_v22, %v15070_v50  ;;  %v16373_v50 = vld [vmem:[#allocation31_spill] sm:$0xff] }
 0x2bc   : > { %7603 = vmatpush1.bf16.msra.mxu0 %v12751_v12  ;;  %8171 = vmatprep.mubr.bf16.mxu1 %v15012_v21  ;;  %v15181_v11 = vrot.slane %v3027_v43, %v13814_v18  ;;  %v15225_v12 = vpack.c.bf16 %v4675_v5, %v4675_v5  ;;  %v3501_v56 = vcombine.high %v15187_v54, %v15219_v44  ;;  %v12773_v43 = vld [vmem:[#allocation7 + $0x4e4] ss:$12 sps:$4 sm:$0xff]  }
 0x2bd   : > { %11956 = vmatpush3.bf16.msra.mxu1 %v12755_v2  ;;  %7604 = vmatprep.subr.bf16.mxu0 %v12758_v1  ;;  %v11170_v19 = vcombine.low %v15163_v52, %v15175_v48  ;;  %v12769_v2 = vld [vmem:[#allocation7 + $0x890] ss:$12 sps:$4 sm:$0xff]   ;;  %v4101_v20 = vcombine.high %v15241_v40, %v15204_v32  ;;  %v15271_v31 = vrot.slane %v16373_v50, %v13814_v18  ;;  %v12794_v50 = vld [vmem:[#allocation7 + $0x9c8] ss:$12 sps:$4 sm:$0xff]  }
 0x2be   : > { %11957 = vmatprep.subr.bf16.mxu1 %v12759_v59  ;;  %v11171_v30 = vcombine.low %v15178_v33, %v15181_v11  ;;  %v12766_v59 = vld [vmem:[#allocation7 + $0x4c8] ss:$12 sps:$4 sm:$0xff]  }
 0x2bf   : > { %v3688_v1 = vrot.slane %v11170_v19, %v14035_v47 }
 0x2c0   : > { %7605 = vmatpush1.bf16.msra.mxu0 %v12756_v4  ;;  %v3695_v24 = vrot.slane %v11171_v30, %v14035_v47  ;;  %v4245_v4 = vcombine.high %v15207_v63, %v15216_v62  ;;  %v12778_v30 = vld [vmem:[#allocation7 + $0x4fc] ss:$12 sps:$4 sm:$0xff]  }
 0x2c1   : > { %11958 = vmatpush3.bf16.msra.mxu1 %v12760_v7  ;;  %7606 = vmatprep.subr.bf16.mxu0 %v12763_v3  ;;  %v11220_v7 = vcombine.low %v3501_v56, %v15222_v46  ;;  %v12774_v3 = vld [vmem:[#allocation7 + $0x8a8] ss:$12 sps:$4 sm:$0xff]   ;;  %v4414_v45 = vrot.slane %v3688_v1, %v14035_v47  ;;  %v16371_v1 = vld [vmem:[#allocation44_spill] sm:$0xff] }
 0x2c2   : > { %7584 = vmatmul.mubr.bf16.gmra.mrb[20].mxu0 %v14768_v41  ;;  %11959 = vmatprep.subr.bf16.mxu1 %v12764_v14  ;;  %v11190_v41 = vcombine.low %v15210_v61, %v15213_v17  ;;  %v4544_v14 = vrot.slane %v3695_v24, %v14035_v47  ;;  %v15257_v19 = vpack.c.bf16 %v4245_v4, %v4101_v20  ;;  %v12783_v4 = vld [vmem:[#allocation7 + $0x514] ss:$12 sps:$4 sm:$0xff]   ;;  %v12784_v20 = vld [vmem:[#allocation7 + $0x8d8] ss:$12 sps:$4 sm:$0xff]  }
 0x2c3   : > { %8172 = vmatmul.mubr.bf16.gmra.mrb[68].mxu1 %v15014_v53  ;;  %7593 = vmatprep.mubr.bf16.mxu0 %v16368_v8  ;;  %v4400_v10 = vrot.slane %v11220_v7, %v14035_v47 }
 0x2c4   : > { %7607 = vmatpush1.bf16.msra.mxu0 %v12761_v25  ;;  %8179 = vmatprep.mubr.bf16.mxu1 %v15225_v12  ;;  %v15246_v5 = vrot.slane %v11190_v41, %v14035_v47 }
 0x2c5   : > { %11960 = vmatpush3.bf16.msra.mxu1 %v12765_v6  ;;  %7608 = vmatprep.subr.bf16.mxu0 %v12768_v28  ;;  %v16369_v6 = vld [vmem:[#allocation48_spill] sm:$0xff]  ;;  %v4423_v56 = vcombine.high %v4400_v10, %v4414_v45 }
 0x2c6   : > { %11961 = vmatprep.subr.bf16.mxu1 %v12769_v2  ;;  %v11228_v58 = vcombine.low %v3773_v57, %v15246_v5  ;;  %v12779_v28 = vld [vmem:[#allocation7 + $0x8c0] ss:$12 sps:$4 sm:$0xff]  }
 0x2c7   : > { %v16370_v2 = vld [vmem:[#allocation45_spill] sm:$0xff] }
 0x2c8   : > { %7609 = vmatpush1.bf16.msra.mxu0 %v12766_v59  ;;  %v4558_v25 = vrot.slane %v11228_v58, %v14035_v47  ;;  %v2963_v24 = vcombine.low %v16371_v1, %v16370_v2  ;;  %v2964_v8 = vcombine.high %v16371_v1, %v16370_v2  ;;  %v16372_v57 = vld [vmem:[#allocation57_spill] sm:$0xff]  ;;  %v4422_v59 = vcombine.low %v4400_v10, %v4414_v45  ;;  %v12789_v2 = vld [vmem:[#allocation7 + $0x8f0] ss:$12 sps:$4 sm:$0xff]  }
 0x2c9   : > { %11962 = vmatpush3.bf16.msra.mxu1 %v12770_v15  ;;  %7610 = vmatprep.subr.bf16.mxu0 %v12773_v43  ;;  %v12776_v15 = vld [vmem:[#allocation7 + $0x4f8] ss:$12 sps:$4 sm:$0xff]   ;;  %v12780_v43 = vld [vmem:[#allocation7 + $0x800] ss:$12 sps:$4 sm:$0xff]   ;;  %v3975_v45 = vrot.slane %v11196_v42, %v14035_v47  ;;  %v2946_v10 = vcombine.high %v15271_v31, %v15271_v31 }
 0x2ca   : > { %7594 = vmatmul.mubr.bf16.gmra.mrb[24].mxu0 %v16369_v6  ;;  %11963 = vmatprep.subr.bf16.mxu1 %v12774_v3  ;;  %v4567_v41 = vcombine.high %v4544_v14, %v4558_v25  ;;  %v4566_v22 = vcombine.low %v4544_v14, %v4558_v25  ;;  %v2973_v58 = vrot.slane %v2963_v24, %v13814_v18  ;;  %v12785_v42 = vld [vmem:[#allocation7 + $0x818] ss:$12 sps:$4 sm:$0xff]  }
 0x2cb   : > { %8180 = vmatmul.mubr.bf16.gmra.mrb[72].mxu1 %v15254_v55  ;;  %7634 = vmatprep.mubr.bf16.mxu0 %v16372_v57  ;;  %v2980_v14 = vrot.slane %v2964_v8, %v13814_v18  ;;  %v4100_v25 = vcombine.low %v15241_v40, %v15204_v32  ;;  %v12788_v6 = vld [vmem:[#allocation7 + $0x52c] ss:$12 sps:$4 sm:$0xff]   ;;  %v11173_v24 = vcombine.high %v15178_v33, %v15181_v11  ;;  %v12793_v33 = vld [vmem:[#allocation7 + $0x544] ss:$12 sps:$4 sm:$0xff]  }
 0x2cc   : > { %7611 = vmatpush1.bf16.msra.mxu0 %v12771_v39  ;;  %8219 = vmatprep.mubr.bf16.mxu1 %v15257_v19  ;;  %v15274_v7 = vpack.c.bf16 %v4567_v41, %v4423_v56  ;;  %v15276_v3 = vpack.c.bf16 %v4566_v22, %v4422_v59  ;;  %v11157_v39 = vcombine.high %v15172_v38, %v15152_v29  ;;  %v16376_v56 = vld [vmem:[#allocation41_spill] sm:$0xff]  ;;  %v16377_v57 = vld [vmem:[#allocation39_spill] sm:$0xff] }
 0x2cd   : > { %11964 = vmatpush3.bf16.msra.mxu1 %v12775_v0  ;;  %7612 = vmatprep.subr.bf16.mxu0 %v12778_v30  ;;  %v12781_v0 = vld [vmem:[#allocation7 + $0x510] ss:$12 sps:$4 sm:$0xff]   ;;  %v11192_v30 = vcombine.high %v15210_v61, %v15213_v17  ;;  %v11172_v29 = vcombine.high %v15163_v52, %v15175_v48  ;;  %v4244_v38 = vcombine.low %v15207_v63, %v15216_v62  ;;  %v12786_v52 = vld [vmem:[#allocation7 + $0x528] ss:$12 sps:$4 sm:$0xff]  }
 0x2ce   : > { %11965 = vmatprep.subr.bf16.mxu1 %v12779_v28  ;;  %v3568_v28 = vrot.slane %v11157_v39, %v14035_v47  ;;  %v3888_v61 = vcombine.low %v15079_v27, %v15084_v26  ;;  %v3976_v17 = vcombine.low %v15103_v35, %v3975_v45  ;;  %v11150_v32 = vcombine.low %v2973_v58, %v2980_v14  ;;  %v16374_v48 = vld [vmem:[#allocation38_spill] sm:$0xff]  ;;  %v16375_v63 = vld [vmem:[#allocation37_spill] sm:$0xff] }
 0x2cf   : > { %v11152_v40 = vcombine.high %v2973_v58, %v2980_v14  ;;  %v3702_v8 = vrot.slane %v11172_v29, %v14035_v47  ;;  %v2902_v62 = vcombine.low %v16375_v63, %v16374_v48  ;;  %v2904_v41 = vcombine.low %v16377_v57, %v16376_v56  ;;  %v12791_v14 = vld [vmem:[#allocation7 + $0x540] ss:$12 sps:$4 sm:$0xff]  }
 0x2d0   : > { %7613 = vmatpush1.bf16.msra.mxu0 %v12776_v15  ;;  %v3569_v1 = vcombine.low %v15222_v46, %v3568_v28  ;;  %v15306_v27 = vrot.slane %v11192_v30, %v14035_v47  ;;  %v11177_v35 = vcombine.high %v15166_v23, %v15184_v16  ;;  %v12790_v46 = vld [vmem:[#allocation7 + $0x830] ss:$12 sps:$4 sm:$0xff]   ;;  %v2903_v11 = vcombine.high %v16375_v63, %v16374_v48  ;;  %v12799_v28 = vld [vmem:[#allocation7 + $0x9e0] ss:$12 sps:$4 sm:$0xff]  }
 0x2d1   : > { %11966 = vmatpush3.bf16.msra.mxu1 %v12780_v43  ;;  %7614 = vmatprep.subr.bf16.mxu0 %v12783_v4  ;;  %v2905_v59 = vcombine.high %v16377_v57, %v16376_v56  ;;  %v3709_v22 = vrot.slane %v11173_v24, %v14035_v47  ;;  %v11239_v15 = vcombine.high %v15054_v51, %v3888_v61  ;;  %v12800_v48 = vld [vmem:[#allocation7 + $0x920] ss:$12 sps:$4 sm:$0xff]   ;;  %v12804_v56 = vld [vmem:[#allocation7 + $0x9f8] ss:$12 sps:$4 sm:$0xff]  }
 0x2d2   : > { %11967 = vmatprep.subr.bf16.mxu1 %v12784_v20  ;;  %v11241_v43 = vcombine.high %v15084_v26, %v3976_v17  ;;  %v3780_v23 = vrot.slane %v11177_v35, %v14035_v47  ;;  %v11221_v16 = vcombine.high %v15219_v44, %v3569_v1  ;;  %v15320_v4 = vrot.slane %v2946_v10, %v13814_v18  ;;  %v12796_v1 = vld [vmem:[#allocation7 + $0x558] ss:$12 sps:$4 sm:$0xff]   ;;  %v12803_v63 = vld [vmem:[#allocation7 + $0x574] ss:$12 sps:$4 sm:$0xff]  }
 0x2d3   : > { %v15323_v20 = vrot.slane %v11150_v32, %v14035_v47  ;;  %v15326_v45 = vrot.slane %v11152_v40, %v14035_v47  ;;  %v4421_v58 = vrot.slane %v3702_v8, %v14035_v47  ;;  %v15329_v51 = vpack.c.bf16 %v4244_v38, %v4100_v25 }
 0x2d4   : > { %7615 = vmatpush1.bf16.msra.mxu0 %v12781_v0  ;;  %v15332_v26 = vrot.slane %v2904_v41, %v13814_v18  ;;  %v11229_v39 = vcombine.low %v3780_v23, %v15306_v27  ;;  %v4551_v10 = vrot.slane %v3709_v22, %v14035_v47  ;;  %v12795_v0 = vld [vmem:[#allocation7 + $0x908] ss:$12 sps:$4 sm:$0xff]   ;;  %v15337_v30 = vrot.slane %v2905_v59, %v13814_v18  ;;  %v12801_v59 = vld [vmem:[#allocation7 + $0x570] ss:$12 sps:$4 sm:$0xff]   ;;  %v12805_v22 = vld [vmem:[#allocation7 + $0x938] ss:$12 sps:$4 sm:$0xff]  }
 0x2d5   : > { %11968 = vmatpush3.bf16.msra.mxu1 %v12785_v42  ;;  %7616 = vmatprep.subr.bf16.mxu0 %v12788_v6  ;;  %v15341_v42 = vrot.slane %v15271_v31, %v13814_v18  ;;  %v4407_v25 = vrot.slane %v11221_v16, %v14035_v47  ;;  %v12798_v6 = vld [vmem:[#allocation7 + $0x55c] ss:$12 sps:$4 sm:$0xff]   ;;  %v4659_v29 = vrot.slane %v11239_v15, %v14035_v47 }
 0x2d6   : > { %11969 = vmatprep.subr.bf16.mxu1 %v12789_v2  ;;  %v15346_v38 = vrot.slane %v2902_v62, %v13814_v18  ;;  %v15349_v2 = vrot.slane %v2903_v11, %v13814_v18  ;;  %v4565_v61 = vrot.slane %v11229_v39, %v14035_v47  ;;  %v4673_v17 = vrot.slane %v11241_v43, %v14035_v47  ;;  %v12808_v43 = vld [vmem:[#allocation7 + $0x58c] ss:$12 sps:$4 sm:$0xff]   ;;  %v12809_v23 = vld [vmem:[#allocation7 + $0xa10] ss:$12 sps:$4 sm:$0xff]  }
 0x2d7   : > { %v3341_v31 = vcombine.low %v15341_v42, %v15320_v4  ;;  %v3499_v32 = vcombine.high %v15323_v20, %v15326_v45  ;;  %v4425_v40 = vcombine.high %v4407_v25, %v4421_v58  ;;  %v4424_v8 = vcombine.low %v4407_v25, %v4421_v58  ;;  %v16378_v39 = vld [vmem:[#allocation66_spill] sm:$0xff] }
 0x2d8   : > { %7617 = vmatpush1.bf16.msra.mxu0 %v12786_v52  ;;  %v4569_v24 = vcombine.high %v4551_v10, %v4565_v61  ;;  %v4568_v52 = vcombine.low %v4551_v10, %v4565_v61  ;;  %v11131_v62 = vcombine.low %v15332_v26, %v15337_v30  ;;  %v11130_v57 = vcombine.low %v15346_v38, %v15349_v2  ;;  %v16379_v10 = vld [vmem:[#allocation63_spill] sm:$0xff] }
 0x2d9   : > { %11970 = vmatpush3.bf16.msra.mxu1 %v12790_v46  ;;  %7618 = vmatprep.subr.bf16.mxu0 %v12793_v33  ;;  %v4677_v46 = vcombine.high %v4659_v29, %v4673_v17  ;;  %v3349_v33 = vrot.slane %v3341_v31, %v14035_v47  ;;  %v11212_v11 = vcombine.low %v3499_v32, %v15187_v54  ;;  %v12810_v32 = vld [vmem:[#allocation7 + $0x950] ss:$12 sps:$4 sm:$0xff]  }
 0x2da   : > { %11989 = vmatprep.subr.bf16.mxu1 %v12794_v50  ;;  %v15363_v41 = vpack.c.bf16 %v4569_v24, %v4425_v40  ;;  %v15365_v35 = vpack.c.bf16 %v4568_v52, %v4424_v8  ;;  %v3271_v50 = vrot.slane %v11131_v62, %v14035_v47  ;;  %v3264_v16 = vrot.slane %v11130_v57, %v14035_v47  ;;  %v12813_v40 = vld [vmem:[#allocation7 + $0x5a4] ss:$12 sps:$4 sm:$0xff]   ;;  %v12814_v52 = vld [vmem:[#allocation7 + $0xa28] ss:$12 sps:$4 sm:$0xff]   ;;  %v12811_v57 = vld [vmem:[#allocation7 + $0x5a0] ss:$12 sps:$4 sm:$0xff]  }
 0x2db   : > { %v11210_v15 = vcombine.low %v3349_v33, %v15323_v20  ;;  %v15372_v58 = vpack.c.bf16 %v4677_v46, %v4677_v46  ;;  %v3088_v25 = vcombine.high %v16379_v10, %v16378_v39  ;;  %v12806_v20 = vld [vmem:[#allocation7 + $0x588] ss:$12 sps:$4 sm:$0xff]   ;;  %v4676_v8 = vcombine.low %v4659_v29, %v4673_v17  ;;  %v12819_v17 = vld [vmem:[#allocation7 + $0xa40] ss:$12 sps:$4 sm:$0xff]  }
 0x2dc   : > { %8220 = vmatmul.mubr.bf16.vlgmr.msra.gmra.mrb[76].mxu1 %v15329_v51  ;;  %7619 = vmatpush1.bf16.msra.mxu0 %v12791_v14  ;;  %v15375_v14 = vrot.slane %v11212_v11, %v14035_v47  ;;  %v12815_v46 = vld [vmem:[#allocation7 + $0x968] ss:$12 sps:$4 sm:$0xff]  }
 0x2dd   : > { %8227 = vmatprep.mubr.bf16.mxu1 %v15094_v60  ;;  %11990 = vmatpush3.bf16.msra.mxu1 %v12795_v0  ;;  %v3087_v0 = vcombine.low %v16379_v10, %v16378_v39  ;;  %v15391_v24 = vrot.slane %v11210_v15, %v14035_v47  ;;  %v12818_v29 = vld [vmem:[#allocation7 + $0x5bc] ss:$12 sps:$4 sm:$0xff]  }
 0x2de   : > { %7620 = vmatprep.subr.bf16.mxu0 %v12798_v6  ;;  %11991 = vmatprep.subr.bf16.mxu1 %v12799_v28  ;;  %v16380_v6 = vld [vmem:[#allocation59_spill] sm:$0xff]  ;;  %v16381_v28 = vld [vmem:[#allocation60_spill] sm:$0xff] }
 0x2df   : > { %v16382_v61 = vcombine.high %v16380_v6, %v16381_v28  ;;  %v3109_v62 = vrot.slane %v3087_v0, %v13814_v18  ;;  %v12824_v0 = vld [vmem:[#allocation7 + $0xa58] ss:$12 sps:$4 sm:$0xff]   ;;  %v12821_v6 = vld [vmem:[#allocation7 + $0x5d0] ss:$12 sps:$4 sm:$0xff]  }
 0x2e0   : > { %7621 = vmatpush1.bf16.msra.mxu0 %v12796_v1  ;;  %v15388_v1 = vrot.slane %v3271_v50, %v14035_v47  ;;  %v12825_v28 = vld [vmem:[#allocation7 + $0x998] ss:$12 sps:$4 sm:$0xff]  }
 0x2e1   : > { %11992 = vmatpush3.bf16.msra.mxu1 %v12800_v48  ;;  %7622 = vmatprep.subr.bf16.mxu0 %v12803_v63  ;;  %v3128_v31 = vrot.slane %v16382_v61, %v13814_v18  ;;  %v4112_v48 = vrot.slane %v3264_v16, %v14035_v47  ;;  %v4279_v63 = vcombine.high %v15391_v24, %v15375_v14  ;;  %v12823_v16 = vld [vmem:[#allocation7 + $0x5d4] ss:$12 sps:$4 sm:$0xff]   ;;  %v12828_v61 = vld [vmem:[#allocation7 + $0x5ec] ss:$12 sps:$4 sm:$0xff]  }
 0x2e2   : > { %11993 = vmatprep.subr.bf16.mxu1 %v12804_v56  ;;  %v3116_v56 = vrot.slane %v3088_v25, %v13814_v18 }
 0x2e3   : > { %v4135_v33 = vcombine.high %v4112_v48, %v15388_v1  ;;  %v3129_v11 = vcombine.high %v3128_v31, %v3128_v31  ;;  %v15406_v39 = vrot.slane %v3128_v31, %v13814_v18 }
 0x2e4   : > { %8228 = vmatmul.mubr.bf16.gmra.mrb[80].mxu1 %v15096_v9  ;;  %7623 = vmatpush1.bf16.msra.mxu0 %v12801_v59  ;;  %v15399_v59 = vpack.c.bf16 %v4676_v8, %v4676_v8  ;;  %v11191_v50 = vcombine.low %v3109_v62, %v3116_v56  ;;  %v11193_v15 = vcombine.high %v3109_v62, %v3116_v56  ;;  %v12826_v8 = vld [vmem:[#allocation7 + $0x5e8] ss:$12 sps:$4 sm:$0xff]  }
 0x2e5   : > { %8235 = vmatprep.mubr.bf16.mxu1 %v15372_v58  ;;  %11994 = vmatpush3.bf16.msra.mxu1 %v12805_v22  ;;  %v15401_v22 = vpack.c.bf16 %v4279_v63, %v4135_v33  ;;  %v15409_v10 = vrot.slane %v3129_v11, %v13814_v18  ;;  %v12829_v18 = vld [vmem:[#allocation7 + $0xa70] ss:$12 sps:$4 sm:$0xff]   ;;  %v4278_v56 = vcombine.low %v15391_v24, %v15375_v14  ;;  %v12831_v11 = vld [vmem:[#allocation7 + $0x600] ss:$12 sps:$4 sm:$0xff]  }
 0x2e6   : > { %7624 = vmatprep.subr.bf16.mxu0 %v12808_v43  ;;  %11995 = vmatprep.subr.bf16.mxu1 %v12809_v23  ;;  %v12816_v43 = vld [vmem:[#allocation7 + $0x5b8] ss:$12 sps:$4 sm:$0xff]   ;;  %v12820_v23 = vld [vmem:[#allocation7 + $0x980] ss:$12 sps:$4 sm:$0xff]   ;;  %v15412_v25 = vrot.slane %v11191_v50, %v14035_v47  ;;  %v4134_v33 = vcombine.low %v4112_v48, %v15388_v1  ;;  %v12838_v50 = vld [vmem:[#allocation7 + $0x61c] ss:$12 sps:$4 sm:$0xff]   ;;  %v3500_v1 = vcombine.low %v15187_v54, %v15219_v44 }
 0x2e7   : > { %v3977_v31 = vcombine.low %v15406_v39, %v15409_v10  ;;  %v12833_v63 = vld [vmem:[#allocation7 + $0x604] ss:$12 sps:$4 sm:$0xff]   ;;  %v12839_v14 = vld [vmem:[#allocation7 + $0xb60] ss:$12 sps:$4 sm:$0xff]   ;;  %v11132_v54 = vcombine.high %v15346_v38, %v15349_v2 }
 0x2e8   : > { %7625 = vmatpush1.bf16.msra.mxu0 %v12806_v20  ;;  %v15415_v20 = vrot.slane %v11193_v15, %v14035_v47  ;;  %v16383_v15 = vld [vmem:[#allocation62_spill] sm:$0xff]  ;;  %v16384_v48 = vld [vmem:[#allocation68_spill] sm:$0xff] }
 0x2e9   : > { %11996 = vmatpush3.bf16.msra.mxu1 %v12810_v32  ;;  %7626 = vmatprep.subr.bf16.mxu0 %v12813_v40  ;;  %v3923_v32 = vcombine.high %v15246_v5, %v15306_v27  ;;  %v15424_v62 = vrot.slane %v3977_v31, %v14035_v47  ;;  %v12841_v31 = vld [vmem:[#allocation7 + $0x630] ss:$12 sps:$4 sm:$0xff]   ;;  %v3278_v2 = vrot.slane %v11132_v54, %v14035_v47  ;;  %v12868_v54 = vld [vmem:[#allocation7 + $0x6ac] ss:$12 sps:$4 sm:$0xff]  }
 0x2ea   : > { %11997 = vmatprep.subr.bf16.mxu1 %v12814_v52  ;;  %v3925_v40 = vcombine.high %v15412_v25, %v15415_v20  ;;  %v12830_v52 = vld [vmem:[#allocation7 + $0x9b0] ss:$12 sps:$4 sm:$0xff]  }
 0x2eb   : > { %v12849_v38 = vld [vmem:[#allocation7 + $0xb90] ss:$12 sps:$4 sm:$0xff]  }
 0x2ec   : > { %8236 = vmatmul.mubr.bf16.gmra.mrb[84].mxu1 %v15399_v59  ;;  %7627 = vmatpush1.bf16.msra.mxu0 %v12811_v57  ;;  %v12834_v57 = vld [vmem:[#allocation7 + $0xb48] ss:$12 sps:$4 sm:$0xff]   ;;  %v11244_v5 = vcombine.low %v3925_v40, %v15424_v62 }
 0x2ed   : > { %11998 = vmatpush3.bf16.msra.mxu1 %v12815_v46  ;;  %8275 = vmatprep.mubr.bf16.mxu1 %v15401_v22  ;;  %v11242_v46 = vcombine.low %v3923_v32, %v15412_v25  ;;  %v12848_v32 = vld [vmem:[#allocation7 + $0x64c] ss:$12 sps:$4 sm:$0xff]  }
 0x2ee   : > { %7628 = vmatprep.subr.bf16.mxu0 %v12818_v29  ;;  %11999 = vmatprep.subr.bf16.mxu1 %v12819_v17  ;;  %v15431_v29 = vpack.c.bf16 %v4278_v56, %v4134_v33  ;;  %v12835_v17 = vld [vmem:[#allocation7 + $0xa88] ss:$12 sps:$4 sm:$0xff]   ;;  %v12853_v56 = vld [vmem:[#allocation7 + $0x664] ss:$12 sps:$4 sm:$0xff]   ;;  %v12851_v33 = vld [vmem:[#allocation7 + $0x660] ss:$12 sps:$4 sm:$0xff]  }
 0x2ef   : > { %v4688_v24 = vrot.slane %v11242_v46, %v14035_v47  ;;  %v12854_v46 = vld [vmem:[#allocation7 + $0xba8] ss:$12 sps:$4 sm:$0xff]  }
 0x2f0   : > { %7629 = vmatpush1.bf16.msra.mxu0 %v12816_v43  ;;  %v4702_v43 = vrot.slane %v11244_v5, %v14035_v47  ;;  %v15468_v5 = vrot.slane %v3278_v2, %v14035_v47 }
 0x2f1   : > { %12000 = vmatpush3.bf16.msra.mxu1 %v12820_v23  ;;  %7630 = vmatprep.subr.bf16.mxu0 %v12823_v16  ;;  %v11137_v23 = vcombine.high %v15341_v42, %v15320_v4  ;;  %v12836_v16 = vld [vmem:[#allocation7 + $0x618] ss:$12 sps:$4 sm:$0xff]  }
 0x2f2   : > { %12001 = vmatprep.subr.bf16.mxu1 %v12824_v0  ;;  %v11133_v0 = vcombine.high %v15332_v26, %v15337_v30  ;;  %v12844_v4 = vld [vmem:[#allocation7 + $0xb78] ss:$12 sps:$4 sm:$0xff]   ;;  %v4711_v42 = vcombine.high %v4688_v24, %v4702_v43 }
 0x2f3   : > { %v3356_v44 = vrot.slane %v11137_v23, %v14035_v47  ;;  %v12845_v30 = vld [vmem:[#allocation7 + $0xab8] ss:$12 sps:$4 sm:$0xff]   ;;  %v11197_v23 = vcombine.high %v15406_v39, %v15409_v10  ;;  %v12861_v39 = vld [vmem:[#allocation7 + $0x690] ss:$12 sps:$4 sm:$0xff]  }
 0x2f4   : > { %7631 = vmatpush1.bf16.msra.mxu0 %v12821_v6  ;;  %v12840_v6 = vld [vmem:[#allocation7 + $0xaa0] ss:$12 sps:$4 sm:$0xff]   ;;  %v15452_v40 = vpack.c.bf16 %v4711_v42, %v4711_v42  ;;  %v12865_v10 = vld [vmem:[#allocation7 + $0xb18] ss:$12 sps:$4 sm:$0xff]  }
 0x2f5   : > { %12002 = vmatpush3.bf16.msra.mxu1 %v12825_v28  ;;  %7632 = vmatprep.subr.bf16.mxu0 %v12828_v61  ;;  %v12843_v28 = vld [vmem:[#allocation7 + $0x634] ss:$12 sps:$4 sm:$0xff]   ;;  %v11213_v61 = vcombine.high %v15326_v45, %v3500_v1  ;;  %v11211_v26 = vcombine.low %v3356_v44, %v15326_v45  ;;  %v12856_v1 = vld [vmem:[#allocation7 + $0x678] ss:$12 sps:$4 sm:$0xff]   ;;  %v3992_v42 = vrot.slane %v11197_v23, %v14035_v47  ;;  %v12869_v44 = vld [vmem:[#allocation7 + $0xbf0] ss:$12 sps:$4 sm:$0xff]  }
 0x2f6   : > { %12003 = vmatprep.subr.bf16.mxu1 %v12829_v18  ;;  %v3285_v18 = vrot.slane %v11133_v0, %v14035_v47  ;;  %v12846_v45 = vld [vmem:[#allocation7 + $0x648] ss:$12 sps:$4 sm:$0xff]  }
 0x2f8   : > { %7633 = vmatpush1.bf16.msra.mxu0 %v12826_v8  ;;  %v15456_v8 = vrot.slane %v11213_v61, %v14035_v47  ;;  %v3924_v61 = vcombine.low %v15412_v25, %v15415_v20 }
 0x2f9   : > { %12004 = vmatpush3.bf16.msra.mxu1 %v12830_v52  ;;  %7663 = vmatprep.subr.bf16.mxu0 %v12833_v63  ;;  %v15462_v52 = vrot.slane %v3285_v18, %v14035_v47  ;;  %v12850_v63 = vld [vmem:[#allocation7 + $0xad0] ss:$12 sps:$4 sm:$0xff]   ;;  %v12866_v18 = vld [vmem:[#allocation7 + $0x6a8] ss:$12 sps:$4 sm:$0xff]  }
 0x2fa   : > { %12023 = vmatprep.subr.bf16.mxu1 %v12834_v57  ;;  %v4710_v57 = vcombine.low %v4688_v24, %v4702_v43  ;;  %v12859_v24 = vld [vmem:[#allocation7 + $0xbc0] ss:$12 sps:$4 sm:$0xff]  }
 0x2fb   : > { %7635 = vmatmul.mubr.bf16.vlgmr.msra.gmra.mrb[16].mxu0 %v16383_v15  ;;  %v12858_v15 = vld [vmem:[#allocation7 + $0x67c] ss:$12 sps:$4 sm:$0xff]   ;;  %v4136_v25 = vcombine.low %v15468_v5, %v15462_v52 }
 0x2fc   : > { %8276 = vmatmul.mubr.bf16.vlgmr.msra.gmra.mrb[88].mxu1 %v15431_v29  ;;  %7644 = vmatprep.mubr.bf16.mxu0 %v16384_v48 }
 0x2fd   : > { %7664 = vmatpush1.bf16.msra.mxu0 %v12831_v11  ;;  %8283 = vmatprep.mubr.bf16.mxu1 %v15274_v7  ;;  %v4137_v11 = vcombine.high %v15468_v5, %v15462_v52  ;;  %v12874_v52 = vld [vmem:[#allocation7 + $0x6d8] ss:$12 sps:$4 sm:$0xff]   ;;  %v12879_v5 = vld [vmem:[#allocation7 + $0x6f4] ss:$12 sps:$4 sm:$0xff]  }
 0x2fe   : > { %12024 = vmatpush3.bf16.msra.mxu1 %v12835_v17  ;;  %7665 = vmatprep.subr.bf16.mxu0 %v12838_v50  ;;  %v15474_v17 = vpack.c.bf16 %v4710_v57, %v4710_v57  ;;  %v12855_v50 = vld [vmem:[#allocation7 + $0xae8] ss:$12 sps:$4 sm:$0xff]  }
 0x2ff   : > { %12025 = vmatprep.subr.bf16.mxu1 %v12839_v14 }
 0x301   : > { %7666 = vmatpush1.bf16.msra.mxu0 %v12836_v16  ;;  %v12860_v16 = vld [vmem:[#allocation7 + $0xb00] ss:$12 sps:$4 sm:$0xff]  }
 0x302   : > { %12026 = vmatpush3.bf16.msra.mxu1 %v12840_v6  ;;  %7667 = vmatprep.subr.bf16.mxu0 %v12843_v28  ;;  %v12863_v6 = vld [vmem:[#allocation7 + $0x694] ss:$12 sps:$4 sm:$0xff]  }
 0x303   : > { %7645 = vmatmul.mubr.bf16.gmra.mrb[20].mxu0 %v14818_v13  ;;  %12027 = vmatprep.subr.bf16.mxu1 %v12844_v4  ;;  %v15465_v13 = vrot.slane %v11211_v26, %v14035_v47  ;;  %v12864_v4 = vld [vmem:[#allocation7 + $0xbd8] ss:$12 sps:$4 sm:$0xff]   ;;  %v12870_v26 = vld [vmem:[#allocation7 + $0xb30] ss:$12 sps:$4 sm:$0xff]  }
 0x304   : > { %8284 = vmatmul.mubr.bf16.gmra.mrb[92].mxu1 %v15276_v3  ;;  %7654 = vmatprep.mubr.bf16.mxu0 %v15026_v37 }
 0x305   : > { %7668 = vmatpush1.bf16.msra.mxu0 %v12841_v31  ;;  %8291 = vmatprep.mubr.bf16.mxu1 %v15452_v40  ;;  %v4281_v37 = vcombine.high %v15465_v13, %v15456_v8  ;;  %v3993_v31 = vcombine.low %v15424_v62, %v3992_v42  ;;  %v16385_v42 = vld [vmem:[#allocation28_spill] sm:$0xff] }
 0x306   : > { %12028 = vmatpush3.bf16.msra.mxu1 %v12845_v30  ;;  %7669 = vmatprep.subr.bf16.mxu0 %v12848_v32  ;;  %v12873_v30 = vld [vmem:[#allocation7 + $0x6c4] ss:$12 sps:$4 sm:$0xff]   ;;  %v4280_v32 = vcombine.low %v15465_v13, %v15456_v8 }
 0x307   : > { %12029 = vmatprep.subr.bf16.mxu1 %v12849_v38  ;;  %v15477_v14 = vpack.c.bf16 %v4281_v37, %v4137_v11  ;;  %v12876_v37 = vld [vmem:[#allocation7 + $0x6dc] ss:$12 sps:$4 sm:$0xff]  }
 0x308   : > { %v15500_v8 = vpack.c.bf16 %v4280_v32, %v4136_v25  ;;  %v12891_v32 = vld [vmem:[#allocation7 + $0x754] ss:$12 sps:$4 sm:$0xff]   ;;  %v12889_v25 = vld [vmem:[#allocation7 + $0x750] ss:$12 sps:$4 sm:$0xff]  }
 0x309   : > { %7670 = vmatpush1.bf16.msra.mxu0 %v12846_v45  ;;  %v11243_v45 = vcombine.high %v15306_v27, %v3924_v61  ;;  %v12886_v61 = vld [vmem:[#allocation7 + $0x738] ss:$12 sps:$4 sm:$0xff]  }
 0x30a   : > { %12030 = vmatpush3.bf16.msra.mxu1 %v12850_v63  ;;  %7671 = vmatprep.subr.bf16.mxu0 %v12853_v56  ;;  %v11245_v63 = vcombine.high %v15415_v20, %v3993_v31  ;;  %v12871_v56 = vld [vmem:[#allocation7 + $0x6c0] ss:$12 sps:$4 sm:$0xff]  }
 0x30b   : > { %7655 = vmatmul.mubr.bf16.gmra.mrb[24].mxu0 %v15064_v36  ;;  %12031 = vmatprep.subr.bf16.mxu1 %v12854_v46  ;;  %v4695_v27 = vrot.slane %v11243_v45, %v14035_v47 }
 0x30c   : > { %8292 = vmatmul.mubr.bf16.gmra.mrb[96].mxu1 %v15474_v17  ;;  %7695 = vmatprep.mubr.bf16.mxu0 %v15073_v49  ;;  %v11801_v43 = vpop.f32.mrb[16].mxu1  ;;  %v4709_v20 = vrot.slane %v11245_v63, %v14035_v47 }
 0x30d   : > { %7672 = vmatpush1.bf16.msra.mxu0 %v12851_v33  ;;  %8331 = vmatprep.mubr.bf16.mxu1 %v15477_v14  ;;  %v11802_v48 = vpop.f32.mrb[17].mxu1 }
 0x30e   : > { %12032 = vmatpush3.bf16.msra.mxu1 %v12855_v50  ;;  %7673 = vmatprep.subr.bf16.mxu0 %v12858_v15  ;;  %v15484_v36 = vadd.f32 %v11802_v48, %v11801_v43  ;;  %v11804_v0 = vpop.f32.mrb[18].mxu1  ;;  %v4713_v33 = vcombine.high %v4695_v27, %v4709_v20  ;;  %v12877_v50 = vld [vmem:[#allocation7 + $0x6f0] ss:$12 sps:$4 sm:$0xff]  }
 0x30f   : > { %12033 = vmatprep.subr.bf16.mxu1 %v12859_v24  ;;  %v11805_v28 = vpop.f32.mrb[19].mxu1  ;;  %v12882_v24 = vld [vmem:[#allocation7 + $0x70c] ss:$12 sps:$4 sm:$0xff]  }
 0x310   : > { %v15486_v49 = vadd.f32 %v11805_v28, %v11804_v0  ;;  %v15508_v48 = vpack.c.bf16 %v4713_v33, %v4713_v33  ;;  %v12885_v0 = vld [vmem:[#allocation7 + $0x724] ss:$12 sps:$4 sm:$0xff]   ;;  %v4712_v28 = vcombine.low %v4695_v27, %v4709_v20 }
 0x311   : > { %7674 = vmatpush1.bf16.msra.mxu0 %v12856_v1 }
 0x312   : > { %12034 = vmatpush3.bf16.msra.mxu1 %v12860_v16  ;;  %7675 = vmatprep.subr.bf16.mxu0 %v12863_v6  ;;  %v12880_v16 = vld [vmem:[#allocation7 + $0x708] ss:$12 sps:$4 sm:$0xff]   ;;  %v15512_v6 = vld [vmem:[#allocation8] sm:$0x7] }
 0x313   : > { %12035 = vmatprep.subr.bf16.mxu1 %v12864_v4  ;;  %v12883_v4 = vld [vmem:[#allocation7 + $0x720] ss:$12 sps:$4 sm:$0xff]  }
 0x315   : > { %7676 = vmatpush1.bf16.msra.mxu0 %v12861_v39  ;;  %v5367_v39 = vrot.slane %v15512_v6, %v16385_v42 }
 0x316   : > { %12036 = vmatpush3.bf16.msra.mxu1 %v12865_v10  ;;  %7677 = vmatprep.subr.bf16.mxu0 %v12868_v54  ;;  %v12888_v10 = vld [vmem:[#allocation7 + $0x73c] ss:$12 sps:$4 sm:$0xff]   ;;  %v15516_v54 = vpack.c.bf16 %v4712_v28, %v4712_v28 }
 0x317   : > { %12037 = vmatprep.subr.bf16.mxu1 %v12869_v44  ;;  %v11807_v38 = vpop.f32.mrb[20].mxu1 }
 0x318   : > { %v11808_v2 = vpop.f32.mrb[21].mxu1 }
 0x319   : > { %7678 = vmatpush1.bf16.msra.mxu0 %v12866_v18  ;;  %v15498_v62 = vadd.f32 %v11808_v2, %v11807_v38  ;;  %v11810_v57 = vpop.f32.mrb[22].mxu1  ;;  %v7942_v18 = vadd.f32 %v15484_v36, %v5367_v39  ;;  %v7945_v2 = vadd.f32 %v15486_v49, %v5367_v39 }
 0x31a   : > { %12038 = vmatpush3.bf16.msra.mxu1 %v12870_v26  ;;  %7679 = vmatprep.subr.bf16.mxu0 %v12873_v30  ;;  %v11811_v46 = vpop.f32.mrb[23].mxu1 }
 0x31b   : > { %v15502_v13 = vadd.f32 %v11811_v46, %v11810_v57  ;;  %v12894_v57 = vld [vmem:[#allocation7 + $0x76c] ss:$12 sps:$4 sm:$0xff]   ;;  %v7950_v27 = vadd.f32 %v15498_v62, %v5367_v39 }
 0x31c   : > { %v12898_v62 = vld [vmem:[#allocation7 + $0x798] ss:$12 sps:$4 sm:$0xff]  }
 0x31d   : > { %8332 = vmatmul.mubr.bf16.vlgmr.msra.gmra.mrb[100].mxu1 %v15500_v8  ;;  %7680 = vmatpush1.bf16.msra.mxu0 %v12871_v56  ;;  %v7953_v33 = vadd.f32 %v15502_v13, %v5367_v39 }
 0x31e   : > { %8339 = vmatprep.mubr.bf16.mxu1 %v15363_v41  ;;  %7681 = vmatprep.subr.bf16.mxu0 %v12876_v37  ;;  %v12892_v37 = vld [vmem:[#allocation7 + $0x768] ss:$12 sps:$4 sm:$0xff]  }
 0x320   : > { %v11813_v11 = vpop.f32.mrb[24].mxu1 }
 0x321   : > { %7682 = vmatpush1.bf16.msra.mxu0 %v12874_v52  ;;  %v11814_v15 = vpop.f32.mrb[25].mxu1 }
 0x322   : > { %7683 = vmatprep.subr.bf16.mxu0 %v12879_v5  ;;  %v11815_v43 = vadd.f32 %v11814_v15, %v11813_v11  ;;  %v11816_v23 = vpop.f32.mrb[26].mxu1  ;;  %v12897_v5 = vld [vmem:[#allocation7 + $0x784] ss:$12 sps:$4 sm:$0xff]   ;;  %v12895_v15 = vld [vmem:[#allocation7 + $0x780] ss:$12 sps:$4 sm:$0xff]  }
 0x323   : > { %v11817_v1 = vpop.f32.mrb[27].mxu1  ;;  %v12900_v23 = vld [vmem:[#allocation7 + $0x79c] ss:$12 sps:$4 sm:$0xff]  }
 0x325   : > { %8340 = vmatmul.mubr.bf16.gmra.mrb[104].mxu1 %v15365_v35  ;;  %7684 = vmatpush1.bf16.msra.mxu0 %v12877_v50 }
 0x326   : > { %8347 = vmatprep.mubr.bf16.mxu1 %v15508_v48  ;;  %7685 = vmatprep.subr.bf16.mxu0 %v12882_v24 }
 0x329   : > { %7686 = vmatpush1.bf16.msra.mxu0 %v12880_v16 }
 0x32a   : > { %7687 = vmatprep.subr.bf16.mxu0 %v12885_v0  ;;  %v7958_v0 = vadd.f32 %v11815_v43, %v5367_v39  ;;  %v12907_v43 = vld [vmem:[#allocation7 + $0x7e0] ss:$12 sps:$4 sm:$0xff]   ;;  %v12912_v39 = vld [vmem:[#allocation7 + $0x7fc] ss:$12 sps:$4 sm:$0xff]  }
 0x32c   : > { %v11835_v44 = vpop.f32.mrb[28].mxu1 }
 0x32d   : > { %8348 = vmatmul.mubr.bf16.gmra.mrb[108].mxu1 %v15516_v54  ;;  %7688 = vmatpush1.bf16.msra.mxu0 %v12883_v4  ;;  %v11836_v31 = vpop.f32.mrb[29].mxu1  ;;  %v12903_v4 = vld [vmem:[#allocation7 + $0x7b4] ss:$12 sps:$4 sm:$0xff]  }
 0x32e   : > { %7689 = vmatprep.subr.bf16.mxu0 %v12888_v10  ;;  %v11837_v26 = vadd.f32 %v11836_v31, %v11835_v44  ;;  %v11838_v30 = vpop.f32.mrb[30].mxu1  ;;  %v12906_v31 = vld [vmem:[#allocation7 + $0x7cc] ss:$12 sps:$4 sm:$0xff]  }
 0x32f   : > { %v11839_v38 = vpop.f32.mrb[31].mxu1 }
 0x330   : > { %v15521_v45 = vadd.f32 %v11837_v26, %v7942_v18  ;;  %v11840_v63 = vadd.f32 %v11839_v38, %v11838_v30  ;;  %v12910_v26 = vld [vmem:[#allocation7 + $0x7f8] ss:$12 sps:$4 sm:$0xff]  }
 0x331   : > { %7690 = vmatpush1.bf16.msra.mxu0 %v12886_v61  ;;  %v12901_v61 = vld [vmem:[#allocation7 + $0x7b0] ss:$12 sps:$4 sm:$0xff]  }
 0x332   : > { %v15523_v56 = vadd.f32 %v11840_v63, %v7945_v2  ;;  %7691 = vmatprep.subr.bf16.mxu0 %v12891_v32 }
 0x334   : > { %v11841_v46 = vpop.f32.mrb[32].mxu1 }
 0x335   : > { %7692 = vmatpush1.bf16.msra.mxu0 %v12889_v25  ;;  %v11842_v36 = vpop.f32.mrb[33].mxu1  ;;  %v12913_v25 = vld [vmem:[#allocation7 + $0x810] ss:$12 sps:$4 sm:$0xff]  }
 0x336   : > { %7693 = vmatprep.subr.bf16.mxu0 %v12894_v57  ;;  %v11843_v20 = vadd.f32 %v11842_v36, %v11841_v46  ;;  %v11844_v52 = vpop.f32.mrb[34].mxu1  ;;  %v12918_v57 = vld [vmem:[#allocation7 + $0x82c] ss:$12 sps:$4 sm:$0xff]   ;;  %v12921_v36 = vld [vmem:[#allocation7 + $0x844] ss:$12 sps:$4 sm:$0xff]  }
 0x337   : > { %v11845_v49 = vpop.f32.mrb[35].mxu1 }
 0x338   : > { %v8006_v11 = vadd.f32 %v11843_v20, %v7950_v27  ;;  %v11846_v50 = vadd.f32 %v11845_v49, %v11844_v52 }
 0x339   : > { %7694 = vmatpush1.bf16.msra.mxu0 %v12892_v37 }
 0x33a   : > { %v15527_v24 = vadd.f32 %v11846_v50, %v7953_v33  ;;  %7724 = vmatprep.subr.bf16.mxu0 %v12897_v5  ;;  %v12924_v33 = vld [vmem:[#allocation7 + $0x85c] ss:$12 sps:$4 sm:$0xff]  }
 0x33c   : > { %7696 = vmatmul.mubr.bf16.vlgmr.msra.gmra.mrb[16].mxu0 %v15131_v34  ;;  %v11847_v1 = vpop.f32.mrb[36].mxu1  ;;  %v12909_v34 = vld [vmem:[#allocation7 + $0x7e4] ss:$12 sps:$4 sm:$0xff]  }
 0x33d   : > { %7705 = vmatprep.mubr.bf16.mxu0 %v15012_v21  ;;  %7725 = vmatpush1.bf16.msra.mxu0 %v12895_v15  ;;  %v11848_v16 = vpop.f32.mrb[37].mxu1  ;;  %v12904_v21 = vld [vmem:[#allocation7 + $0x7c8] ss:$12 sps:$4 sm:$0xff]  }
 0x33e   : > { %7726 = vmatprep.subr.bf16.mxu0 %v12900_v23  ;;  %v11849_v28 = vadd.f32 %v11848_v16, %v11847_v1  ;;  %v11850_v13 = vpop.f32.mrb[38].mxu1  ;;  %v12927_v1 = vld [vmem:[#allocation7 + $0x874] ss:$12 sps:$4 sm:$0xff]  }
 0x33f   : > { %v11851_v10 = vpop.f32.mrb[39].mxu1  ;;  %v12925_v13 = vld [vmem:[#allocation7 + $0x870] ss:$12 sps:$4 sm:$0xff]  }
 0x340   : > { %v8014_v44 = vadd.f32 %v11849_v28, %v7958_v0  ;;  %v12933_v10 = vld [vmem:[#allocation7 + $0x8a4] ss:$12 sps:$4 sm:$0xff]  }
 0x341   : > { %7727 = vmatpush1.bf16.msra.mxu0 %v12898_v62 }
 0x342   : > { %7728 = vmatprep.subr.bf16.mxu0 %v12903_v4  ;;  %v12928_v4 = vld [vmem:[#allocation7 + $0x888] ss:$12 sps:$4 sm:$0xff]  }
 0x344   : > { %7706 = vmatmul.mubr.bf16.gmra.mrb[20].mxu0 %v15014_v53  ;;  %v12915_v53 = vld [vmem:[#allocation7 + $0x814] ss:$12 sps:$4 sm:$0xff]  }
 0x345   : > { %7715 = vmatprep.mubr.bf16.mxu0 %v15225_v12  ;;  %7729 = vmatpush1.bf16.msra.mxu0 %v12901_v61  ;;  %v12936_v61 = vld [vmem:[#allocation7 + $0x8bc] ss:$12 sps:$4 sm:$0xff]  }
 0x346   : > { %7730 = vmatprep.subr.bf16.mxu0 %v12906_v31  ;;  %v12934_v31 = vld [vmem:[#allocation7 + $0x8b8] ss:$12 sps:$4 sm:$0xff]  }
 0x349   : > { %7731 = vmatpush1.bf16.msra.mxu0 %v12904_v21 }
 0x34a   : > { %7732 = vmatprep.subr.bf16.mxu0 %v12909_v34  ;;  %v12939_v34 = vld [vmem:[#allocation7 + $0x8d4] ss:$12 sps:$4 sm:$0xff]  }
 0x34c   : > { %7716 = vmatmul.mubr.bf16.gmra.mrb[24].mxu0 %v15254_v55 }
 0x34d   : > { %7733 = vmatpush1.bf16.msra.mxu0 %v12907_v43  ;;  %7756 = vmatprep.mubr.bf16.mxu0 %v15257_v19  ;;  %v11869_v18 = vpop.f32.mrb[40].mxu1  ;;  %v12916_v19 = vld [vmem:[#allocation7 + $0x828] ss:$12 sps:$4 sm:$0xff]  }
 0x34e   : > { %7734 = vmatprep.subr.bf16.mxu0 %v12912_v39  ;;  %v11870_v30 = vpop.f32.mrb[41].mxu1 }
 0x34f   : > { %v11871_v32 = vadd.f32 %v11870_v30, %v11869_v18  ;;  %v11872_v12 = vpop.f32.mrb[42].mxu1 }
 0x350   : > { %v11873_v38 = vpop.f32.mrb[43].mxu1 }
 0x351   : > { %v8054_v2 = vadd.f32 %v11871_v32, %v15521_v45  ;;  %7735 = vmatpush1.bf16.msra.mxu0 %v12910_v26  ;;  %v11874_v63 = vadd.f32 %v11873_v38, %v11872_v12  ;;  %v12919_v45 = vld [vmem:[#allocation7 + $0x840] ss:$12 sps:$4 sm:$0xff]   ;;  %v12937_v26 = vld [vmem:[#allocation7 + $0x8d0] ss:$12 sps:$4 sm:$0xff]   ;;  %v12940_v38 = vld [vmem:[#allocation7 + $0x8e8] ss:$12 sps:$4 sm:$0xff]  }
 0x352   : > { %7736 = vmatprep.subr.bf16.mxu0 %v12915_v53  ;;  %v12942_v32 = vld [vmem:[#allocation7 + $0x8ec] ss:$12 sps:$4 sm:$0xff]  }
 0x353   : > { %v8057_v55 = vadd.f32 %v11874_v63, %v15523_v56  ;;  %v12922_v56 = vld [vmem:[#allocation7 + $0x858] ss:$12 sps:$4 sm:$0xff]  }
 0x355   : > { %7737 = vmatpush1.bf16.msra.mxu0 %v12913_v25  ;;  %v11875_v46 = vpop.f32.mrb[44].mxu1  ;;  %v12945_v25 = vld [vmem:[#allocation7 + $0x904] ss:$12 sps:$4 sm:$0xff]  }
 0x356   : > { %7738 = vmatprep.subr.bf16.mxu0 %v12918_v57  ;;  %v11876_v37 = vpop.f32.mrb[45].mxu1 }
 0x357   : > { %v11877_v27 = vadd.f32 %v11876_v37, %v11875_v46  ;;  %v11878_v20 = vpop.f32.mrb[46].mxu1 }
 0x358   : > { %v11879_v52 = vpop.f32.mrb[47].mxu1 }
 0x359   : > { %v8062_v5 = vadd.f32 %v11877_v27, %v8006_v11  ;;  %7739 = vmatpush1.bf16.msra.mxu0 %v12916_v19  ;;  %v11880_v49 = vadd.f32 %v11879_v52, %v11878_v20  ;;  %v12930_v11 = vld [vmem:[#allocation7 + $0x88c] ss:$12 sps:$4 sm:$0xff]   ;;  %v12948_v52 = vld [vmem:[#allocation7 + $0x91c] ss:$12 sps:$4 sm:$0xff]  }
 0x35a   : > { %7740 = vmatprep.subr.bf16.mxu0 %v12921_v36  ;;  %v12943_v36 = vld [vmem:[#allocation7 + $0x900] ss:$12 sps:$4 sm:$0xff]  }
 0x35b   : > { %v8065_v50 = vadd.f32 %v11880_v49, %v15527_v24  ;;  %v12931_v24 = vld [vmem:[#allocation7 + $0x8a0] ss:$12 sps:$4 sm:$0xff]  }
 0x35d   : > { %7741 = vmatpush1.bf16.msra.mxu0 %v12919_v45  ;;  %v11881_v15 = vpop.f32.mrb[48].mxu1  ;;  %v12951_v45 = vld [vmem:[#allocation7 + $0x934] ss:$12 sps:$4 sm:$0xff]  }
 0x35e   : > { %7742 = vmatprep.subr.bf16.mxu0 %v12924_v33  ;;  %v11882_v23 = vpop.f32.mrb[49].mxu1 }
 0x35f   : > { %v11883_v62 = vadd.f32 %v11882_v23, %v11881_v15  ;;  %v11884_v16 = vpop.f32.mrb[50].mxu1 }
 0x360   : > { %v11885_v0 = vpop.f32.mrb[51].mxu1  ;;  %v12960_v16 = vld [vmem:[#allocation7 + $0x97c] ss:$12 sps:$4 sm:$0xff]  }
 0x361   : > { %v8070_v28 = vadd.f32 %v11883_v62, %v8014_v44  ;;  %7743 = vmatpush1.bf16.msra.mxu0 %v12922_v56  ;;  %v12954_v62 = vld [vmem:[#allocation7 + $0x94c] ss:$12 sps:$4 sm:$0xff]  }
 0x362   : > { %7744 = vmatprep.subr.bf16.mxu0 %v12927_v1  ;;  %v12949_v1 = vld [vmem:[#allocation7 + $0x930] ss:$12 sps:$4 sm:$0xff]   ;;  %v12958_v0 = vld [vmem:[#allocation7 + $0x978] ss:$12 sps:$4 sm:$0xff]  }
 0x365   : > { %7745 = vmatpush1.bf16.msra.mxu0 %v12925_v13  ;;  %v12963_v13 = vld [vmem:[#allocation7 + $0x994] ss:$12 sps:$4 sm:$0xff]  }
 0x366   : > { %7746 = vmatprep.subr.bf16.mxu0 %v12930_v11 }
 0x369   : > { %7747 = vmatpush1.bf16.msra.mxu0 %v12928_v4 }
 0x36a   : > { %7748 = vmatprep.subr.bf16.mxu0 %v12933_v10  ;;  %v12961_v10 = vld [vmem:[#allocation7 + $0x990] ss:$12 sps:$4 sm:$0xff]  }
 0x36d   : > { %7749 = vmatpush1.bf16.msra.mxu0 %v12931_v24 }
 0x36e   : > { %v11903_v21 = vpop.f32.mrb[52].mxu1  ;;  %7750 = vmatprep.subr.bf16.mxu0 %v12936_v61 }
 0x36f   : > { %v11904_v43 = vpop.f32.mrb[53].mxu1 }
 0x370   : > { %v11905_v39 = vadd.f32 %v11904_v43, %v11903_v21  ;;  %v11906_v44 = vpop.f32.mrb[54].mxu1 }
 0x371   : > { %7751 = vmatpush1.bf16.msra.mxu0 %v12934_v31  ;;  %v11907_v18 = vpop.f32.mrb[55].mxu1  ;;  %v12966_v31 = vld [vmem:[#allocation7 + $0x9ac] ss:$12 sps:$4 sm:$0xff]  }
 0x372   : > { %v8110_v30 = vadd.f32 %v11905_v39, %v8054_v2  ;;  %v11908_v53 = vadd.f32 %v11907_v18, %v11906_v44  ;;  %7752 = vmatprep.subr.bf16.mxu0 %v12939_v34 }
 0x374   : > { %v8113_v12 = vadd.f32 %v11908_v53, %v8057_v55  ;;  %v12946_v55 = vld [vmem:[#allocation7 + $0x918] ss:$12 sps:$4 sm:$0xff]  }
 0x375   : > { %7753 = vmatpush1.bf16.msra.mxu0 %v12937_v26  ;;  %v12967_v26 = vld [vmem:[#allocation7 + $0x9c0] ss:$12 sps:$4 sm:$0xff]  }
 0x376   : > { %v11909_v63 = vpop.f32.mrb[56].mxu1  ;;  %7754 = vmatprep.subr.bf16.mxu0 %v12942_v32 }
 0x377   : > { %v11910_v57 = vpop.f32.mrb[57].mxu1 }
 0x378   : > { %v11911_v46 = vadd.f32 %v11910_v57, %v11909_v63  ;;  %v11912_v19 = vpop.f32.mrb[58].mxu1  ;;  %v12970_v63 = vld [vmem:[#allocation7 + $0x9d8] ss:$12 sps:$4 sm:$0xff]  }
 0x379   : > { %7755 = vmatpush1.bf16.msra.mxu0 %v12940_v38  ;;  %v11913_v37 = vpop.f32.mrb[59].mxu1  ;;  %v12972_v38 = vld [vmem:[#allocation7 + $0x9dc] ss:$12 sps:$4 sm:$0xff]  }
 0x37a   : > { %v8118_v27 = vadd.f32 %v11911_v46, %v8062_v5  ;;  %v11914_v20 = vadd.f32 %v11913_v37, %v11912_v19  ;;  %7785 = vmatprep.subr.bf16.mxu0 %v12945_v25 }
 0x37c   : > { %v8121_v2 = vadd.f32 %v11914_v20, %v8065_v50  ;;  %7757 = vmatmul.mubr.bf16.vlgmr.msra.gmra.mrb[16].mxu0 %v15329_v51  ;;  %v12957_v51 = vld [vmem:[#allocation7 + $0x964] ss:$12 sps:$4 sm:$0xff]   ;;  %v12955_v50 = vld [vmem:[#allocation7 + $0x960] ss:$12 sps:$4 sm:$0xff]  }
 0x37d   : > { %7766 = vmatprep.mubr.bf16.mxu0 %v15094_v60  ;;  %7786 = vmatpush1.bf16.msra.mxu0 %v12943_v36  ;;  %v12952_v60 = vld [vmem:[#allocation7 + $0x948] ss:$12 sps:$4 sm:$0xff]   ;;  %v12973_v36 = vld [vmem:[#allocation7 + $0x9f0] ss:$12 sps:$4 sm:$0xff]  }
 0x37e   : > { %v11915_v49 = vpop.f32.mrb[60].mxu1  ;;  %7787 = vmatprep.subr.bf16.mxu0 %v12948_v52  ;;  %v12978_v52 = vld [vmem:[#allocation7 + $0xa0c] ss:$12 sps:$4 sm:$0xff]  }
 0x37f   : > { %v11916_v33 = vpop.f32.mrb[61].mxu1 }
 0x380   : > { %v11917_v15 = vadd.f32 %v11916_v33, %v11915_v49  ;;  %v11918_v56 = vpop.f32.mrb[62].mxu1  ;;  %v12984_v49 = vld [vmem:[#allocation7 + $0xa3c] ss:$12 sps:$4 sm:$0xff]   ;;  %v12987_v33 = vld [vmem:[#allocation7 + $0xa54] ss:$12 sps:$4 sm:$0xff]  }
 0x381   : > { %7788 = vmatpush1.bf16.msra.mxu0 %v12946_v55  ;;  %v11919_v23 = vpop.f32.mrb[63].mxu1  ;;  %v12981_v55 = vld [vmem:[#allocation7 + $0xa24] ss:$12 sps:$4 sm:$0xff]  }
 0x382   : > { %v8126_v5 = vadd.f32 %v11917_v15, %v8070_v28  ;;  %7789 = vmatprep.subr.bf16.mxu0 %v12951_v45  ;;  %v12982_v45 = vld [vmem:[#allocation7 + $0xa38] ss:$12 sps:$4 sm:$0xff]  }
 0x384   : > { %7767 = vmatmul.mubr.bf16.gmra.mrb[20].mxu0 %v15096_v9 }
 0x385   : > { %7776 = vmatprep.mubr.bf16.mxu0 %v15372_v58  ;;  %7790 = vmatpush1.bf16.msra.mxu0 %v12949_v1 }
 0x386   : > { %7791 = vmatprep.subr.bf16.mxu0 %v12954_v62 }
 0x389   : > { %7792 = vmatpush1.bf16.msra.mxu0 %v12952_v60  ;;  %v12990_v60 = vld [vmem:[#allocation7 + $0xa6c] ss:$12 sps:$4 sm:$0xff]  }
 0x38a   : > { %7793 = vmatprep.subr.bf16.mxu0 %v12957_v51 }
 0x38c   : > { %7777 = vmatmul.mubr.bf16.gmra.mrb[24].mxu0 %v15399_v59  ;;  %v12964_v59 = vld [vmem:[#allocation7 + $0x9a8] ss:$12 sps:$4 sm:$0xff]  }
 0x38d   : > { %7794 = vmatpush1.bf16.msra.mxu0 %v12955_v50  ;;  %7817 = vmatprep.mubr.bf16.mxu0 %v15401_v22  ;;  %v12969_v22 = vld [vmem:[#allocation7 + $0x9c4] ss:$12 sps:$4 sm:$0xff]  }
 0x38e   : > { %v11937_v28 = vpop.f32.mrb[64].mxu1  ;;  %7795 = vmatprep.subr.bf16.mxu0 %v12960_v16 }
 0x38f   : > { %v11938_v9 = vpop.f32.mrb[65].mxu1 }
 0x390   : > { %v11939_v11 = vadd.f32 %v11938_v9, %v11937_v28  ;;  %v11940_v58 = vpop.f32.mrb[66].mxu1  ;;  %v12993_v28 = vld [vmem:[#allocation7 + $0xa84] ss:$12 sps:$4 sm:$0xff]  }
 0x391   : > { %7796 = vmatpush1.bf16.msra.mxu0 %v12958_v0  ;;  %v11941_v4 = vpop.f32.mrb[67].mxu1  ;;  %v12988_v0 = vld [vmem:[#allocation7 + $0xa68] ss:$12 sps:$4 sm:$0xff]  }
 0x392   : > { %v8166_v24 = vadd.f32 %v11939_v11, %v8110_v30  ;;  %v11942_v61 = vadd.f32 %v11941_v4, %v11940_v58  ;;  %7797 = vmatprep.subr.bf16.mxu0 %v12963_v13  ;;  %v12991_v4 = vld [vmem:[#allocation7 + $0xa80] ss:$12 sps:$4 sm:$0xff]  }
 0x394   : > { %v8169_v21 = vadd.f32 %v11942_v61, %v8113_v12  ;;  %v12975_v12 = vld [vmem:[#allocation7 + $0x9f4] ss:$12 sps:$4 sm:$0xff]   ;;  %v12996_v61 = vld [vmem:[#allocation7 + $0xa9c] ss:$12 sps:$4 sm:$0xff]  }
 0x395   : > { %7798 = vmatpush1.bf16.msra.mxu0 %v12961_v10 }
 0x396   : > { %v11943_v34 = vpop.f32.mrb[68].mxu1  ;;  %7799 = vmatprep.subr.bf16.mxu0 %v12966_v31 }
 0x397   : > { %v11944_v43 = vpop.f32.mrb[69].mxu1 }
 0x398   : > { %v11945_v39 = vadd.f32 %v11944_v43, %v11943_v34  ;;  %v11946_v44 = vpop.f32.mrb[70].mxu1  ;;  %v12999_v34 = vld [vmem:[#allocation7 + $0xab4] ss:$12 sps:$4 sm:$0xff]  }
 0x399   : > { %7800 = vmatpush1.bf16.msra.mxu0 %v12964_v59  ;;  %v11947_v18 = vpop.f32.mrb[71].mxu1 }
 0x39a   : > { %v8174_v53 = vadd.f32 %v11945_v39, %v8118_v27  ;;  %v11948_v32 = vadd.f32 %v11947_v18, %v11946_v44  ;;  %7801 = vmatprep.subr.bf16.mxu0 %v12969_v22  ;;  %v12976_v27 = vld [vmem:[#allocation7 + $0xa08] ss:$12 sps:$4 sm:$0xff]   ;;  %v12997_v18 = vld [vmem:[#allocation7 + $0xab0] ss:$12 sps:$4 sm:$0xff]  }
 0x39c   : > { %v8177_v30 = vadd.f32 %v11948_v32, %v8121_v2  ;;  %v12979_v2 = vld [vmem:[#allocation7 + $0xa20] ss:$12 sps:$4 sm:$0xff]  }
 0x39d   : > { %7802 = vmatpush1.bf16.msra.mxu0 %v12967_v26  ;;  %v13002_v32 = vld [vmem:[#allocation7 + $0xacc] ss:$12 sps:$4 sm:$0xff]  }
 0x39e   : > { %v11949_v25 = vpop.f32.mrb[72].mxu1  ;;  %7803 = vmatprep.subr.bf16.mxu0 %v12972_v38  ;;  %v13003_v38 = vld [vmem:[#allocation7 + $0xae0] ss:$12 sps:$4 sm:$0xff]  }
 0x39f   : > { %v11950_v57 = vpop.f32.mrb[73].mxu1 }
 0x3a0   : > { %v11951_v46 = vadd.f32 %v11950_v57, %v11949_v25  ;;  %v11952_v19 = vpop.f32.mrb[74].mxu1  ;;  %v13011_v25 = vld [vmem:[#allocation7 + $0xb14] ss:$12 sps:$4 sm:$0xff]  }
 0x3a1   : > { %7804 = vmatpush1.bf16.msra.mxu0 %v12970_v63  ;;  %v11953_v37 = vpop.f32.mrb[75].mxu1  ;;  %v13006_v63 = vld [vmem:[#allocation7 + $0xaf8] ss:$12 sps:$4 sm:$0xff]  }
 0x3a2   : > { %v8182_v20 = vadd.f32 %v11951_v46, %v8126_v5  ;;  %7805 = vmatprep.subr.bf16.mxu0 %v12975_v12  ;;  %v12985_v5 = vld [vmem:[#allocation7 + $0xa50] ss:$12 sps:$4 sm:$0xff]   ;;  %v13014_v37 = vld [vmem:[#allocation7 + $0xb2c] ss:$12 sps:$4 sm:$0xff]  }
 0x3a3   : > { %v13009_v46 = vld [vmem:[#allocation7 + $0xb10] ss:$12 sps:$4 sm:$0xff]  }
 0x3a5   : > { %7806 = vmatpush1.bf16.msra.mxu0 %v12973_v36 }
 0x3a6   : > { %7807 = vmatprep.subr.bf16.mxu0 %v12978_v52 }
 0x3a9   : > { %7808 = vmatpush1.bf16.msra.mxu0 %v12976_v27  ;;  %v13017_v27 = vld [vmem:[#allocation7 + $0xb44] ss:$12 sps:$4 sm:$0xff]  }
 0x3aa   : > { %7809 = vmatprep.subr.bf16.mxu0 %v12981_v55 }
 0x3ad   : > { %7810 = vmatpush1.bf16.msra.mxu0 %v12979_v2 }
 0x3ae   : > { %7811 = vmatprep.subr.bf16.mxu0 %v12984_v49 }
 0x3af   : > { %v11971_v15 = vpop.f32.mrb[76].mxu1 }
 0x3b0   : > { %v11972_v56 = vpop.f32.mrb[77].mxu1 }
 0x3b1   : > { %v11973_v23 = vadd.f32 %v11972_v56, %v11971_v15  ;;  %7812 = vmatpush1.bf16.msra.mxu0 %v12982_v45  ;;  %v11974_v1 = vpop.f32.mrb[78].mxu1  ;;  %v13015_v45 = vld [vmem:[#allocation7 + $0xb40] ss:$12 sps:$4 sm:$0xff]   ;;  %v13020_v15 = vld [vmem:[#allocation7 + $0xb5c] ss:$12 sps:$4 sm:$0xff]  }
 0x3b2   : > { %v11975_v62 = vpop.f32.mrb[79].mxu1  ;;  %7813 = vmatprep.subr.bf16.mxu0 %v12987_v33 }
 0x3b3   : > { %v8222_v51 = vadd.f32 %v11973_v23, %v8166_v24  ;;  %v11976_v50 = vadd.f32 %v11975_v62, %v11974_v1  ;;  %v13023_v62 = vld [vmem:[#allocation7 + $0xb74] ss:$12 sps:$4 sm:$0xff]  }
 0x3b5   : > { %v8225_v16 = vadd.f32 %v11976_v50, %v8169_v21  ;;  %7814 = vmatpush1.bf16.msra.mxu0 %v12985_v5  ;;  %v12994_v21 = vld [vmem:[#allocation7 + $0xa98] ss:$12 sps:$4 sm:$0xff]  }
 0x3b6   : > { %7815 = vmatprep.subr.bf16.mxu0 %v12990_v60  ;;  %v13018_v5 = vld [vmem:[#allocation7 + $0xb58] ss:$12 sps:$4 sm:$0xff]  }
 0x3b7   : > { %v11977_v13 = vpop.f32.mrb[80].mxu1 }
 0x3b8   : > { %v11978_v9 = vpop.f32.mrb[81].mxu1 }
 0x3b9   : > { %v11979_v11 = vadd.f32 %v11978_v9, %v11977_v13  ;;  %7816 = vmatpush1.bf16.msra.mxu0 %v12988_v0  ;;  %v11980_v58 = vpop.f32.mrb[82].mxu1  ;;  %v13021_v0 = vld [vmem:[#allocation7 + $0xb70] ss:$12 sps:$4 sm:$0xff]   ;;  %v13026_v13 = vld [vmem:[#allocation7 + $0xb8c] ss:$12 sps:$4 sm:$0xff]  }
 0x3ba   : > { %v11981_v10 = vpop.f32.mrb[83].mxu1  ;;  %7846 = vmatprep.subr.bf16.mxu0 %v12993_v28 }
 0x3bb   : > { %v8230_v31 = vadd.f32 %v11979_v11, %v8174_v53  ;;  %v11982_v59 = vadd.f32 %v11981_v10, %v11980_v58  ;;  %v13024_v11 = vld [vmem:[#allocation7 + $0xb88] ss:$12 sps:$4 sm:$0xff]   ;;  %v13029_v58 = vld [vmem:[#allocation7 + $0xba4] ss:$12 sps:$4 sm:$0xff]  }
 0x3bc   : > { %7818 = vmatmul.mubr.bf16.vlgmr.msra.gmra.mrb[16].mxu0 %v15431_v29  ;;  %v13005_v29 = vld [vmem:[#allocation7 + $0xae4] ss:$12 sps:$4 sm:$0xff]   ;;  %v13032_v10 = vld [vmem:[#allocation7 + $0xbbc] ss:$12 sps:$4 sm:$0xff]  }
 0x3bd   : > { %v8233_v24 = vadd.f32 %v11982_v59, %v8177_v30  ;;  %7827 = vmatprep.mubr.bf16.mxu0 %v15274_v7  ;;  %7847 = vmatpush1.bf16.msra.mxu0 %v12991_v4  ;;  %v13000_v7 = vld [vmem:[#allocation7 + $0xac8] ss:$12 sps:$4 sm:$0xff]   ;;  %v13027_v4 = vld [vmem:[#allocation7 + $0xba0] ss:$12 sps:$4 sm:$0xff]  }
 0x3be   : > { %7848 = vmatprep.subr.bf16.mxu0 %v12996_v61  ;;  %v13008_v30 = vld [vmem:[#allocation7 + $0xafc] ss:$12 sps:$4 sm:$0xff]   ;;  %v13030_v61 = vld [vmem:[#allocation7 + $0xbb8] ss:$12 sps:$4 sm:$0xff]  }
 0x3bf   : > { %v11983_v22 = vpop.f32.mrb[84].mxu1 }
 0x3c0   : > { %v11984_v43 = vpop.f32.mrb[85].mxu1 }
 0x3c1   : > { %v11985_v39 = vadd.f32 %v11984_v43, %v11983_v22  ;;  %7849 = vmatpush1.bf16.msra.mxu0 %v12994_v21  ;;  %v11986_v44 = vpop.f32.mrb[86].mxu1  ;;  %v13033_v21 = vld [vmem:[#allocation7 + $0xbd0] ss:$12 sps:$4 sm:$0xff]   ;;  %v13038_v43 = vld [vmem:[#allocation7 + $0xbec] ss:$12 sps:$4 sm:$0xff]  }
 0x3c2   : > { %v11987_v26 = vpop.f32.mrb[87].mxu1  ;;  %7850 = vmatprep.subr.bf16.mxu0 %v12999_v34 }
 0x3c3   : > { %v8238_v53 = vadd.f32 %v11985_v39, %v8182_v20  ;;  %v13036_v26 = vld [vmem:[#allocation7 + $0xbe8] ss:$12 sps:$4 sm:$0xff]  }
 0x3c4   : > { %7828 = vmatmul.mubr.bf16.gmra.mrb[20].mxu0 %v15276_v3 }
 0x3c5   : > { %7837 = vmatprep.mubr.bf16.mxu0 %v15452_v40  ;;  %7851 = vmatpush1.bf16.msra.mxu0 %v12997_v18 }
 0x3c6   : > { %7852 = vmatprep.subr.bf16.mxu0 %v13002_v32 }
 0x3c9   : > { %7853 = vmatpush1.bf16.msra.mxu0 %v13000_v7 }
 0x3ca   : > { %7854 = vmatprep.subr.bf16.mxu0 %v13005_v29 }
 0x3cc   : > { %7838 = vmatmul.mubr.bf16.gmra.mrb[24].mxu0 %v15474_v17  ;;  %v13012_v17 = vld [vmem:[#allocation7 + $0xb28] ss:$12 sps:$4 sm:$0xff]  }
 0x3cd   : > { %7855 = vmatpush1.bf16.msra.mxu0 %v13003_v38  ;;  %7878 = vmatprep.mubr.bf16.mxu0 %v15477_v14 }
 0x3ce   : > { %7856 = vmatprep.subr.bf16.mxu0 %v13008_v30 }
 0x3cf   : > { %v12005_v12 = vpop.f32.mrb[88].mxu1 }
 0x3d0   : > { %v12006_v3 = vpop.f32.mrb[89].mxu1 }
 0x3d1   : > { %v12007_v57 = vadd.f32 %v12006_v3, %v12005_v12  ;;  %7857 = vmatpush1.bf16.msra.mxu0 %v13006_v63  ;;  %v12008_v40 = vpop.f32.mrb[90].mxu1 }
 0x3d2   : > { %v12009_v19 = vpop.f32.mrb[91].mxu1  ;;  %7858 = vmatprep.subr.bf16.mxu0 %v13011_v25 }
 0x3d3   : > { %v8278_v36 = vadd.f32 %v12007_v57, %v8222_v51  ;;  %v12010_v20 = vadd.f32 %v12009_v19, %v12008_v40 }
 0x3d5   : > { %v8281_v52 = vadd.f32 %v12010_v20, %v8225_v16  ;;  %7859 = vmatpush1.bf16.msra.mxu0 %v13009_v46  ;;  %v13040_v20 = vld [vmem:[#allocation10] sm:$0xff]  }
 0x3d6   : > { %7860 = vmatprep.subr.bf16.mxu0 %v13014_v37 }
 0x3d7   : > { %v12011_v14 = vpop.f32.mrb[92].mxu1 }
 0x3d8   : > { %v12012_v55 = vpop.f32.mrb[93].mxu1 }
 0x3d9   : > { %v12013_v2 = vadd.f32 %v12012_v55, %v12011_v14  ;;  %7861 = vmatpush1.bf16.msra.mxu0 %v13012_v17  ;;  %v12014_v49 = vpop.f32.mrb[94].mxu1  ;;  %v13044_v17 = vld [vmem:[#allocation10 + $0x10] sm:$0xff]  }
 0x3da   : > { %v12015_v33 = vpop.f32.mrb[95].mxu1  ;;  %7862 = vmatprep.subr.bf16.mxu0 %v13017_v27  ;;  %v16386_v27 = vld [vmem:[#allocation27_spill] sm:$0xff] }
 0x3db   : > { %v8286_v56 = vadd.f32 %v12013_v2, %v8230_v31  ;;  %v12016_v23 = vadd.f32 %v12015_v33, %v12014_v49  ;;  %v13035_v31 = vld [vmem:[#allocation7 + $0xbd4] ss:$12 sps:$4 sm:$0xff]   ;;  %v15557_v14 = vrot.slane %v15512_v6, %v16386_v27 }
 0x3dd   : > { %v8289_v1 = vadd.f32 %v12016_v23, %v8233_v24  ;;  %7863 = vmatpush1.bf16.msra.mxu0 %v13015_v45 }
 0x3de   : > { %7864 = vmatprep.subr.bf16.mxu0 %v13020_v15 }
 0x3df   : > { %v12017_v60 = vpop.f32.mrb[96].mxu1 }
 0x3e0   : > { %v12018_v51 = vpop.f32.mrb[97].mxu1 }
 0x3e1   : > { %v12019_v50 = vadd.f32 %v12018_v51, %v12017_v60  ;;  %7865 = vmatpush1.bf16.msra.mxu0 %v13018_v5  ;;  %v12020_v16 = vpop.f32.mrb[98].mxu1 }
 0x3e2   : > { %v12021_v28 = vpop.f32.mrb[99].mxu1  ;;  %7866 = vmatprep.subr.bf16.mxu0 %v13023_v62 }
 0x3e3   : > { %v8294_v9 = vadd.f32 %v12019_v50, %v8238_v53 }
 0x3e5   : > { %7867 = vmatpush1.bf16.msra.mxu0 %v13021_v0 }
 0x3e6   : > { %7868 = vmatprep.subr.bf16.mxu0 %v13026_v13 }
 0x3e9   : > { %7869 = vmatpush1.bf16.msra.mxu0 %v13024_v11 }
 0x3ea   : > { %7870 = vmatprep.subr.bf16.mxu0 %v13029_v58 }
 0x3ed   : > { %7871 = vmatpush1.bf16.msra.mxu0 %v13027_v4 }
 0x3ee   : > { %7872 = vmatprep.subr.bf16.mxu0 %v13032_v10 }
 0x3f0   : > { %v12039_v59 = vpop.f32.mrb[100].mxu1 }
 0x3f1   : > { %v12040_v24 = vpop.f32.mrb[101].mxu1  ;;  %7873 = vmatpush1.bf16.msra.mxu0 %v13030_v61 }
 0x3f2   : > { %v12041_v34 = vadd.f32 %v12040_v24, %v12039_v59  ;;  %v12042_v22 = vpop.f32.mrb[102].mxu1  ;;  %7874 = vmatprep.subr.bf16.mxu0 %v13035_v31 }
 0x3f3   : > { %v12043_v39 = vpop.f32.mrb[103].mxu1 }
 0x3f4   : > { %v8334_v44 = vadd.f32 %v12041_v34, %v8278_v36  ;;  %v12044_v18 = vadd.f32 %v12043_v39, %v12042_v22  ;;  %v13039_v36 = vld [vmem:[#allocation10 + $0x40] sm:$0xff]  }
 0x3f5   : > { %7875 = vmatpush1.bf16.msra.mxu0 %v13033_v21  ;;  %12057 = vmatprep.subr.bf16.mxu1 %v13039_v36 }
 0x3f6   : > { %v8337_v32 = vadd.f32 %v12044_v18, %v8281_v52  ;;  %7876 = vmatprep.subr.bf16.mxu0 %v13038_v43  ;;  %v13041_v52 = vld [vmem:[#allocation10 + $0x48] sm:$0xff]   ;;  %12058 = vmatpush3.bf16.msra.mxu1 %v13040_v20 }
 0x3f7   : > { %12059 = vmatprep.subr.bf16.mxu1 %v13041_v52 }
 0x3f8   : > { %v12045_v53 = vpop.f32.mrb[104].mxu1  ;;  %v8360_v2 = vmax.f32 %v8337_v32, 0.0 }
 0x3f9   : > { %v12046_v7 = vpop.f32.mrb[105].mxu1  ;;  %7877 = vmatpush1.bf16.msra.mxu0 %v13036_v26 }
 0x3fa   : > { %v12047_v29 = vadd.f32 %v12046_v7, %v12045_v53  ;;  %v12048_v38 = vpop.f32.mrb[106].mxu1  ;;  %v8422_v5 = vcombine.high %v8360_v2, %v8360_v2  ;;  %v8443_v61 = vrot.slane %v8360_v2, %v14035_v47 }
 0x3fb   : > { %v12049_v30 = vpop.f32.mrb[107].mxu1 }
 0x3fc   : > { %v8342_v63 = vadd.f32 %v12047_v29, %v8286_v56  ;;  %v12050_v25 = vadd.f32 %v12049_v30, %v12048_v38  ;;  %7879 = vmatmul.mubr.bf16.vlgmr.msra.gmra.mrb[16].mxu0 %v15500_v8  ;;  %v13042_v8 = vld [vmem:[#allocation10 + $0x8] sm:$0xff]   ;;  %v8450_v31 = vrot.slane %v8422_v5, %v14035_v47 }
 0x3fd   : > { %7888 = vmatprep.mubr.bf16.mxu0 %v15363_v41  ;;  %v13043_v41 = vld [vmem:[#allocation10 + $0x50] sm:$0xff]   ;;  %12060 = vmatpush3.bf16.msra.mxu1 %v13042_v8 }
 0x3fe   : > { %v8345_v12 = vadd.f32 %v12050_v25, %v8289_v1  ;;  %12061 = vmatprep.subr.bf16.mxu1 %v13043_v41  ;;  %v8363_v45 = vmax.f32 %v8342_v63, 0.0 }
 0x400   : > { %v12051_v3 = vpop.f32.mrb[108].mxu1  ;;  %v8366_v62 = vmax.f32 %v8345_v12, 0.0  ;;  %v8457_v28 = vcombine.high %v8363_v45, %v8363_v45  ;;  %v15573_v59 = vrot.slane %v8363_v45, %v14035_v47 }
 0x401   : > { %v12052_v57 = vpop.f32.mrb[109].mxu1  ;;  %12062 = vmatpush3.bf16.msra.mxu1 %v13044_v17 }
 0x402   : > { %v12053_v40 = vadd.f32 %v12052_v57, %v12051_v3  ;;  %v12054_v46 = vpop.f32.mrb[110].mxu1  ;;  %v8492_v24 = vcombine.high %v8366_v62, %v8366_v62  ;;  %v15581_v18 = vrot.slane %v8366_v62, %v14035_v47 }
 0x403   : > { %v12055_v19 = vpop.f32.mrb[111].mxu1 }
 0x404   : > { %v8350_v37 = vadd.f32 %v12053_v40, %v8294_v9  ;;  %7889 = vmatmul.mubr.bf16.gmra.mrb[20].mxu0 %v15365_v35  ;;  %v8357_v35 = vmax.f32 %v8334_v44, 0.0  ;;  %v15578_v44 = vrot.slane %v8457_v28, %v14035_v47  ;;  %v15585_v25 = vrot.slane %v8492_v24, %v14035_v47 }
 0x405   : > { %7898 = vmatprep.mubr.bf16.mxu0 %v15508_v48  ;;  %v16387_v48 = vld [vmem:[#allocation26_spill] sm:$0xff] }
 0x406   : > { %v16388_v55 = vsub.s32 1, %v16387_v48  ;;  %v8387_v56 = vcombine.high %v8357_v35, %v8357_v35  ;;  %v8408_v0 = vrot.slane %v8357_v35, %v14035_v47  ;;  %v8369_v13 = vmax.f32 %v8350_v37, 0.0 }
 0x407   : > { %v15597_v2 = vsub.s32 4, %v16387_v48 }
 0x408   : > { %v8415_v11 = vrot.slane %v8387_v56, %v14035_v47  ;;  %v8527_v26 = vcombine.high %v8369_v13, %v8369_v13  ;;  %v15591_v17 = vrot.slane %v8369_v13, %v14035_v47 }
 0x40a   : > { %v15594_v35 = vrot.slane %v8527_v26, %v14035_v47 }
 0x40c   : > { %7899 = vmatmul.mubr.bf16.gmra.mrb[24].mxu0 %v15516_v54  ;;  %v15562_v54 = vrot.slane %v15512_v6, %v16388_v55 }
 0x4cf   : > { %v7880_v49 = vpop.f32.mrb[16].mxu0 }
 0x4d0   : > { %v12269_v33 = vadd.f32 %v7880_v49, %v15557_v14  ;;  %v7882_v15 = vpop.f32.mrb[17].mxu0 }
 0x4d1   : > { %v12270_v23 = vadd.f32 %v7882_v15, %v15562_v54  ;;  %v7884_v1 = vpop.f32.mrb[18].mxu0 }
 0x4d2   : > { %v8355_v60 = vmax.f32 %v12269_v33, 0.0  ;;  %v12271_v51 = vadd.f32 %v7884_v1, %v15557_v14  ;;  %v7886_v50 = vpop.f32.mrb[19].mxu0 }
 0x4d3   : > { %v8356_v16 = vmax.f32 %v12270_v23, 0.0  ;;  %v12272_v6 = vadd.f32 %v7886_v50, %v15562_v54 }
 0x4d4   : > { %v8358_v9 = vmax.f32 %v12271_v51, 0.0 }
 0x4d5   : > { %v8385_v58 = vcombine.low %v8355_v60, %v8356_v16  ;;  %v8386_v4 = vcombine.high %v8355_v60, %v8356_v16  ;;  %v8359_v10 = vmax.f32 %v12272_v6, 0.0 }
 0x4d7   : > { %v8394_v21 = vrot.slane %v8385_v58, %v14035_v47  ;;  %v8401_v34 = vrot.slane %v8386_v4, %v14035_v47  ;;  %v8420_v22 = vcombine.low %v8358_v9, %v8359_v10  ;;  %v8421_v43 = vcombine.high %v8358_v9, %v8359_v10  ;;  %v7890_v39 = vpop.f32.mrb[20].mxu0 }
 0x4d8   : > { %v12273_v32 = vadd.f32 %v7890_v39, %v15557_v14  ;;  %v7892_v53 = vpop.f32.mrb[21].mxu0 }
 0x4d9   : > { %v8416_v7 = vcombine.low %v8394_v21, %v8408_v0  ;;  %v8417_v29 = vcombine.high %v8394_v21, %v8408_v0  ;;  %v8418_v38 = vcombine.low %v8401_v34, %v8415_v11  ;;  %v8419_v30 = vcombine.high %v8401_v34, %v8415_v11  ;;  %v7894_v63 = vpop.f32.mrb[22].mxu0 }
 0x4da   : > { %v8429_v12 = vrot.slane %v8420_v22, %v14035_v47  ;;  %v8436_v3 = vrot.slane %v8421_v43, %v14035_v47  ;;  %v12274_v57 = vadd.f32 %v7892_v53, %v15562_v54  ;;  %v7896_v40 = vpop.f32.mrb[23].mxu0  ;;  %v8361_v55 = vmax.f32 %v12273_v32, 0.0 }
 0x4db   : > { %v11630_v46 = vrot.slane %v8416_v7, 9  ;;  %v11634_v19 = vrot.slane %v8417_v29, 9  ;;  %v11638_v37 = vrot.slane %v8418_v38, 9  ;;  %v11642_v36 = vrot.slane %v8419_v30, 9 }
 0x4dc   : > { %v8451_v20 = vcombine.low %v8429_v12, %v8443_v61  ;;  %v8452_v52 = vcombine.high %v8429_v12, %v8443_v61  ;;  %v8453_v8 = vcombine.low %v8436_v3, %v8450_v31  ;;  %v8454_v41 = vcombine.high %v8436_v3, %v8450_v31 }
 0x4dd   : > { %v15599_v49 = vmax.f32 %v8416_v7, %v11630_v46  ;;  %v15601_v45 = vmax.f32 %v8417_v29, %v11634_v19  ;;  %v15603_v56 = vmax.f32 %v8418_v38, %v11638_v37  ;;  %v8362_v23 = vmax.f32 %v12274_v57, 0.0  ;;  %v13046_v46 = vld [vmem:[#allocation10 + $0x18] sm:$0xff]  }
 0x4de   : > { %v11631_v33 = vrot.slane %v8452_v52, 9  ;;  %v11635_v15 = vrot.slane %v8453_v8, 9  ;;  %v12275_v1 = vadd.f32 %v7894_v63, %v15557_v14  ;;  %v12276_v5 = vadd.f32 %v7896_v40, %v15562_v54  ;;  %v13045_v40 = vld [vmem:[#allocation10 + $0x58] sm:$0xff]  }
 0x4df   : > { %v7900_v62 = vpop.f32.mrb[24].mxu0  ;;  %v15607_v60 = vmax.f32 %v8419_v30, %v11642_v36  ;;  %v11639_v48 = vrot.slane %v8454_v41, 9  ;;  %v11646_v50 = vrot.slane %v8451_v20, 9  ;;  %v8455_v6 = vcombine.low %v8361_v55, %v8362_v23  ;;  %12063 = vmatprep.subr.bf16.mxu1 %v13045_v40 }
 0x4e0   : > { %v15609_v51 = vmax.f32 %v8452_v52, %v11631_v33  ;;  %v7902_v16 = vpop.f32.mrb[25].mxu0  ;;  %v8456_v0 = vcombine.high %v8361_v55, %v8362_v23  ;;  %v8364_v28 = vmax.f32 %v12275_v1, 0.0  ;;  %v8365_v13 = vmax.f32 %v12276_v5, 0.0  ;;  %12064 = vmatpush3.bf16.msra.mxu1 %v13046_v46 }
 0x4e1   : > { %v7904_v9 = vpop.f32.mrb[26].mxu0  ;;  %v15611_v11 = vmax.f32 %v8453_v8, %v11635_v15  ;;  %v12277_v58 = vadd.f32 %v7900_v62, %v15557_v14  ;;  %v12278_v4 = vadd.f32 %v7902_v16, %v15562_v54  ;;  %v8611_v61 = vrot.slane %v15599_v49, %v15597_v2 }
 0x4e2   : > { %v7905_v10 = vpop.f32.mrb[27].mxu0  ;;  %v8464_v31 = vrot.slane %v8455_v6, %v14035_v47  ;;  %v8471_v24 = vrot.slane %v8456_v0, %v14035_v47  ;;  %v8490_v21 = vcombine.low %v8364_v28, %v8365_v13  ;;  %v8491_v34 = vcombine.high %v8364_v28, %v8365_v13 }
 0x4e3   : > { %v15619_v22 = vmax.f32 %v8454_v41, %v11639_v48  ;;  %v8367_v43 = vmax.f32 %v12277_v58, 0.0  ;;  %v8368_v39 = vmax.f32 %v12278_v4, 0.0  ;;  %v8623_v14 = vrot.slane %v15609_v51, %v15597_v2 }
 0x4e4   : > { %v8486_v54 = vcombine.low %v8464_v31, %v15573_v59  ;;  %v8487_v26 = vcombine.high %v8464_v31, %v15573_v59  ;;  %v8488_v32 = vcombine.low %v8471_v24, %v15578_v44  ;;  %v8489_v53 = vcombine.high %v8471_v24, %v15578_v44 }
 0x4e5   : > { %v8499_v7 = vrot.slane %v8490_v21, %v14035_v47  ;;  %v8506_v29 = vrot.slane %v8491_v34, %v14035_v47  ;;  %v8525_v38 = vcombine.low %v8367_v43, %v8368_v39  ;;  %v8526_v30 = vcombine.high %v8367_v43, %v8368_v39 }
 0x4e6   : > { %v15629_v63 = vmax.f32 %v8451_v20, %v11646_v50  ;;  %v11632_v12 = vrot.slane %v8488_v32, 9  ;;  %v11636_v3 = vrot.slane %v8489_v53, 9  ;;  %v11643_v57 = vrot.slane %v8486_v54, 9 }
 0x4e7   : > { %v8521_v59 = vcombine.low %v8499_v7, %v15581_v18  ;;  %v8522_v19 = vcombine.high %v8499_v7, %v15581_v18  ;;  %v8523_v44 = vcombine.low %v8506_v29, %v15585_v25  ;;  %v8524_v37 = vcombine.high %v8506_v29, %v15585_v25 }
 0x4e8   : > { %v15635_v36 = vmax.f32 %v8488_v32, %v11632_v12  ;;  %v8657_v52 = vsel %vm8648_vm1, %v8623_v14, %v8611_v61  ;;  %v8603_v20 = vrot.slane %v15599_v49, %v16386_v27  ;;  %v8615_v8 = vrot.slane %v15609_v51, %v16386_v27 }
 0x4e9   : > { %v15642_v41 = vmax.f32 %v8489_v53, %v11636_v3  ;;  %v15644_v55 = vmax.f32 %v8486_v54, %v11643_v57  ;;  %v11647_v18 = vrot.slane %v8487_v26, 9  ;;  %v11633_v33 = vrot.slane %v8524_v37, 9 }
 0x4ea   : > { %v11640_v15 = vrot.slane %v8521_v59, 9  ;;  %v8534_v25 = vrot.slane %v8525_v38, %v14035_v47  ;;  %v8541_v23 = vrot.slane %v8526_v30, %v14035_v47  ;;  %v8635_v1 = vrot.slane %v15635_v36, %v15597_v2 }
 0x4eb   : > { %v15650_v5 = vmax.f32 %v8524_v37, %v11633_v33  ;;  %v11644_v62 = vrot.slane %v8522_v19, 9  ;;  %v11648_v48 = vrot.slane %v8523_v44, 9  ;;  %v8627_v50 = vrot.slane %v15635_v36, %v16386_v27 }
 0x4ec   : > { %v8556_v16 = vcombine.low %v8534_v25, %v15591_v17  ;;  %v8557_v6 = vcombine.high %v8534_v25, %v15591_v17  ;;  %v15657_v0 = vcombine.low %v8541_v23, %v15594_v35  ;;  %v15660_v28 = vcombine.high %v8541_v23, %v15594_v35 }
 0x4ed   : > { %v15662_v13 = vmax.f32 %v8487_v26, %v11647_v18  ;;  %v8647_v9 = vrot.slane %v15650_v5, %v15597_v2  ;;  %v8658_v58 = vsel %vm8650_vm2, %v8635_v1, %v8657_v52  ;;  %v8639_v4 = vrot.slane %v15650_v5, %v16386_v27  ;;  %v13047_v52 = vld [vmem:[#allocation10 + $0x60] sm:$0xff]  }
 0x4ee   : > { %v15669_v10 = vmax.f32 %v8521_v59, %v11640_v15  ;;  %v11637_v61 = vrot.slane %v8556_v16, 9  ;;  %v11641_v17 = vrot.slane %v8557_v6, 9  ;;  %v8649_v31 = vsel %vm8648_vm1, %v8615_v8, %v8603_v20  ;;  %v13048_v15 = vld [vmem:[#allocation10 + $0x20] sm:$0xff]   ;;  %12065 = vmatprep.subr.bf16.mxu1 %v13047_v52 }
 0x4ef   : > { %v8659_v24 = vsel %vm8652_vm3, %v8647_v9, %v8658_v58  ;;  %v8651_v35 = vsel %vm8650_vm2, %v8627_v50, %v8649_v31  ;;  %v8607_v21 = vrot.slane %v15599_v49, %v16385_v42  ;;  %v8619_v34 = vrot.slane %v15609_v51, %v16385_v42  ;;  %12066 = vmatpush3.bf16.msra.mxu1 %v13048_v15 }
 0x4f0   : > { %v15678_v43 = vmax.f32 %v8522_v19, %v11644_v62  ;;  %v15680_v39 = vmax.f32 %v8523_v44, %v11648_v48  ;;  %v15682_v14 = vmax.f32 %v8556_v16, %v11637_v61  ;;  %v11645_v54 = vrot.slane %v15657_v0, 9  ;;  %8664 = vrot.lane.b32.xlu1 %v8659_v24, %s13492_s29 }
 0x4f1   : > { %v8653_v26 = vsel %vm8652_vm3, %v8639_v4, %v8651_v35  ;;  %v8631_v32 = vrot.slane %v15635_v36, %v16385_v42  ;;  %v8643_v53 = vrot.slane %v15650_v5, %v16385_v42  ;;  %v8654_v7 = vsel %vm8648_vm1, %v8619_v34, %v8607_v21  ;;  %v13049_v21 = vld [vmem:[#allocation10 + $0x68] sm:$0xff]  }
 0x4f2   : > { %8660 = vrot.lane.b32.xlu0 %v8653_v26, %s13492_s29  ;;  %v8723_v29 = vrot.slane %v15601_v45, %v16386_v27  ;;  %v8735_v38 = vrot.slane %v15611_v11, %v16386_v27  ;;  %v8747_v30 = vrot.slane %v15642_v41, %v16386_v27  ;;  %v8759_v12 = vrot.slane %v15682_v14, %v16386_v27  ;;  %v13050_v34 = vld [vmem:[#allocation10 + $0x28] sm:$0xff]  }
 0x4f3   : > { %v15701_v3 = vmax.f32 %v8557_v6, %v11641_v17  ;;  %v8655_v57 = vsel %vm8650_vm2, %v8631_v32, %v8654_v7  ;;  %v8739_v40 = vrot.slane %v15611_v11, %v16385_v42  ;;  %v8751_v46 = vrot.slane %v15642_v41, %v16385_v42  ;;  %12067 = vmatprep.subr.bf16.mxu1 %v13049_v21 }
 0x4f4   : > { %v8656_v59 = vsel %vm8652_vm3, %v8643_v53, %v8655_v57  ;;  %v8768_v19 = vsel %vm8648_vm1, %v8735_v38, %v8723_v29  ;;  %v8727_v44 = vrot.slane %v15601_v45, %v16385_v42  ;;  %v8763_v37 = vrot.slane %v15682_v14, %v16385_v42  ;;  %12068 = vmatpush3.bf16.msra.mxu1 %v13050_v34 }
 0x4f5   : > { %v8769_v20 = vsel %vm8650_vm2, %v8747_v30, %v8768_v19  ;;  %v8731_v8 = vrot.slane %v15601_v45, %v15597_v2  ;;  %v8743_v18 = vrot.slane %v15611_v11, %v15597_v2  ;;  %v8755_v33 = vrot.slane %v15642_v41, %v15597_v2 }
 0x4f6   : > { %v11649_v25 = vrot.slane %v15660_v28, 9  ;;  %8662 = vrot.lane.b32.xlu0 %v8656_v59, %s13492_s29  ;;  %v8770_v23 = vsel %vm8652_vm3, %v8759_v12, %v8769_v20  ;;  %v8771_v1 = vsel %vm8648_vm1, %v8739_v40, %v8727_v44  ;;  %v8767_v62 = vrot.slane %v15682_v14, %v15597_v2  ;;  %v13051_v40 = vld [vmem:[#allocation10 + $0x70] sm:$0xff]  }
 0x4f7   : > { %8777 = vrot.lane.b32.xlu1 %v8770_v23, %s13492_s29  ;;  %v8772_v48 = vsel %vm8650_vm2, %v8751_v46, %v8771_v1  ;;  %v8774_v50 = vsel %vm8648_vm1, %v8743_v18, %v8731_v8  ;;  %v8851_v16 = vrot.slane %v15619_v22, %v16386_v27  ;;  %v8863_v6 = vrot.slane %v15669_v10, %v16386_v27 }
 0x4f8   : > { %v8773_v9 = vsel %vm8652_vm3, %v8763_v37, %v8772_v48  ;;  %v8775_v58 = vsel %vm8650_vm2, %v8755_v33, %v8774_v50  ;;  %v8839_v4 = vrot.slane %v15603_v56, %v16386_v27  ;;  %v8855_v61 = vrot.slane %v15619_v22, %v16385_v42  ;;  %v13052_v37 = vld [vmem:[#allocation10 + $0x30] sm:$0xff]   ;;  %12069 = vmatprep.subr.bf16.mxu1 %v13051_v40 }
 0x4f9   : > { %v8875_v17 = vrot.slane %v15701_v3, %v16386_v27  ;;  %v8843_v31 = vrot.slane %v15603_v56, %v16385_v42  ;;  %v8867_v24 = vrot.slane %v15669_v10, %v16385_v42  ;;  %v8879_v35 = vrot.slane %v15701_v3, %v16385_v42  ;;  %12070 = vmatpush3.bf16.msra.mxu1 %v13052_v37 }
 0x4fa   : > { %v15749_v26 = vmax.f32 %v15657_v0, %v11645_v54  ;;  %v15752_v32 = vmax.f32 %v15660_v28, %v11649_v25  ;;  %8779 = vrot.lane.b32.xlu0 %v8773_v9, %s13492_s29  ;;  %v8776_v53 = vsel %vm8652_vm3, %v8767_v62, %v8775_v58  ;;  %v8884_v7 = vsel %vm8648_vm1, %v8851_v16, %v8839_v4 }
 0x4fb   : > { %8781 = vrot.lane.b32.xlu1 %v8776_v53, %s13492_s29  ;;  %v8885_v29 = vsel %vm8650_vm2, %v8863_v6, %v8884_v7  ;;  %v8887_v38 = vsel %vm8648_vm1, %v8855_v61, %v8843_v31  ;;  %v8847_v30 = vrot.slane %v15603_v56, %v15597_v2  ;;  %v8859_v0 = vrot.slane %v15619_v22, %v15597_v2  ;;  %v13054_v31 = vld [vmem:[#allocation10 + $0x38] sm:$0xff]  }
 0x4fc   : > { %v8888_v28 = vsel %vm8650_vm2, %v8867_v24, %v8887_v38  ;;  %v8871_v54 = vrot.slane %v15669_v10, %v15597_v2  ;;  %v8955_v12 = vrot.slane %v15607_v60, %v16386_v27  ;;  %v8967_v57 = vrot.slane %v15644_v55, %v16386_v27 }
 0x4fd   : > { %v8886_v46 = vsel %vm8652_vm3, %v8875_v17, %v8885_v29  ;;  %v8889_v59 = vsel %vm8652_vm3, %v8879_v35, %v8888_v28  ;;  %v8883_v19 = vrot.slane %v15701_v3, %v15597_v2  ;;  %v8979_v44 = vrot.slane %v15678_v43, %v16386_v27  ;;  %v13053_v17 = vld [vmem:[#allocation10 + $0x78] sm:$0xff]  }
 0x4fe   : > { %8893 = vrot.lane.b32.xlu0 %v8886_v46, %s13492_s29  ;;  %v8991_v52 = vrot.slane %v15749_v26, %v16386_v27  ;;  %v9000_v20 = vsel %vm8648_vm1, %v8967_v57, %v8955_v12  ;;  %v8959_v8 = vrot.slane %v15607_v60, %v16385_v42  ;;  %v8971_v18 = vrot.slane %v15644_v55, %v16385_v42 }
 0x4ff   : > { %8895 = vrot.lane.b32.xlu1 %v8889_v59, %s13492_s29  ;;  %v8890_v33 = vsel %vm8648_vm1, %v8859_v0, %v8847_v30  ;;  %v8983_v15 = vrot.slane %v15678_v43, %v16385_v42  ;;  %v8963_v25 = vrot.slane %v15607_v60, %v15597_v2  ;;  %v8975_v23 = vrot.slane %v15644_v55, %v15597_v2 }
 0x500   : > { %v8891_v1 = vsel %vm8650_vm2, %v8871_v54, %v8890_v33  ;;  %v8995_v62 = vrot.slane %v15749_v26, %v16385_v42  ;;  %v9003_v48 = vsel %vm8648_vm1, %v8971_v18, %v8959_v8  ;;  %v8987_v50 = vrot.slane %v15678_v43, %v15597_v2  ;;  %12071 = vmatprep.subr.bf16.mxu1 %v13053_v17  ;;  %v13055_v54 = vld [vmem:[#allocation10 + $0xc0] sm:$0xff]  }
 0x501   : > { %v8892_v16 = vsel %vm8652_vm3, %v8883_v19, %v8891_v1  ;;  %v9001_v6 = vsel %vm8650_vm2, %v8979_v44, %v9000_v20  ;;  %v9006_v9 = vsel %vm8648_vm1, %v8975_v23, %v8963_v25  ;;  %v9083_v58 = vrot.slane %v15662_v13, %v16386_v27  ;;  %12072 = vmatpush3.bf16.msra.mxu1 %v13054_v31 }
 0x502   : > { %8897 = vrot.lane.b32.xlu0 %v8892_v16, %s13492_s29  ;;  %v9002_v4 = vsel %vm8652_vm3, %v8991_v52, %v9001_v6  ;;  %v8999_v61 = vrot.slane %v15749_v26, %v15597_v2  ;;  %v9004_v24 = vsel %vm8650_vm2, %v8983_v15, %v9003_v48  ;;  %v9071_v35 = vrot.slane %v15629_v63, %v16386_v27 }
 0x503   : > { %9009 = vrot.lane.b32.xlu1 %v9002_v4, %s13492_s29  ;;  %v9087_v21 = vrot.slane %v15662_v13, %v16385_v42  ;;  %v9005_v34 = vsel %vm8652_vm3, %v8995_v62, %v9004_v24  ;;  %v9007_v53 = vsel %vm8650_vm2, %v8987_v50, %v9006_v9  ;;  %v9095_v7 = vrot.slane %v15680_v39, %v16386_v27 }
 0x504   : > { %v9075_v29 = vrot.slane %v15629_v63, %v16385_v42  ;;  %v9107_v38 = vrot.slane %v15752_v32, %v16386_v27  ;;  %v9116_v30 = vsel %vm8648_vm1, %v9083_v58, %v9071_v35  ;;  %v9099_v0 = vrot.slane %v15680_v39, %v16385_v42  ;;  %12079 = vmatprep.subr.bf16.mxu1 %v13055_v54 }
 0x505   : > { %v9091_v28 = vrot.slane %v15662_v13, %v15597_v2  ;;  %v9008_v12 = vsel %vm8652_vm3, %v8999_v61, %v9007_v53  ;;  %v9111_v57 = vrot.slane %v15752_v32, %v16385_v42  ;;  %v9079_v46 = vrot.slane %v15629_v63, %v15597_v2 }
 0x506   : > { %9011 = vrot.lane.b32.xlu0 %v9005_v34, %s13492_s29  ;;  %v9119_v40 = vsel %vm8648_vm1, %v9087_v21, %v9075_v29  ;;  %v9117_v59 = vsel %vm8650_vm2, %v9095_v7, %v9116_v30  ;;  %v9103_v19 = vrot.slane %v15680_v39, %v15597_v2  ;;  %v9115_v52 = vrot.slane %v15752_v32, %v15597_v2 }
 0x507   : > { %9013 = vrot.lane.b32.xlu1 %v9008_v12, %s13492_s29  ;;  %v9118_v44 = vsel %vm8652_vm3, %v9107_v38, %v9117_v59  ;;  %v9120_v37 = vsel %vm8650_vm2, %v9099_v0, %v9119_v40  ;;  %v9122_v20 = vsel %vm8648_vm1, %v9091_v28, %v9079_v46 }
 0x508   : > { %v9121_v8 = vsel %vm8652_vm3, %v9111_v57, %v9120_v37  ;;  %v9123_v18 = vsel %vm8650_vm2, %v9103_v19, %v9122_v20 }
 0x509   : > { %v9124_v33 = vsel %vm8652_vm3, %v9115_v52, %v9123_v18 }
 0x50a   : > { %9125 = vrot.lane.b32.xlu0 %v9118_v44, %s13492_s29 }
 0x50b   : > { %9127 = vrot.lane.b32.xlu1 %v9121_v8, %s13492_s29 }
 0x50e   : > { %9129 = vrot.lane.b32.xlu0 %v9124_v33, %s13492_s29 }
 0x562   : > { %v8665_v25 = vpop.permute.xlu1 %8664 }
 0x564   : > { %v8661_v15 = vpop.permute.xlu0 %8660 }
 0x565   : > { %v8671_v1 = vsel %vm8666_vm4, %v8665_v25, %v8661_v15 }
 0x566   : > { %v8687_v6 = vrot.slane %v8671_v1, %v14035_v47 }
 0x568   : > { %v8663_v23 = vpop.permute.xlu0 %8662 }
 0x569   : > { %v8667_v62 = vsel %vm8666_vm4, %v8661_v15, %v8663_v23  ;;  %v8668_v48 = vsel %vm8666_vm4, %v8663_v23, %v8665_v25  ;;  %v8778_v50 = vpop.permute.xlu1 %8777 }
 0x56a   : > { %v8673_v16 = vcombine.low %v8667_v62, %v8668_v48 }
 0x56c   : > { %v8680_v9 = vrot.slane %v8673_v16, %v14035_v47  ;;  %v8780_v58 = vpop.permute.xlu0 %8779 }
 0x56d   : > { %v8782_v4 = vpop.permute.xlu1 %8781  ;;  %v8783_v31 = vsel %vm8666_vm4, %v8778_v50, %v8780_v58 }
 0x56e   : > { %v8688_v61 = vcombine.low %v8680_v9, %v8687_v6  ;;  %v8689_v17 = vcombine.high %v8680_v9, %v8687_v6  ;;  %v8784_v24 = vsel %vm8666_vm4, %v8780_v58, %v8782_v4  ;;  %v8787_v53 = vsel %vm8666_vm4, %v8782_v4, %v8778_v50  ;;  %v13056_v9 = vld [vmem:[#allocation10 + $0x80] sm:$0xff]  }
 0x56f   : > { %v8789_v35 = vcombine.low %v8783_v31, %v8784_v24  ;;  %v8803_v0 = vrot.slane %v8787_v53, %v14035_v47 }
 0x570   : > { %v8690_v21 = vrot.slane %v8688_v61, 1  ;;  %v8894_v34 = vpop.permute.xlu0 %8893  ;;  %v8691_v7 = vrot.slane %v8689_v17, 1  ;;  %v15862_v30 = vmax.f32 %v15599_v49, %v8688_v61  ;;  %v15866_v54 = vmax.f32 %v15635_v36, %v8689_v17  ;;  %v13057_v17 = vld [vmem:[#allocation10 + $0xc8] sm:$0xff]  }
 0x571   : > { %v8796_v38 = vrot.slane %v8789_v35, %v14035_v47  ;;  %v8896_v28 = vpop.permute.xlu1 %8895 }
 0x572   : > { %v15858_v29 = vmax.f32 %v15609_v51, %v8690_v21  ;;  %v15869_v57 = vmax.f32 %v15650_v5, %v8691_v7  ;;  %v9175_v59 = vrot.slane %v15862_v30, %v16385_v42  ;;  %v9171_v36 = vrot.slane %v15862_v30, %v16386_v27 }
 0x573   : > { %v8804_v40 = vcombine.low %v8796_v38, %v8803_v0  ;;  %v9195_v19 = vrot.slane %v15866_v54, %v16386_v27  ;;  %v8805_v5 = vcombine.high %v8796_v38, %v8803_v0  ;;  %v9199_v44 = vrot.slane %v15866_v54, %v16385_v42  ;;  %v13059_v0 = vld [vmem:[#allocation10 + $0xd0] sm:$0xff]  }
 0x574   : > { %v8898_v12 = vpop.permute.xlu0 %8897  ;;  %v9187_v51 = vrot.slane %v15858_v29, %v16385_v42  ;;  %v9183_v46 = vrot.slane %v15858_v29, %v16386_v27  ;;  %v8899_v52 = vsel %vm8666_vm4, %v8894_v34, %v8896_v28  ;;  %v9211_v8 = vrot.slane %v15869_v57, %v16385_v42 }
 0x575   : > { %v8900_v49 = vsel %vm8666_vm4, %v8896_v28, %v8898_v12  ;;  %v8806_v37 = vrot.slane %v8804_v40, 1  ;;  %v9010_v20 = vpop.permute.xlu1 %9009  ;;  %v9207_v33 = vrot.slane %v15869_v57, %v16386_v27  ;;  %v8903_v6 = vsel %vm8666_vm4, %v8898_v12, %v8894_v34  ;;  %v13058_v34 = vld [vmem:[#allocation10 + $0x88] sm:$0xff]  }
 0x576   : > { %v9219_v18 = vsel %vm8648_vm1, %v9187_v51, %v9175_v59  ;;  %v8905_v15 = vcombine.low %v8899_v52, %v8900_v49  ;;  %v9216_v23 = vsel %vm8648_vm1, %v9183_v46, %v9171_v36  ;;  %v8807_v58 = vrot.slane %v8805_v5, 1 }
 0x577   : > { %v9220_v25 = vsel %vm8650_vm2, %v9199_v44, %v9219_v18  ;;  %v9217_v62 = vsel %vm8650_vm2, %v9195_v19, %v9216_v23  ;;  %v15896_v16 = vmax.f32 %v15611_v11, %v8806_v37  ;;  %v15901_v31 = vmax.f32 %v15601_v45, %v8804_v40  ;;  %v13061_v19 = vld [vmem:[#allocation10 + $0xd8] sm:$0xff]  }
 0x578   : > { %v9221_v1 = vsel %vm8652_vm3, %v9211_v8, %v9220_v25  ;;  %v9218_v50 = vsel %vm8652_vm3, %v9207_v33, %v9217_v62  ;;  %v8912_v4 = vrot.slane %v8905_v15, %v14035_v47  ;;  %v9012_v24 = vpop.permute.xlu0 %9011  ;;  %v8919_v21 = vrot.slane %v8903_v6, %v14035_v47  ;;  %v13062_v18 = vld [vmem:[#allocation10 + $0x98] sm:$0xff]   ;;  %v13063_v25 = vld [vmem:[#allocation10 + $0xe0] sm:$0xff]  }
 0x579   : > { %v9485_v48 = vpack.c.bf16 %v9221_v1, %v9221_v1  ;;  %v9484_v61 = vpack.c.bf16 %v9218_v50, %v9218_v50  ;;  %v9014_v35 = vpop.permute.xlu1 %9013  ;;  %v15905_v11 = vmax.f32 %v15642_v41, %v8805_v5  ;;  %v9247_v53 = vrot.slane %v15896_v16, %v16386_v27  ;;  %v13064_v6 = vld [vmem:[#allocation10 + $0xa0] sm:$0xff]  }
 0x57a   : > { %v15910_v7 = vmax.f32 %v15682_v14, %v8807_v58  ;;  %v8920_v38 = vcombine.low %v8912_v4, %v8919_v21  ;;  %v9016_v45 = vsel %vm8666_vm4, %v9012_v24, %v9014_v35  ;;  %v9235_v28 = vrot.slane %v15901_v31, %v16386_v27  ;;  %v13060_v14 = vld [vmem:[#allocation10 + $0x90] sm:$0xff]  }
 0x57b   : > { %10498 = vmatprep.mubr.bf16.mxu1 %v9485_v48  ;;  %v9015_v12 = vsel %vm8666_vm4, %v9010_v20, %v9012_v24  ;;  %v9259_v51 = vrot.slane %v15905_v11, %v16386_v27  ;;  %v8921_v49 = vcombine.high %v8912_v4, %v8919_v21  ;;  %v9019_v44 = vsel %vm8666_vm4, %v9014_v35, %v9010_v20  ;;  %v13065_v4 = vld [vmem:[#allocation10 + $0xe8] sm:$0xff]  }
 0x57c   : > { %10499 = vmatmul.mubr.bf16.vlgmr.msra.gmra.mrb[112].mxu1 %v9484_v61  ;;  %v9021_v41 = vcombine.low %v9015_v12, %v9016_v45  ;;  %v9126_v40 = vpop.permute.xlu0 %9125  ;;  %v9280_v46 = vsel %vm8648_vm1, %v9247_v53, %v9235_v28  ;;  %v8922_v59 = vrot.slane %v8920_v38, 1  ;;  %v9271_v36 = vrot.slane %v15910_v7, %v16386_v27  ;;  %v13066_v21 = vld [vmem:[#allocation10 + $0xa8] sm:$0xff]  }
 0x57d   : > { %12080 = vmatpush3.bf16.msra.mxu1 %v13056_v9  ;;  %v9281_v5 = vsel %vm8650_vm2, %v9259_v51, %v9280_v46  ;;  %v8923_v33 = vrot.slane %v8921_v49, 1  ;;  %v9035_v23 = vrot.slane %v9019_v44, %v14035_v47  ;;  %v15930_v62 = vmax.f32 %v15603_v56, %v8920_v38  ;;  %v9128_v50 = vpop.permute.xlu1 %9127 }
 0x57e   : > { %12081 = vmatprep.subr.bf16.mxu1 %v13057_v17  ;;  %v9282_v37 = vsel %vm8652_vm3, %v9271_v36, %v9281_v5  ;;  %v9028_v52 = vrot.slane %v9021_v41, %v14035_v47  ;;  %v15926_v15 = vmax.f32 %v15619_v22, %v8922_v59  ;;  %v15933_v20 = vmax.f32 %v15669_v10, %v8921_v49  ;;  %v13068_v49 = vld [vmem:[#allocation10 + $0xb0] sm:$0xff]   ;;  %v13069_v36 = vld [vmem:[#allocation10 + $0xf8] sm:$0xff]  }
 0x57f   : > { %v9487_v8 = vpack.c.bf16 %v9282_v37, %v9282_v37  ;;  %v15936_v9 = vmax.f32 %v15701_v3, %v8923_v33  ;;  %v9307_v56 = vrot.slane %v15930_v62, %v15597_v2  ;;  %v9131_v10 = vsel %vm8666_vm4, %v9126_v40, %v9128_v50  ;;  %v13071_v33 = vld [vmem:[#allocation10 + $0x140] sm:$0xff]  }
 0x580   : > { %v9130_v1 = vpop.permute.xlu0 %9129  ;;  %v9036_v48 = vcombine.low %v9028_v52, %v9035_v23  ;;  %v9319_v22 = vrot.slane %v15926_v15, %v15597_v2  ;;  %v9037_v61 = vcombine.high %v9028_v52, %v9035_v23  ;;  %v9191_v17 = vrot.slane %v15858_v29, %v15597_v2 }
 0x581   : > { %12082 = vmatpush3.bf16.msra.mxu1 %v13058_v34  ;;  %10538 = vmatprep.mubr.bf16.mxu1 %v9487_v8  ;;  %v9132_v58 = vsel %vm8666_vm4, %v9128_v50, %v9130_v1  ;;  %v9331_v3 = vrot.slane %v15933_v20, %v15597_v2  ;;  %v13067_v34 = vld [vmem:[#allocation10 + $0xf0] sm:$0xff]   ;;  %v9255_v53 = vrot.slane %v15896_v16, %v15597_v2 }
 0x582   : > { %12083 = vmatprep.subr.bf16.mxu1 %v13059_v0  ;;  %v9038_v24 = vrot.slane %v9036_v48, 1  ;;  %v9137_v35 = vcombine.low %v9131_v10, %v9132_v58  ;;  %v9343_v38 = vrot.slane %v15936_v9, %v15597_v2  ;;  %v9350_v45 = vsel %vm8648_vm1, %v9319_v22, %v9307_v56 }
 0x583   : > { %v9179_v29 = vrot.slane %v15862_v30, %v15597_v2  ;;  %v9351_v0 = vsel %vm8650_vm2, %v9331_v3, %v9350_v45  ;;  %v9243_v28 = vrot.slane %v15901_v31, %v15597_v2  ;;  %v9039_v12 = vrot.slane %v9037_v61, 1  ;;  %v13077_v45 = vld [vmem:[#allocation10 + $0x158] sm:$0xff]  }
 0x584   : > { %v9135_v41 = vsel %vm8666_vm4, %v9130_v1, %v9126_v40  ;;  %v15960_v51 = vsel %vm8652_vm3, %v9343_v38, %v9351_v0  ;;  %v15963_v46 = vmax.f32 %v15644_v55, %v9038_v24  ;;  %v9203_v59 = vrot.slane %v15866_v54, %v15597_v2  ;;  %v13074_v24 = vld [vmem:[#allocation10 + $0x108] sm:$0xff]   ;;  %v13078_v0 = vld [vmem:[#allocation10 + $0x118] sm:$0xff]  }
 0x585   : > { %12084 = vmatpush3.bf16.msra.mxu1 %v13060_v14  ;;  %v9144_v14 = vrot.slane %v9137_v35, %v14035_v47  ;;  %v9222_v30 = vsel %vm8648_vm1, %v9191_v17, %v9179_v29  ;;  %v15971_v40 = vmax.f32 %v15607_v60, %v9036_v48  ;;  %v9151_v5 = vrot.slane %v9135_v41, %v14035_v47  ;;  %v13070_v60 = vld [vmem:[#allocation10 + $0xb8] sm:$0xff]   ;;  %v13075_v35 = vld [vmem:[#allocation10 + $0x150] sm:$0xff]  }
 0x586   : > { %12085 = vmatprep.subr.bf16.mxu1 %v13061_v19  ;;  %v9286_v19 = vsel %vm8648_vm1, %v9255_v53, %v9243_v28  ;;  %v9267_v55 = vrot.slane %v15905_v11, %v15597_v2  ;;  %v15977_v44 = vmax.f32 %v15678_v43, %v9037_v61  ;;  %v15980_v37 = vmax.f32 %v15749_v26, %v9039_v12  ;;  %v13079_v28 = vld [vmem:[#allocation10 + $0x160] sm:$0xff]  }
 0x587   : > { %v9223_v54 = vsel %vm8650_vm2, %v9203_v59, %v9222_v30  ;;  %v9379_v52 = vrot.slane %v15963_v46, %v16385_v42  ;;  %v9152_v8 = vcombine.low %v9144_v14, %v9151_v5  ;;  %v9215_v47 = vrot.slane %v15869_v57, %v15597_v2  ;;  %v13072_v57 = vld [vmem:[#allocation10 + $0x100] sm:$0xff]   ;;  %v13082_v59 = vld [vmem:[#allocation10 + $0x128] sm:$0xff]  }
 0x588   : > { %v9279_v43 = vrot.slane %v15910_v7, %v15597_v2  ;;  %v9367_v26 = vrot.slane %v15971_v40, %v16385_v42  ;;  %v9391_v23 = vrot.slane %v15977_v44, %v16385_v42  ;;  %v9153_v48 = vcombine.high %v9144_v14, %v9151_v5  ;;  %v13080_v14 = vld [vmem:[#allocation10 + $0x120] sm:$0xff]  }
 0x589   : > { %12086 = vmatpush3.bf16.msra.mxu1 %v13062_v18  ;;  %v9287_v18 = vsel %vm8650_vm2, %v9267_v55, %v9286_v19  ;;  %v9154_v50 = vrot.slane %v9152_v8, 1  ;;  %v9251_v30 = vrot.slane %v15896_v16, %v16385_v42  ;;  %v9315_v19 = vrot.slane %v15926_v15, %v16385_v42 }
 0x58a   : > { %12087 = vmatprep.subr.bf16.mxu1 %v13063_v25  ;;  %v9224_v25 = vsel %vm8652_vm3, %v9215_v47, %v9223_v54  ;;  %v9288_v1 = vsel %vm8652_vm3, %v9279_v43, %v9287_v18  ;;  %v9411_v22 = vsel %vm8648_vm1, %v9379_v52, %v9367_v26  ;;  %v9155_v17 = vrot.slane %v9153_v48, 1  ;;  %v13084_v54 = vld [vmem:[#allocation10 + $0x130] sm:$0xff]   ;;  %v13087_v26 = vld [vmem:[#allocation10 + $0x1c0] sm:$0xff]  }
 0x58b   : > { %v9486_v58 = vpack.c.bf16 %v9224_v25, %v9224_v25  ;;  %v9412_v56 = vsel %vm8650_vm2, %v9391_v23, %v9411_v22  ;;  %v9489_v61 = vpack.c.bf16 %v9288_v1, %v9288_v1  ;;  %v16004_v3 = vmax.f32 %v15662_v13, %v9154_v50  ;;  %v13076_v13 = vld [vmem:[#allocation10 + $0x110] sm:$0xff]   ;;  %v13088_v1 = vld [vmem:[#allocation10 + $0x180] sm:$0xff]   ;;  %v13089_v50 = vld [vmem:[#allocation10 + $0x1c8] sm:$0xff]  }
 0x58c   : > { %v16013_v53 = vmax.f32 %v15752_v32, %v9155_v17  ;;  %v9239_v5 = vrot.slane %v15901_v31, %v16385_v42  ;;  %v9303_v55 = vrot.slane %v15930_v62, %v16385_v42  ;;  %v9263_v16 = vrot.slane %v15905_v11, %v16385_v42  ;;  %v13086_v31 = vld [vmem:[#allocation10 + $0x138] sm:$0xff]   ;;  %v13096_v17 = vld [vmem:[#allocation10 + $0x1a0] sm:$0xff]  }
 0x58d   : > { %12088 = vmatpush3.bf16.msra.mxu1 %v13064_v6  ;;  %v9403_v6 = vrot.slane %v15980_v37, %v16385_v42  ;;  %v9447_v38 = vrot.slane %v16004_v3, %v15597_v2  ;;  %v9327_v47 = vrot.slane %v15933_v20, %v16385_v42  ;;  %v9339_v11 = vrot.slane %v15936_v9, %v16385_v42 }
 0x58e   : > { %12089 = vmatprep.subr.bf16.mxu1 %v13065_v4  ;;  %v13073_v4 = vld [vmem:[#allocation10 + $0x148] sm:$0xff]   ;;  %v9283_v52 = vsel %vm8648_vm1, %v9251_v30, %v9239_v5  ;;  %v13493_v22 = vmov 0.0   ;;  %v13104_v5 = vld [vmem:[#allocation10 + $0x200] sm:$0xff]  }
 0x58f   : > { %v16001_v10 = vsel %vm8652_vm3, %v9403_v6, %v9412_v56  ;;  %v9284_v18 = vsel %vm8650_vm2, %v9263_v16, %v9283_v52  ;;  %v13091_v6 = vld [vmem:[#allocation10 + $0x1d0] sm:$0xff]   ;;  %12249 = vmatprep.subr.bf16.mxu0 %v13493_v22  ;;  %v13094_v56 = vld [vmem:[#allocation10 + $0x198] sm:$0xff]   ;;  %12265 = vmatprep.mubr.msk.bf16.mxu0 %vm13494_vm5, %v13493_v22  ;;  %v13106_v52 = vld [vmem:[#allocation10 + $0x208] sm:$0xff]  }
 0x590   : > { %v13107_v16 = vld [vmem:[#allocation10 + $0x250] sm:$0xff]  }
 0x591   : > { %12090 = vmatpush3.bf16.msra.mxu1 %v13066_v21  ;;  %v16007_v21 = vmax.f32 %v15629_v63, %v9152_v8  ;;  %v13085_v8 = vld [vmem:[#allocation10 + $0x178] sm:$0xff]  }
 0x592   : > { %12091 = vmatprep.subr.bf16.mxu1 %v13067_v34  ;;  %v16010_v34 = vmax.f32 %v15680_v39, %v9153_v48  ;;  %v9471_v39 = vrot.slane %v16013_v53, %v15597_v2 }
 0x593   : > { %v9435_v29 = vrot.slane %v16007_v21, %v15597_v2 }
 0x594   : > { %v9459_v63 = vrot.slane %v16010_v34, %v15597_v2 }
 0x595   : > { %12092 = vmatpush3.bf16.msra.mxu1 %v13068_v49  ;;  %v9478_v32 = vsel %vm8648_vm1, %v9447_v38, %v9435_v29  ;;  %v13081_v49 = vld [vmem:[#allocation10 + $0x168] sm:$0xff]   ;;  %v9299_v29 = vrot.slane %v15930_v62, %v16386_v27  ;;  %v13102_v62 = vld [vmem:[#allocation10 + $0x1b8] sm:$0xff]  }
 0x596   : > { %12093 = vmatprep.subr.bf16.mxu1 %v13069_v36  ;;  %v9479_v12 = vsel %vm8650_vm2, %v9459_v63, %v9478_v32  ;;  %v13083_v36 = vld [vmem:[#allocation10 + $0x170] sm:$0xff]   ;;  %v13098_v38 = vld [vmem:[#allocation10 + $0x1a8] sm:$0xff]   ;;  %v9363_v63 = vrot.slane %v15971_v40, %v16386_v27  ;;  %v13101_v32 = vld [vmem:[#allocation10 + $0x1f8] sm:$0xff]  }
 0x597   : > { %v16026_v41 = vsel %vm8652_vm3, %v9471_v39, %v9479_v12  ;;  %v9387_v12 = vrot.slane %v15977_v44, %v16386_v27 }
 0x599   : > { %12094 = vmatpush3.bf16.msra.mxu1 %v13070_v60  ;;  %v9347_v60 = vsel %vm8648_vm1, %v9315_v19, %v9303_v55 }
 0x59a   : > { %12101 = vmatprep.subr.bf16.mxu1 %v13071_v33  ;;  %v9275_v33 = vrot.slane %v15910_v7, %v16385_v42  ;;  %v9348_v43 = vsel %vm8650_vm2, %v9327_v47, %v9347_v60  ;;  %v13090_v7 = vld [vmem:[#allocation10 + $0x188] sm:$0xff]   ;;  %v13109_v60 = vld [vmem:[#allocation10 + $0x258] sm:$0xff]  }
 0x59b   : > { %v9349_v23 = vsel %vm8652_vm3, %v9339_v11, %v9348_v43  ;;  %v13110_v47 = vld [vmem:[#allocation10 + $0x218] sm:$0xff]   ;;  %v13114_v43 = vld [vmem:[#allocation10 + $0x228] sm:$0xff]   ;;  %v9383_v11 = vrot.slane %v15963_v46, %v15597_v2 }
 0x59c   : > { %10539 = vmatmul.mubr.bf16.vlgmr.msra.gmra.mrb[116].mxu1 %v9486_v58  ;;  %v9285_v25 = vsel %vm8652_vm3, %v9275_v33, %v9284_v18  ;;  %v13092_v58 = vld [vmem:[#allocation10 + $0x190] sm:$0xff]   ;;  %v13111_v18 = vld [vmem:[#allocation10 + $0x260] sm:$0xff]   ;;  %v13113_v33 = vld [vmem:[#allocation10 + $0x268] sm:$0xff]  }
 0x59d   : > { %12102 = vmatpush3.bf16.msra.mxu1 %v13072_v57  ;;  %10578 = vmatprep.mubr.bf16.mxu1 %v9489_v61  ;;  %v9488_v48 = vpack.c.bf16 %v9285_v25, %v9285_v25  ;;  %v9491_v57 = vpack.c.bf16 %v9349_v23, %v9349_v23  ;;  %v13095_v61 = vld [vmem:[#allocation10 + $0x1e0] sm:$0xff]   ;;  %v9371_v25 = vrot.slane %v15971_v40, %v15597_v2  ;;  %v13116_v23 = vld [vmem:[#allocation10 + $0x230] sm:$0xff]  }
 0x59e   : > { %12103 = vmatprep.subr.bf16.mxu1 %v13073_v4  ;;  %v13093_v4 = vld [vmem:[#allocation10 + $0x1d8] sm:$0xff]  }
 0x5a1   : > { %12104 = vmatpush3.bf16.msra.mxu1 %v13074_v24  ;;  %v13097_v24 = vld [vmem:[#allocation10 + $0x1e8] sm:$0xff]  }
 0x5a2   : > { %12105 = vmatprep.subr.bf16.mxu1 %v13075_v35  ;;  %v9311_v35 = vrot.slane %v15926_v15, %v16386_v27  ;;  %v9323_v15 = vrot.slane %v15933_v20, %v16386_v27  ;;  %v9399_v20 = vrot.slane %v15980_v37, %v16386_v27 }
 0x5a4   : > { %v9344_v39 = vsel %vm8648_vm1, %v9311_v35, %v9299_v29  ;;  %v13127_v35 = vld [vmem:[#allocation10 + $0x2e0] sm:$0xff]   ;;  %v9443_v29 = vrot.slane %v16004_v3, %v16385_v42 }
 0x5a5   : > { %12106 = vmatpush3.bf16.msra.mxu1 %v13076_v13  ;;  %v13099_v13 = vld [vmem:[#allocation10 + $0x1f0] sm:$0xff]  }
 0x5a6   : > { %12107 = vmatprep.subr.bf16.mxu1 %v13077_v45  ;;  %v9375_v45 = vrot.slane %v15963_v46, %v16386_v27  ;;  %v9407_v46 = vrot.slane %v15980_v37, %v15597_v2  ;;  %v13126_v37 = vld [vmem:[#allocation10 + $0x298] sm:$0xff]  }
 0x5a9   : > { %12108 = vmatpush3.bf16.msra.mxu1 %v13078_v0  ;;  %v13100_v0 = vld [vmem:[#allocation10 + $0x1b0] sm:$0xff]  }
 0x5aa   : > { %12109 = vmatprep.subr.bf16.mxu1 %v13079_v28  ;;  %v9408_v28 = vsel %vm8648_vm1, %v9375_v45, %v9363_v63  ;;  %v13131_v45 = vld [vmem:[#allocation10 + $0x2f0] sm:$0xff]   ;;  %v9431_v63 = vrot.slane %v16007_v21, %v16385_v42 }
 0x5ab   : > { %v9409_v30 = vsel %vm8650_vm2, %v9387_v12, %v9408_v28  ;;  %v13134_v28 = vld [vmem:[#allocation10 + $0x2b8] sm:$0xff]  }
 0x5ac   : > { %v9410_v19 = vsel %vm8652_vm3, %v9399_v20, %v9409_v30  ;;  %v13136_v30 = vld [vmem:[#allocation10 + $0x300] sm:$0xff]   ;;  %v13137_v20 = vld [vmem:[#allocation10 + $0x348] sm:$0xff]  }
 0x5ad   : > { %12110 = vmatpush3.bf16.msra.mxu1 %v13080_v14  ;;  %v9345_v14 = vsel %vm8650_vm2, %v9323_v15, %v9344_v39  ;;  %v13133_v39 = vld [vmem:[#allocation10 + $0x2f8] sm:$0xff]   ;;  %v9475_v15 = vsel %vm8648_vm1, %v9443_v29, %v9431_v63  ;;  %v13159_v63 = vld [vmem:[#allocation13] sm:$0xff]  }
 0x5ae   : > { %12111 = vmatprep.subr.bf16.mxu1 %v13081_v49  ;;  %v9335_v49 = vrot.slane %v15936_v9, %v16386_v27  ;;  %v9493_v9 = vpack.c.bf16 %v9410_v19, %v9410_v19  ;;  %v13138_v19 = vld [vmem:[#allocation10 + $0x308] sm:$0xff]   ;;  %12250 = vmatpush3.bf16.msra.mxu0 %v13159_v63 }
 0x5af   : > { %12251 = vmatprep.subr.bf16.mxu0 %v13493_v22 }
 0x5b1   : > { %12112 = vmatpush3.bf16.msra.mxu1 %v13082_v59  ;;  %v13103_v59 = vld [vmem:[#allocation10 + $0x240] sm:$0xff]  }
 0x5b2   : > { %12113 = vmatprep.subr.bf16.mxu1 %v13083_v36  ;;  %v9346_v36 = vsel %vm8652_vm3, %v9335_v49, %v9345_v14  ;;  %v13135_v14 = vld [vmem:[#allocation10 + $0x340] sm:$0xff]  }
 0x5b3   : > { %v9490_v55 = vpack.c.bf16 %v9346_v36, %v9346_v36 }
 0x5b5   : > { %12114 = vmatpush3.bf16.msra.mxu1 %v13084_v54  ;;  %v13105_v54 = vld [vmem:[#allocation10 + $0x248] sm:$0xff]  }
 0x5b6   : > { %12115 = vmatprep.subr.bf16.mxu1 %v13085_v8  ;;  %v13108_v8 = vld [vmem:[#allocation10 + $0x210] sm:$0xff]  }
 0x5b9   : > { %12116 = vmatpush3.bf16.msra.mxu1 %v13086_v31  ;;  %v13112_v31 = vld [vmem:[#allocation10 + $0x220] sm:$0xff]  }
 0x5ba   : > { %12123 = vmatprep.subr.bf16.mxu1 %v13087_v26  ;;  %v13115_v26 = vld [vmem:[#allocation10 + $0x270] sm:$0xff]  }
 0x5bc   : > { %10579 = vmatmul.mubr.bf16.vlgmr.msra.gmra.mrb[120].mxu1 %v9488_v48  ;;  %v9414_v48 = vsel %vm8648_vm1, %v9383_v11, %v9371_v25  ;;  %v9463_v11 = vrot.slane %v16013_v53, %v16386_v27 }
 0x5bd   : > { %12124 = vmatpush3.bf16.msra.mxu1 %v13088_v1  ;;  %10618 = vmatprep.mubr.bf16.mxu1 %v9491_v57  ;;  %v13117_v1 = vld [vmem:[#allocation10 + $0x278] sm:$0xff]  }
 0x5be   : > { %12125 = vmatprep.subr.bf16.mxu1 %v13089_v50  ;;  %v9395_v50 = vrot.slane %v15977_v44, %v15597_v2  ;;  %v13118_v57 = vld [vmem:[#allocation10 + $0x238] sm:$0xff]   ;;  %v13122_v44 = vld [vmem:[#allocation10 + $0x288] sm:$0xff]  }
 0x5bf   : > { %v13125_v2 = vld [vmem:[#allocation10 + $0x2d8] sm:$0xff]  }
 0x5c1   : > { %12126 = vmatpush3.bf16.msra.mxu1 %v13090_v7  ;;  %v9415_v7 = vsel %vm8650_vm2, %v9395_v50, %v9414_v48  ;;  %v13156_v48 = vld [vmem:[#allocation10 + $0x3a8] sm:$0xff]  }
 0x5c2   : > { %12127 = vmatprep.subr.bf16.mxu1 %v13091_v6  ;;  %v13119_v6 = vld [vmem:[#allocation10 + $0x2c0] sm:$0xff]   ;;  %v9416_v40 = vsel %vm8652_vm3, %v9407_v46, %v9415_v7  ;;  %v13157_v46 = vld [vmem:[#allocation10 + $0x3b0] sm:$0xff]  }
 0x5c5   : > { %12128 = vmatpush3.bf16.msra.mxu1 %v13092_v58  ;;  %v13120_v58 = vld [vmem:[#allocation10 + $0x280] sm:$0xff]  }
 0x5c6   : > { %12129 = vmatprep.subr.bf16.mxu1 %v13093_v4  ;;  %v9492_v4 = vpack.c.bf16 %v15960_v51, %v15960_v51  ;;  %v13129_v51 = vld [vmem:[#allocation10 + $0x2e8] sm:$0xff]  }
 0x5c9   : > { %12130 = vmatpush3.bf16.msra.mxu1 %v13094_v56  ;;  %v13121_v56 = vld [vmem:[#allocation10 + $0x2c8] sm:$0xff]  }
 0x5ca   : > { %12131 = vmatprep.subr.bf16.mxu1 %v13095_v61  ;;  %v9495_v61 = vpack.c.bf16 %v9416_v40, %v9416_v40 }
 0x5cd   : > { %12132 = vmatpush3.bf16.msra.mxu1 %v13096_v17  ;;  %v13123_v17 = vld [vmem:[#allocation10 + $0x2d0] sm:$0xff]  }
 0x5ce   : > { %12133 = vmatprep.subr.bf16.mxu1 %v13097_v24  ;;  %v13124_v24 = vld [vmem:[#allocation10 + $0x290] sm:$0xff]  }
 0x5d1   : > { %12134 = vmatpush3.bf16.msra.mxu1 %v13098_v38  ;;  %v13128_v38 = vld [vmem:[#allocation10 + $0x2a0] sm:$0xff]  }
 0x5d2   : > { %12135 = vmatprep.subr.bf16.mxu1 %v13099_v13  ;;  %v13130_v13 = vld [vmem:[#allocation10 + $0x2a8] sm:$0xff]  }
 0x5d5   : > { %12136 = vmatpush3.bf16.msra.mxu1 %v13100_v0  ;;  %v13132_v0 = vld [vmem:[#allocation10 + $0x2b0] sm:$0xff]  }
 0x5d6   : > { %12137 = vmatprep.subr.bf16.mxu1 %v13101_v32  ;;  %v9455_v32 = vrot.slane %v16010_v34, %v16385_v42 }
 0x5d8   : > { %v9476_v12 = vsel %vm8650_vm2, %v9455_v32, %v9475_v15  ;;  %v13162_v15 = vld [vmem:[#allocation13 + $0x18] sm:$0xff]   ;;  %v13163_v32 = vld [vmem:[#allocation13 + $0x20] sm:$0xff]  }
 0x5d9   : > { %12138 = vmatpush3.bf16.msra.mxu1 %v13102_v62  ;;  %v9467_v62 = vrot.slane %v16013_v53, %v16385_v42  ;;  %v13141_v42 = vld [vmem:[#allocation10 + $0x358] sm:$0xff]   ;;  %v13155_v53 = vld [vmem:[#allocation10 + $0x3a0] sm:$0xff]  }
 0x5da   : > { %12145 = vmatprep.subr.bf16.mxu1 %v13103_v59  ;;  %v9494_v59 = vpack.c.bf16 %v16001_v10, %v16001_v10  ;;  %v13145_v10 = vld [vmem:[#allocation10 + $0x368] sm:$0xff]  }
 0x5db   : > { %v9477_v49 = vsel %vm8652_vm3, %v9467_v62, %v9476_v12 }
 0x5dc   : > { %10619 = vmatmul.mubr.bf16.vlgmr.msra.gmra.mrb[124].mxu1 %v9490_v55  ;;  %v9497_v36 = vpack.c.bf16 %v9477_v49, %v9477_v49  ;;  %v13140_v55 = vld [vmem:[#allocation10 + $0x310] sm:$0xff]  }
 0x5dd   : > { %12146 = vmatpush3.bf16.msra.mxu1 %v13104_v5  ;;  %10658 = vmatprep.mubr.bf16.mxu1 %v9493_v9  ;;  %v13139_v5 = vld [vmem:[#allocation10 + $0x350] sm:$0xff]   ;;  %v13143_v9 = vld [vmem:[#allocation10 + $0x360] sm:$0xff]  }
 0x5de   : > { %12147 = vmatprep.subr.bf16.mxu1 %v13105_v54  ;;  %v13142_v54 = vld [vmem:[#allocation10 + $0x318] sm:$0xff]  }
 0x5e1   : > { %12148 = vmatpush3.bf16.msra.mxu1 %v13106_v52  ;;  %v13144_v52 = vld [vmem:[#allocation10 + $0x320] sm:$0xff]  }
 0x5e2   : > { %12149 = vmatprep.subr.bf16.mxu1 %v13107_v16  ;;  %v9439_v16 = vrot.slane %v16004_v3, %v16386_v27  ;;  %v13150_v3 = vld [vmem:[#allocation10 + $0x338] sm:$0xff]  }
 0x5e5   : > { %12150 = vmatpush3.bf16.msra.mxu1 %v13108_v8  ;;  %v13146_v8 = vld [vmem:[#allocation10 + $0x328] sm:$0xff]  }
 0x5e6   : > { %12151 = vmatprep.subr.bf16.mxu1 %v13109_v60  ;;  %v13147_v60 = vld [vmem:[#allocation10 + $0x370] sm:$0xff]  }
 0x5e9   : > { %12152 = vmatpush3.bf16.msra.mxu1 %v13110_v47  ;;  %v9427_v47 = vrot.slane %v16007_v21, %v16386_v27  ;;  %v13151_v21 = vld [vmem:[#allocation10 + $0x380] sm:$0xff]  }
 0x5ea   : > { %12153 = vmatprep.subr.bf16.mxu1 %v13111_v18  ;;  %v13148_v18 = vld [vmem:[#allocation10 + $0x330] sm:$0xff]  }
 0x5ed   : > { %12154 = vmatpush3.bf16.msra.mxu1 %v13112_v31  ;;  %v9472_v31 = vsel %vm8648_vm1, %v9439_v16, %v9427_v47 }
 0x5ee   : > { %12155 = vmatprep.subr.bf16.mxu1 %v13113_v33  ;;  %v9451_v33 = vrot.slane %v16010_v34, %v16386_v27  ;;  %v13152_v34 = vld [vmem:[#allocation10 + $0x388] sm:$0xff]   ;;  %v13154_v27 = vld [vmem:[#allocation10 + $0x398] sm:$0xff]  }
 0x5f1   : > { %12156 = vmatpush3.bf16.msra.mxu1 %v13114_v43  ;;  %v13149_v43 = vld [vmem:[#allocation10 + $0x378] sm:$0xff]  }
 0x5f2   : > { %12157 = vmatprep.subr.bf16.mxu1 %v13115_v26  ;;  %v9473_v26 = vsel %vm8650_vm2, %v9451_v33, %v9472_v31 }
 0x5f3   : > { %v9474_v25 = vsel %vm8652_vm3, %v9463_v11, %v9473_v26 }
 0x5f5   : > { %12158 = vmatpush3.bf16.msra.mxu1 %v13116_v23  ;;  %v9496_v23 = vpack.c.bf16 %v9474_v25, %v9474_v25 }
 0x5f6   : > { %12159 = vmatprep.subr.bf16.mxu1 %v13117_v1  ;;  %v13153_v1 = vld [vmem:[#allocation10 + $0x390] sm:$0xff]  }
 0x5f9   : > { %12160 = vmatpush3.bf16.msra.mxu1 %v13118_v57 }
 0x5fa   : > { %12167 = vmatprep.subr.bf16.mxu1 %v13119_v6 }
 0x5fc   : > { %10659 = vmatmul.mubr.bf16.vlgmr.msra.gmra.mrb[128].mxu1 %v9492_v4  ;;  %v9498_v4 = vpack.c.bf16 %v16026_v41, %v16026_v41  ;;  %v13161_v41 = vld [vmem:[#allocation13 + $0x10] sm:$0xff]  }
 0x5fd   : > { %12168 = vmatpush3.bf16.msra.mxu1 %v13120_v58  ;;  %10698 = vmatprep.mubr.bf16.mxu1 %v9495_v61  ;;  %v13158_v58 = vld [vmem:[#allocation10 + $0x3b8] sm:$0xff]  }
 0x5fe   : > { %12169 = vmatprep.subr.bf16.mxu1 %v13121_v56  ;;  %v11650_v56 = vld [vmem:[#allocation11] ss:$0 sm:$0xff] }
 0x601   : > { %12170 = vmatpush3.bf16.msra.mxu1 %v13122_v44 }
 0x602   : > { %12171 = vmatprep.subr.bf16.mxu1 %v13123_v17 }
 0x605   : > { %12172 = vmatpush3.bf16.msra.mxu1 %v13124_v24 }
 0x606   : > { %12173 = vmatprep.subr.bf16.mxu1 %v13125_v2 }
 0x609   : > { %12174 = vmatpush3.bf16.msra.mxu1 %v13126_v37 }
 0x60a   : > { %12175 = vmatprep.subr.bf16.mxu1 %v13127_v35 }
 0x60d   : > { %12176 = vmatpush3.bf16.msra.mxu1 %v13128_v38 }
 0x60e   : > { %12177 = vmatprep.subr.bf16.mxu1 %v13129_v51 }
 0x611   : > { %12178 = vmatpush3.bf16.msra.mxu1 %v13130_v13 }
 0x612   : > { %12179 = vmatprep.subr.bf16.mxu1 %v13131_v45 }
 0x615   : > { %12180 = vmatpush3.bf16.msra.mxu1 %v13132_v0 }
 0x616   : > { %12181 = vmatprep.subr.bf16.mxu1 %v13133_v39  ;;  %v13160_v39 = vld [vmem:[#allocation13 + $0x8] sm:$0xff]  }
 0x617   : > { %12252 = vmatpush3.bf16.msra.mxu0 %v13160_v39 }
 0x618   : > { %12253 = vmatprep.subr.bf16.mxu0 %v13493_v22 }
 0x619   : > { %12182 = vmatpush3.bf16.msra.mxu1 %v13134_v28  ;;  %v13164_v28 = vld [vmem:[#allocation13 + $0x28] sm:$0xff]  }
 0x61a   : > { %12189 = vmatprep.subr.bf16.mxu1 %v13135_v14 }
 0x61b   : > { %12254 = vmatpush3.bf16.msra.mxu0 %v13161_v41 }
 0x61c   : > { %10699 = vmatmul.mubr.bf16.vlgmr.msra.gmra.mrb[132].mxu1 %v9494_v59  ;;  %12255 = vmatprep.subr.bf16.mxu0 %v13493_v22 }
 0x61d   : > { %12190 = vmatpush3.bf16.msra.mxu1 %v13136_v30  ;;  %10738 = vmatprep.mubr.bf16.mxu1 %v9497_v36  ;;  %v13166_v36 = vld [vmem:[#allocation13 + $0x38] sm:$0xff]  }
 0x61e   : > { %12191 = vmatprep.subr.bf16.mxu1 %v13137_v20  ;;  %v13165_v20 = vld [vmem:[#allocation13 + $0x30] sm:$0xff]  }
 0x61f   : > { %12256 = vmatpush3.bf16.msra.mxu0 %v13162_v15 }
 0x620   : > { %12257 = vmatprep.subr.bf16.mxu0 %v13493_v22 }
 0x621   : > { %12192 = vmatpush3.bf16.msra.mxu1 %v13138_v19 }
 0x622   : > { %12193 = vmatprep.subr.bf16.mxu1 %v13139_v5 }
 0x623   : > { %12258 = vmatpush3.bf16.msra.mxu0 %v13163_v32 }
 0x624   : > { %12259 = vmatprep.subr.bf16.mxu0 %v13493_v22 }
 0x625   : > { %12194 = vmatpush3.bf16.msra.mxu1 %v13140_v55 }
 0x626   : > { %12195 = vmatprep.subr.bf16.mxu1 %v13141_v42 }
 0x627   : > { %12260 = vmatpush3.bf16.msra.mxu0 %v13164_v28 }
 0x628   : > { %12261 = vmatprep.subr.bf16.mxu0 %v13493_v22 }
 0x629   : > { %12196 = vmatpush3.bf16.msra.mxu1 %v13142_v54 }
 0x62a   : > { %12197 = vmatprep.subr.bf16.mxu1 %v13143_v9 }
 0x62b   : > { %12262 = vmatpush3.bf16.msra.mxu0 %v13165_v20 }
 0x62c   : > { %12263 = vmatprep.subr.bf16.mxu0 %v13493_v22 }
 0x62d   : > { %12198 = vmatpush3.bf16.msra.mxu1 %v13144_v52 }
 0x62e   : > { %12199 = vmatprep.subr.bf16.mxu1 %v13145_v10 }
 0x62f   : > { %12264 = vmatpush3.bf16.msra.mxu0 %v13166_v36 }
 0x631   : > { %12200 = vmatpush3.bf16.msra.mxu1 %v13146_v8 }
 0x632   : > { %12201 = vmatprep.subr.bf16.mxu1 %v13147_v60 }
 0x635   : > { %12202 = vmatpush3.bf16.msra.mxu1 %v13148_v18 }
 0x636   : > { %12203 = vmatprep.subr.bf16.mxu1 %v13149_v43 }
 0x639   : > { %12204 = vmatpush3.bf16.msra.mxu1 %v13150_v3 }
 0x63a   : > { %12229 = vmatprep.subr.bf16.mxu1 %v13493_v22 }
 0x63c   : > { %10739 = vmatmul.mubr.bf16.vlgmr.msra.gmra.mrb[136].mxu1 %v9496_v23 }
 0x63d   : > { %12230 = vmatpush3.bf16.msra.mxu1 %v13151_v21  ;;  %12245 = vmatprep.mubr.msk.bf16.mxu1 %vm13494_vm5, %v13493_v22 }
 0x63e   : > { %12231 = vmatprep.subr.bf16.mxu1 %v13493_v22 }
 0x641   : > { %12232 = vmatpush3.bf16.msra.mxu1 %v13152_v34 }
 0x642   : > { %12233 = vmatprep.subr.bf16.mxu1 %v13493_v22 }
 0x645   : > { %12234 = vmatpush3.bf16.msra.mxu1 %v13153_v1 }
 0x646   : > { %12235 = vmatprep.subr.bf16.mxu1 %v13493_v22 }
 0x649   : > { %12236 = vmatpush3.bf16.msra.mxu1 %v13154_v27  ;;  %v11771_v27 = vld [vmem:[#allocation14] ss:$0 sm:$0xff] }
 0x64a   : > { %12237 = vmatprep.subr.bf16.mxu1 %v13493_v22 }
 0x64d   : > { %12238 = vmatpush3.bf16.msra.mxu1 %v13155_v53 }
 0x64e   : > { %12239 = vmatprep.subr.bf16.mxu1 %v13493_v22 }
 0x64f   : > { %v12073_v50 = vpop.f32.mrb[112].mxu1 }
 0x650   : > { %v12074_v57 = vpop.f32.mrb[113].mxu1 }
 0x651   : > { %v12075_v7 = vadd.f32 %v12074_v57, %v12073_v50  ;;  %12240 = vmatpush3.bf16.msra.mxu1 %v13156_v48  ;;  %v12076_v6 = vpop.f32.mrb[114].mxu1 }
 0x652   : > { %v12077_v40 = vpop.f32.mrb[115].mxu1  ;;  %12241 = vmatprep.subr.bf16.mxu1 %v13493_v22 }
 0x653   : > { %v10501_v17 = vadd.f32 %v12075_v7, %v11650_v56 }
 0x655   : > { %12242 = vmatpush3.bf16.msra.mxu1 %v13157_v46 }
 0x656   : > { %12243 = vmatprep.subr.bf16.mxu1 %v13493_v22 }
 0x659   : > { %12244 = vmatpush3.bf16.msra.mxu1 %v13158_v58 }
 0x65c   : > { %12246 = vmatmul.mubr.bf16.vlgmr.msra.gmra.mrb[140].mxu1 %v9498_v4 }
 0x66f   : > { %v12095_v61 = vpop.f32.mrb[116].mxu1 }
 0x670   : > { %v12096_v44 = vpop.f32.mrb[117].mxu1 }
 0x671   : > { %v12097_v24 = vadd.f32 %v12096_v44, %v12095_v61  ;;  %v12098_v2 = vpop.f32.mrb[118].mxu1 }
 0x672   : > { %v12099_v37 = vpop.f32.mrb[119].mxu1 }
 0x673   : > { %v10541_v35 = vadd.f32 %v12097_v24, %v10501_v17 }
 0x68f   : > { %v12117_v38 = vpop.f32.mrb[120].mxu1 }
 0x690   : > { %v12118_v51 = vpop.f32.mrb[121].mxu1 }
 0x691   : > { %v12119_v13 = vadd.f32 %v12118_v51, %v12117_v38  ;;  %v12120_v45 = vpop.f32.mrb[122].mxu1 }
 0x692   : > { %v12121_v29 = vpop.f32.mrb[123].mxu1 }
 0x693   : > { %v10581_v0 = vadd.f32 %v12119_v13, %v10541_v35 }
 0x6af   : > { %v12139_v12 = vpop.f32.mrb[124].mxu1 }
 0x6b0   : > { %v12140_v14 = vpop.f32.mrb[125].mxu1 }
 0x6b1   : > { %v12141_v62 = vadd.f32 %v12140_v14, %v12139_v12  ;;  %v12142_v49 = vpop.f32.mrb[126].mxu1 }
 0x6b2   : > { %v12143_v30 = vpop.f32.mrb[127].mxu1 }
 0x6b3   : > { %v10621_v59 = vadd.f32 %v12141_v62, %v10581_v0 }
 0x6cf   : > { %v12161_v19 = vpop.f32.mrb[128].mxu1 }
 0x6d0   : > { %v12162_v5 = vpop.f32.mrb[129].mxu1 }
 0x6d1   : > { %v12163_v55 = vadd.f32 %v12162_v5, %v12161_v19  ;;  %v12164_v42 = vpop.f32.mrb[130].mxu1 }
 0x6d2   : > { %v12165_v54 = vpop.f32.mrb[131].mxu1 }
 0x6d3   : > { %v10661_v9 = vadd.f32 %v12163_v55, %v10621_v59 }
 0x6ef   : > { %v12183_v52 = vpop.f32.mrb[132].mxu1 }
 0x6f0   : > { %v12184_v10 = vpop.f32.mrb[133].mxu1 }
 0x6f1   : > { %v12185_v16 = vadd.f32 %v12184_v10, %v12183_v52  ;;  %v12186_v8 = vpop.f32.mrb[134].mxu1 }
 0x6f2   : > { %v12187_v60 = vpop.f32.mrb[135].mxu1 }
 0x6f3   : > { %v10701_v47 = vadd.f32 %v12185_v16, %v10661_v9 }
 0x70f   : > { %v12205_v18 = vpop.f32.mrb[136].mxu1 }
 0x710   : > { %v12206_v31 = vpop.f32.mrb[137].mxu1 }
 0x711   : > { %v12207_v33 = vadd.f32 %v12206_v31, %v12205_v18  ;;  %v12208_v43 = vpop.f32.mrb[138].mxu1 }
 0x712   : > { %v12209_v22 = vpop.f32.mrb[139].mxu1 }
 0x713   : > { %v10741_v26 = vadd.f32 %v12207_v33, %v10701_v47 }
 0x72f   : > { %v10780_v3 = vpop.f32.mrb[140].mxu1 }
 0x730   : > { %v10781_v11 = vadd.f32 %v10780_v3, %v10741_v26  ;;  %v12247_v25 = vpop.f32.mrb[141].mxu1 }
 0x731   : > { %v10783_v21 = vpop.f32.mrb[142].mxu1 }
 0x732   : > { %v10786_v23 = vmax.f32 %v10781_v11, 0.0  ;;  %v12248_v34 = vpop.f32.mrb[143].mxu1 }
 0x734   : > { %v10787_v1 = vpack.c.bf16 %v10786_v23, %v10786_v23 }
 0x736   : > { %12266 = vmatmul.mubr.bf16.vlgmr.msra.gmra.mrb[28].mxu0 %v10787_v1 }
 0x809   : > { %v10893_v53 = vpop.f32.mrb[28].mxu0 }
 0x80a   : > { %v10894_v48 = vadd.f32 %v11771_v27, %v10893_v53  ;;  %v12267_v50 = vpop.f32.mrb[29].mxu0 }
 0x80b   : > { %v10896_v57 = vpop.f32.mrb[30].mxu0 }
 0x80c   : > { %10899 = vst [vmem:[%s437_s18] sm:$0xf] %v10894_v48  ;;  %v12268_v7 = vpop.f32.mrb[31].mxu0 }
 0x80d   : > { %13404 = shalt.err (!%p13401_p9)
}
 0x80e   : > { %s13405_s26 = scalar_lea.hbm %s16136_s15, 64  ;;  %s13409_s17 = scalar_lea.hbm %s16187_s9, 128 }
 0x80f   : > { %p13406_p12 = scmp.ne.s32.totalorder %s16136_s15, %s13405_s26  ;;  %p13410_p3 = scmp.lt.u32.totalorder %s16136_s15, %s16187_s9 }
 0x810   : > { %p13411_p4 = scmp.lt.u32.totalorder %s13409_s17, %s13405_s26  ;;  %p13413_p8 = scmp.lt.u32.totalorder %s13405_s26, %s16136_s15 }
 0x811   : > { %p13407_p10 = pnand %p13406_p12, %p16389_p11 }
 0x812   : > { %p13412_p7 = por %p13411_p4, %p13410_p3 }
 0x813   : > { %p13408_p2 = pneg %p13407_p10 }
 0x814   : > { %p13414_p13 = por %p13413_p8, %p13412_p7 }
 0x816   : > { %p13415_p0 = pnand %p13414_p13, %p13408_p2 }
 0x818   : > { %13418 = shalt.err (!%p13415_p0)
}
 0x819   : > { %12395 = dma.vmem_to_hbm [thread:$0]  (%p16389_p11), %s16138_s27, 64, %s16136_s15, %s10901_s14  }
 0x81a PF: > { %p12442_p1 = scmp.ge.s32.totalorder %s13473_s12, 2  ;;  %s10926_s11 = sand.u32 1, %s13461_s30  }
 0x81b   : > { %p16390_p6 = scmp.ne.s32.totalorder %s16270_s20, 0  ;;  %s10927_s28 = scalar_lea.sflag [#allocation4], %s10926_s11 }
 0x81d   : > { %p12423_p5 = pnand %p12442_p1, %p16390_p6 }
 0x81f   : > { %13456 = dma.done.wait (!%p12423_p5), %s10927_s28, 64  }
 0x820   : > { %13458 = vsyncadd (!%p12423_p5), %s10927_s28, 4294967232  ;;  %s16391_s12 = sld [smem:[#allocation24_spill]]  ;;  %s16392_s18 = sld [smem:[#allocation23_spill]] }
 0x821   : > { %s16393_s11 = sld [smem:[#allocation25_spill]]  ;;  %s16394_s30 = smov %s13465_s10 }
 0x826   : > { %p24_p9 = scmp.ge.s32.totalorder %s16391_s12, 4   ;;  %s16395_s10 = smov %s16392_s18 }
 0x828   :  { %26 = sbr.rel (!%p24_p9) target bundleno = 11 (0xb), region = 124 }
 0x82f   :  { %10932 = vsyncpa [#allocation3], 1 }
 0x830   :  { %10934 = vsyncpa [#allocation3 + $0x1], 1 }
 0x831   :  { %10935 = vsyncpa [#allocation6], 1 }
 0x832   :  { %10936 = vsyncpa [#allocation9], 1 }
 0x833   :  { %10937 = vsyncpa [#allocation12], 1 }
 0x834   :  { %10938 = vsyncpa [#allocation15], 1 }
 0x835   :  { %10939 = vsyncpa [#allocation4], 1 }
 0x836   :  { %10941 = vsyncpa [#allocation4 + $0x1], 1 }

</bundles_post_ra>
